<compile_context>
chip_gen: v7x
topology: tpu7x:2x2x1
jax: 0.10.0
libtpu: 0.0.40
codegen_flags: <defaults>
</compile_context>

<pallas_src>
import functools
import math

import jax
import jax.numpy as jnp
from jax import lax
from jax.experimental import pallas as pl
from jax.experimental.pallas import tpu as pltpu

# ---------------- model hyper-parameters (from the module __init__) --------------
D_CHAR = 64
D_POS = 64
D_MODEL = D_CHAR + 2 * D_POS          # 192
N_HEAD = 8
HEAD_DIM = D_MODEL // N_HEAD          # 24
D_FF = 4 * D_MODEL                    # 768
HIDDEN = 128
N_CLASSES = 40
OUT_PAD = 128                         # lane-dense padded logit width (sliced to 40 outside)
N_LAYERS = 2
SIGMA = 16.0
EPS = 1e-5
ATTN_SCALE = HEAD_DIM ** (-0.5)
GATE = 1.0 / (1.0 + math.exp(-1.0))   # sigmoid(1.0): use_kernel_attn=False buffer gate
SQRT_HALF = 0.7071067811865476
NEG_INF = -1e30

# MXU operand dtype: bf16 operands (f32 accumulation) hit the native MXU path on
# v5e/v6e/v7x.  Set to jnp.float32 to restore bit-exact reference numerics.
MXU_DTYPE = jnp.bfloat16


# ---------------- lazy, cached capability probes ----------------------------------
@functools.lru_cache(maxsize=None)
def _erf_lowers():
    """Check (once, lazily) whether lax.erf lowers inside a Pallas TPU kernel."""
    try:
        def k(x_ref, o_ref):
            o_ref[...] = lax.erf(x_ref[...])
        x = jnp.linspace(-3.0, 3.0, 8 * 128, dtype=jnp.float32).reshape(8, 128)
        y = pl.pallas_call(k, out_shape=jax.ShapeDtypeStruct((8, 128), jnp.float32))(x)
        return bool(jnp.max(jnp.abs(y - lax.erf(x))) < 1e-5)
    except Exception:
        return False


@functools.lru_cache(maxsize=None)
def _buffered1_ok():
    """Check (once, lazily) whether pipeline_mode=pl.Buffered(1) single-buffering works."""
    try:
        wspec = pl.BlockSpec((8, 128), lambda i: (0, 0),
                             pipeline_mode=pl.Buffered(buffer_count=1))

        def k(w_ref, x_ref, o_ref):
            o_ref[...] = x_ref[...] + w_ref[...]

        w = jnp.full((8, 128), 1.0, jnp.float32)
        x = jnp.full((16, 128), 1.0, jnp.float32)
        y = pl.pallas_call(
            k, grid=(2,),
            in_specs=[wspec, pl.BlockSpec((8, 128), lambda i: (i, 0))],
            out_specs=pl.BlockSpec((8, 128), lambda i: (i, 0)),
            out_shape=jax.ShapeDtypeStruct((16, 128), jnp.float32),
        )(w, x)
        return bool(jnp.all(y == 2.0))
    except Exception:
        return False


# ---------------- exact GELU (erf) -------------------------------------------------
def _erf_from_exp(z):
    # Abramowitz & Stegun 7.1.26 (max abs err ~1.5e-7); uses only exp (EUP slot).
    a = jnp.abs(z)
    t = 1.0 / (1.0 + 0.3275911 * a)
    poly = ((((1.061405429 * t - 1.453152027) * t + 1.421413741) * t
             - 0.284496736) * t + 0.254829592) * t
    y = 1.0 - poly * jnp.exp(-a * a)
    return jnp.where(z < 0.0, -y, y)


def _gelu_exact(x, erf):
    return 0.5 * x * (1.0 + erf(x * SQRT_HALF))


# ---------------- in-kernel helpers ------------------------------------------------
def _layernorm(x, gamma, beta):
    mu = jnp.mean(x, axis=-1, keepdims=True)
    var = jnp.mean((x - mu) ** 2, axis=-1, keepdims=True)
    return (x - mu) * lax.rsqrt(var + EPS) * gamma + beta


def _softmax(x):
    m = jnp.max(x, axis=-1, keepdims=True)
    e = jnp.exp(x - m)
    return e * pl.reciprocal(jnp.sum(e, axis=-1, keepdims=True), approx=True)


def _nt(a, b):
    # a (m, d) @ b (n, d)^T -> (m, n), f32 accumulation on the MXU
    return lax.dot_general(a, b, (((1,), (1,)), ((), ())),
                           preferred_element_type=jnp.float32)


# ---------------- fused whole-model kernel -----------------------------------------
def model_kernel(
    x_ref, pos_ref,
    ln1g_ref, ln1b_ref,
    wq_ref, bq_ref, wk_ref, bk_ref, wv_ref, bv_ref, wo_ref, bo_ref,
    ln2g_ref, ln2b_ref,
    wff1_ref, bff1_ref, wff2_ref, bff2_ref,
    wc_ref, bc_ref, wh_ref, bh_ref,
    out_ref,
    *, erf,
):
    x = x_ref[...]                                   # (R, 192) f32, R = BB*T rows

    # --- position features (built in the wrapper): two exact f32 NT matmuls give the
    #     squared pair distances and the (batch_i - batch_j)^2 penalty -------------
    ga = pos_ref[0]                                  # [posv, posh, |p|^2, 1]      (R, 4)
    gb = pos_ref[1]                                  # [-2posv, -2posh, 1, |p|^2]  (R, 4)
    ba = pos_ref[2]                                  # [bid^2, -2bid, 1, 0]        (R, 4)
    bb = pos_ref[3]                                  # [1, bid, bid^2, 0]          (R, 4)
    dist_sq = _nt(ga, gb)                            # (R, R), exact for int positions
    pen = _nt(ba, bb)                                # (R, R), 0 iff same batch element
    bd = pen < 0.5                                   # block-diagonal (same-batch) mask

    # --- 2-D Gaussian kernel-attention weights: position-only -> layer-invariant;
    #     (1 - GATE) folded into the row normalization ----------------------------
    kwu = jnp.where(bd, jnp.exp(dist_sq * (-1.0 / (2.0 * SIGMA * SIGMA))), 0.0)
    kw_inv = pl.reciprocal(jnp.sum(kwu, axis=-1, keepdims=True), approx=True)
    kw = (kwu * ((1.0 - GATE) * kw_inv)).astype(MXU_DTYPE)

    lane = lax.broadcasted_iota(jnp.int32, (1, D_MODEL), 1)   # head-mask lane index

    for l in range(N_LAYERS):                        # 2 layers: static unroll is fine
        # ---- norm1 + fused lane-dense QKV projections (single bias add each) ----
        xn = _layernorm(x, ln1g_ref[l], ln1b_ref[l])
        xn_m = xn.astype(MXU_DTYPE)
        q = jnp.dot(xn_m, wq_ref[l], preferred_element_type=jnp.float32) + bq_ref[l]
        k = jnp.dot(xn_m, wk_ref[l], preferred_element_type=jnp.float32) + bk_ref[l]
        v = jnp.dot(xn_m, wv_ref[l], preferred_element_type=jnp.float32) + bv_ref[l]
        k_m = k.astype(MXU_DTYPE)

        # ---- 8-head attention: lane masks instead of 24-wide slices; block-diag
        #      mask keeps folded batch elements independent ----
        def head_body(h, acc):
            lo = h * HEAD_DIM
            m_h = ((lane >= lo) & (lane < lo + HEAD_DIM)).astype(jnp.float32)  # (1,192)
            s = _nt((q * m_h).astype(MXU_DTYPE), k_m) * ATTN_SCALE             # (R, R)
            p = _softmax(jnp.where(bd, s, NEG_INF))
            # columns outside head h are exactly zero -> summing heads == concat
            return acc + jnp.dot(p.astype(MXU_DTYPE), (v * m_h).astype(MXU_DTYPE),
                                 preferred_element_type=jnp.float32)

        heads = lax.fori_loop(0, N_HEAD, head_body, jnp.zeros_like(x))         # (R,192)

        # ---- fused out-projection (GATE pre-folded) + kernel attention ----
        std_out = jnp.dot(heads.astype(MXU_DTYPE), wo_ref[l],
                          preferred_element_type=jnp.float32) + bo_ref[l]
        kern_out = jnp.dot(kw, xn_m, preferred_element_type=jnp.float32)
        x = x + std_out + kern_out

        # ---- norm2 + MLP with in-kernel exact GELU (element-wise math in f32) ----
        xn2 = _layernorm(x, ln2g_ref[l], ln2b_ref[l])
        h1 = jnp.dot(xn2.astype(MXU_DTYPE), wff1_ref[l],
                     preferred_element_type=jnp.float32) + bff1_ref[l]
        h1 = _gelu_exact(h1, erf)
        x = x + jnp.dot(h1.astype(MXU_DTYPE), wff2_ref[l],
                        preferred_element_type=jnp.float32) + bff2_ref[l]

    # ---- classifier + output head; lane-dense 128-wide padded logit store ----
    hidden = jnp.dot(x.astype(MXU_DTYPE), wc_ref[...],
                     preferred_element_type=jnp.float32) + bc_ref[...]
    out_ref[...] = jnp.dot(hidden.astype(MXU_DTYPE), wh_ref[...],
                           preferred_element_type=jnp.float32) + bh_ref[...]


# ---------------- pallas_call wrapper -----------------------------------------------
_WEIGHT_KEYS = ("ln1_g", "ln1_b",
                "wq", "bq", "wk", "bk", "wv", "bv", "wo", "bo",
                "ln2_g", "ln2_b",
                "wff1", "bff1", "wff2", "bff2",
                "wc", "bc", "wh", "bh")
_MXU_KEYS = frozenset({"wq", "wk", "wv", "wo", "wff1", "wff2", "wc", "wh"})


def _pick_bb(batch, seq, max_rows=128):
    """Largest batch fold (rows per grid step = BB*seq) that keeps blocks tile-legal,
    <= max_rows MXU rows, and (when possible) >= 2 grid steps for v7x megacore."""
    if seq % 8 != 0:
        return batch                      # full-array block is always legal
    ok = [d for d in range(1, batch + 1) if batch % d == 0 and d * seq <= max_rows]
    if not ok:
        return 1
    pref = [d for d in ok if batch // d >= 2]
    return max(pref) if pref else max(ok)


def fused_model(x_flat, posf, params, seq, *, max_rows=128):
    total_rows, d = x_flat.shape
    batch = total_rows // seq
    bb = _pick_bb(batch, seq, max_rows)
    rows = bb * seq
    grid = (batch // bb,)

    erf = lax.erf if _erf_lowers() else _erf_from_exp
    single_buf = _buffered1_ok()

    def wspec(shape):
        nd = len(shape)
        imap = lambda i, nd=nd: (0,) * nd
        if single_buf:
            # grid-invariant weights: single-buffer them (halves their VMEM footprint)
            return pl.BlockSpec(tuple(shape), imap,
                                pipeline_mode=pl.Buffered(buffer_count=1))
        return pl.BlockSpec(tuple(shape), imap)

    weights = [params[k].astype(MXU_DTYPE) if k in _MXU_KEYS else params[k]
               for k in _WEIGHT_KEYS]

    in_specs = ([pl.BlockSpec((rows, d), lambda i: (i, 0)),
                 pl.BlockSpec((4, rows, 4), lambda i: (0, i, 0))]
                + [wspec(w.shape) for w in weights])

    return pl.pallas_call(
        functools.partial(model_kernel, erf=erf),
        grid=grid,
        in_specs=in_specs,
        out_specs=pl.BlockSpec((rows, OUT_PAD), lambda i: (i, 0)),
        out_shape=jax.ShapeDtypeStruct((total_rows, OUT_PAD), jnp.float32),
        compiler_params=pltpu.CompilerParams(
            dimension_semantics=("parallel",),      # shard batch blocks across v7x's 2 TCs
            vmem_limit_bytes=32 * 1024 * 1024,
        ),
    )(x_flat, posf, *weights)


# ---------------- parameters (kernel-ready layouts, GATE folded at prep time) --------
def init_params(key, vocab_size, max_pos):
    keys = iter(jax.random.split(key, 24))

    def nrm(shape, scale=0.02):
        return (scale * jax.random.normal(next(keys), shape)).astype(jnp.float32)

    L = N_LAYERS
    wh = nrm((HIDDEN, N_CLASSES))
    bh = nrm((1, N_CLASSES))
    return {
        "char_emb": nrm((vocab_size, D_CHAR)),
        "posv_emb": nrm((max_pos, D_POS)),
        "posh_emb": nrm((max_pos, D_POS)),
        "ln1_g": jnp.ones((L, 1, D_MODEL), jnp.float32),
        "ln1_b": jnp.zeros((L, 1, D_MODEL), jnp.float32),
        "ln2_g": jnp.ones((L, 1, D_MODEL), jnp.float32),
        "ln2_b": jnp.zeros((L, 1, D_MODEL), jnp.float32),
        # fused in-proj pieces, stored as W^T so the kernel computes y = x @ W
        "wq": nrm((L, D_MODEL, D_MODEL), 0.05), "bq": nrm((L, 1, D_MODEL)),
        "wk": nrm((L, D_MODEL, D_MODEL), 0.05), "bk": nrm((L, 1, D_MODEL)),
        "wv": nrm((L, D_MODEL, D_MODEL), 0.05), "bv": nrm((L, 1, D_MODEL)),
        # out_proj (W^T) with gate = sigmoid(1.0) folded in once at prep time
        "wo": GATE * nrm((L, D_MODEL, D_MODEL), 0.05),
        "bo": GATE * nrm((L, 1, D_MODEL)),
        "wff1": nrm((L, D_MODEL, D_FF), 0.05), "bff1": nrm((L, 1, D_FF)),
        "wff2": nrm((L, D_FF, D_MODEL), 0.05), "bff2": nrm((L, 1, D_MODEL)),
        "wc": nrm((D_MODEL, HIDDEN)), "bc": nrm((1, HIDDEN)),
        # output head zero-padded to a lane-dense 128-wide block (sliced to 40 outside)
        "wh": jnp.zeros((HIDDEN, OUT_PAD), jnp.float32).at[:, :N_CLASSES].set(wh),
        "bh": jnp.zeros((1, OUT_PAD), jnp.float32).at[:, :N_CLASSES].set(bh),
    }


# ---------------- forward (embedding/positional glue in JAX, hot path fused) ---------
@jax.jit
def forward(params, input_ids, posv, posh):
    # TODO(synk): attention_mask / key_padding_mask path not implemented (always None here).
    batch, seq = input_ids.shape
    char = jnp.take(params["char_emb"], input_ids, axis=0)
    pv = jnp.take(params["posv_emb"], posv, axis=0)
    ph = jnp.take(params["posh_emb"], posh, axis=0)
    x = jnp.concatenate([char, pv, ph], axis=-1).astype(jnp.float32)       # (B, T, 192)
    x_flat = x.reshape(batch * seq, D_MODEL)

    # O(T) per-token position features; the kernel rebuilds the (R,R) Gaussian weights
    # and the block-diagonal batch mask from these with two exact f32 matmuls.
    pvf = posv.astype(jnp.float32)
    phf = posh.astype(jnp.float32)
    bid = jnp.broadcast_to(jnp.arange(batch, dtype=jnp.float32)[:, None], (batch, seq))
    sq = pvf * pvf + phf * phf
    one = jnp.ones_like(pvf)
    zero = jnp.zeros_like(pvf)
    ga = jnp.stack([pvf, phf, sq, one], axis=-1)
    gb = jnp.stack([-2.0 * pvf, -2.0 * phf, one, sq], axis=-1)
    ba = jnp.stack([bid * bid, -2.0 * bid, one, zero], axis=-1)
    bb = jnp.stack([one, bid, bid * bid, zero], axis=-1)
    posf = jnp.stack([ga, gb, ba, bb], axis=0).reshape(4, batch * seq, 4)

    out = fused_model(x_flat, posf, params, seq)
    return out.reshape(batch, seq, OUT_PAD)[:, :, :N_CLASSES]


# ---------------- driver ---------------------------------------------------------------
if __name__ == "__main__":
    B, T = 2, 8
    VOCAB, MAX_POS = 50, 64

    key = jax.random.PRNGKey(0)
    kp, ki, kv, kh = jax.random.split(key, 4)
    params = init_params(kp, VOCAB, MAX_POS)

    input_ids = jax.random.randint(ki, (B, T), 0, VOCAB, dtype=jnp.int32)
    posv = jax.random.randint(kv, (B, T), 0, MAX_POS, dtype=jnp.int32)
    posh = jax.random.randint(kh, (B, T), 0, MAX_POS, dtype=jnp.int32)

    logits = forward(params, input_ids, posv, posh)
    jax.block_until_ready(logits)
    assert logits.shape == (B, T, N_CLASSES) and logits.dtype == jnp.float32
    assert bool(jnp.all(jnp.isfinite(logits)))
    print("KERNEL_OK")
</pallas_src>

<mosaic_0001>
module attributes {stable_mosaic.version = 11 : i64} {
  func.func @model_kernel(%arg0: i32, %arg1: memref<8x192xf32, #tpu.memory_space<vmem>>, %arg2: memref<4x8x4xf32, #tpu.memory_space<vmem>>, %arg3: memref<2x1x192xf32, #tpu.memory_space<vmem>>, %arg4: memref<2x1x192xf32, #tpu.memory_space<vmem>>, %arg5: memref<2x192x192xbf16, #tpu.memory_space<vmem>>, %arg6: memref<2x1x192xf32, #tpu.memory_space<vmem>>, %arg7: memref<2x192x192xbf16, #tpu.memory_space<vmem>>, %arg8: memref<2x1x192xf32, #tpu.memory_space<vmem>>, %arg9: memref<2x192x192xbf16, #tpu.memory_space<vmem>>, %arg10: memref<2x1x192xf32, #tpu.memory_space<vmem>>, %arg11: memref<2x192x192xbf16, #tpu.memory_space<vmem>>, %arg12: memref<2x1x192xf32, #tpu.memory_space<vmem>>, %arg13: memref<2x1x192xf32, #tpu.memory_space<vmem>>, %arg14: memref<2x1x192xf32, #tpu.memory_space<vmem>>, %arg15: memref<2x192x768xbf16, #tpu.memory_space<vmem>>, %arg16: memref<2x1x768xf32, #tpu.memory_space<vmem>>, %arg17: memref<2x768x192xbf16, #tpu.memory_space<vmem>>, %arg18: memref<2x1x192xf32, #tpu.memory_space<vmem>>, %arg19: memref<192x128xbf16, #tpu.memory_space<vmem>>, %arg20: memref<1x128xf32, #tpu.memory_space<vmem>>, %arg21: memref<128x128xbf16, #tpu.memory_space<vmem>>, %arg22: memref<1x128xf32, #tpu.memory_space<vmem>>, %arg23: memref<8x128xf32, #tpu.memory_space<vmem>>) attributes {dimension_semantics = [#tpu.dimension_semantics<parallel>], iteration_bounds = array<i64: 2>, scalar_prefetch = 0 : i64, scratch_operands = 0 : i64, tpu.core_type = #tpu.core_type<tc>, window_params = [{transform_indices = @transform_0, window_bounds = array<i64: 8, 192>}, {transform_indices = @transform_1, window_bounds = array<i64: 4, 8, 4>}, {pipeline_mode = #tpu.pipeline_mode<synchronous>, transform_indices = @transform_2, window_bounds = array<i64: 2, 1, 192>}, {pipeline_mode = #tpu.pipeline_mode<synchronous>, transform_indices = @transform_3, window_bounds = array<i64: 2, 1, 192>}, {pipeline_mode = #tpu.pipeline_mode<synchronous>, transform_indices = @transform_4, window_bounds = array<i64: 2, 192, 192>}, {pipeline_mode = #tpu.pipeline_mode<synchronous>, transform_indices = @transform_5, window_bounds = array<i64: 2, 1, 192>}, {pipeline_mode = #tpu.pipeline_mode<synchronous>, transform_indices = @transform_6, window_bounds = array<i64: 2, 192, 192>}, {pipeline_mode = #tpu.pipeline_mode<synchronous>, transform_indices = @transform_7, window_bounds = array<i64: 2, 1, 192>}, {pipeline_mode = #tpu.pipeline_mode<synchronous>, transform_indices = @transform_8, window_bounds = array<i64: 2, 192, 192>}, {pipeline_mode = #tpu.pipeline_mode<synchronous>, transform_indices = @transform_9, window_bounds = array<i64: 2, 1, 192>}, {pipeline_mode = #tpu.pipeline_mode<synchronous>, transform_indices = @transform_10, window_bounds = array<i64: 2, 192, 192>}, {pipeline_mode = #tpu.pipeline_mode<synchronous>, transform_indices = @transform_11, window_bounds = array<i64: 2, 1, 192>}, {pipeline_mode = #tpu.pipeline_mode<synchronous>, transform_indices = @transform_12, window_bounds = array<i64: 2, 1, 192>}, {pipeline_mode = #tpu.pipeline_mode<synchronous>, transform_indices = @transform_13, window_bounds = array<i64: 2, 1, 192>}, {pipeline_mode = #tpu.pipeline_mode<synchronous>, transform_indices = @transform_14, window_bounds = array<i64: 2, 192, 768>}, {pipeline_mode = #tpu.pipeline_mode<synchronous>, transform_indices = @transform_15, window_bounds = array<i64: 2, 1, 768>}, {pipeline_mode = #tpu.pipeline_mode<synchronous>, transform_indices = @transform_16, window_bounds = array<i64: 2, 768, 192>}, {pipeline_mode = #tpu.pipeline_mode<synchronous>, transform_indices = @transform_17, window_bounds = array<i64: 2, 1, 192>}, {pipeline_mode = #tpu.pipeline_mode<synchronous>, transform_indices = @transform_18, window_bounds = array<i64: 192, 128>}, {pipeline_mode = #tpu.pipeline_mode<synchronous>, transform_indices = @transform_19, window_bounds = array<i64: 1, 128>}, {pipeline_mode = #tpu.pipeline_mode<synchronous>, transform_indices = @transform_20, window_bounds = array<i64: 128, 128>}, {pipeline_mode = #tpu.pipeline_mode<synchronous>, transform_indices = @transform_21, window_bounds = array<i64: 1, 128>}, {transform_indices = @transform_22, window_bounds = array<i64: 8, 128>}]} {
    %c0 = arith.constant 0 : index
    %c0_0 = arith.constant 0 : index
    %0 = vector.load %arg1[%c0, %c0_0] : memref<8x192xf32, #tpu.memory_space<vmem>>, vector<8x192xf32>
    %c0_1 = arith.constant 0 : index
    %c0_2 = arith.constant 0 : index
    %c0_3 = arith.constant 0 : index
    %1 = vector.load %arg2[%c0_1, %c0_2, %c0_3] : memref<4x8x4xf32, #tpu.memory_space<vmem>>, vector<1x8x4xf32>
    %2 = vector.shape_cast %1 : vector<1x8x4xf32> to vector<8x4xf32>
    %c1 = arith.constant 1 : index
    %c0_4 = arith.constant 0 : index
    %c0_5 = arith.constant 0 : index
    %3 = vector.load %arg2[%c1, %c0_4, %c0_5] : memref<4x8x4xf32, #tpu.memory_space<vmem>>, vector<1x8x4xf32>
    %4 = vector.shape_cast %3 : vector<1x8x4xf32> to vector<8x4xf32>
    %c2 = arith.constant 2 : index
    %c0_6 = arith.constant 0 : index
    %c0_7 = arith.constant 0 : index
    %5 = vector.load %arg2[%c2, %c0_6, %c0_7] : memref<4x8x4xf32, #tpu.memory_space<vmem>>, vector<1x8x4xf32>
    %6 = vector.shape_cast %5 : vector<1x8x4xf32> to vector<8x4xf32>
    %c3 = arith.constant 3 : index
    %c0_8 = arith.constant 0 : index
    %c0_9 = arith.constant 0 : index
    %7 = vector.load %arg2[%c3, %c0_8, %c0_9] : memref<4x8x4xf32, #tpu.memory_space<vmem>>, vector<1x8x4xf32>
    %8 = vector.shape_cast %7 : vector<1x8x4xf32> to vector<8x4xf32>
    %cst = arith.constant dense<0.000000e+00> : vector<8x8xf32>
    %9 = tpu.matmul %2, %4, %cst {dimension_numbers = #tpu.dot_dimension_numbers<[1], [1], [0], [0], [0, 0, 1, 0], [], []>} : vector<8x4xf32>, vector<8x4xf32>, vector<8x8xf32> -> vector<8x8xf32>
    %cst_10 = arith.constant dense<0.000000e+00> : vector<8x8xf32>
    %10 = tpu.matmul %6, %8, %cst_10 {dimension_numbers = #tpu.dot_dimension_numbers<[1], [1], [0], [0], [0, 0, 1, 0], [], []>} : vector<8x4xf32>, vector<8x4xf32>, vector<8x8xf32> -> vector<8x8xf32>
    %cst_11 = arith.constant 5.000000e-01 : f32
    %11 = vector.broadcast %cst_11 : f32 to vector<8x8xf32>
    %12 = arith.cmpf olt, %10, %11 : vector<8x8xf32>
    %cst_12 = arith.constant -0.001953125 : f32
    %13 = vector.broadcast %cst_12 : f32 to vector<8x8xf32>
    %14 = arith.mulf %9, %13 : vector<8x8xf32>
    %15 = math.exp %14 : vector<8x8xf32>
    %cst_13 = arith.constant 0.000000e+00 : f32
    %16 = vector.broadcast %cst_13 : f32 to vector<8x8xf32>
    %17 = arith.select %12, %15, %16 : vector<8x8xi1>, vector<8x8xf32>
    %cst_14 = arith.constant dense<0.000000e+00> : vector<8xf32>
    %18 = vector.multi_reduction <add>, %17, %cst_14 [1] : vector<8x8xf32> to vector<8xf32>
    %19 = vector.shape_cast %18 : vector<8xf32> to vector<8x1xf32>
    %20 = tpu.reciprocal %19 {approx = true} : vector<8x1xf32> -> vector<8x1xf32>
    %cst_15 = arith.constant 0.268941432 : f32
    %21 = vector.broadcast %cst_15 : f32 to vector<8x1xf32>
    %22 = arith.mulf %21, %20 : vector<8x1xf32>
    %23 = vector.broadcast %22 : vector<8x1xf32> to vector<8x8xf32>
    %24 = arith.mulf %17, %23 : vector<8x8xf32>
    %25 = arith.truncf %24 : vector<8x8xf32> to vector<8x8xbf16>
    %26 = tpu.iota {dimensions = array<i32: 1>} : vector<1x192xi32>
    %c0_16 = arith.constant 0 : index
    %c0_17 = arith.constant 0 : index
    %c0_18 = arith.constant 0 : index
    %27 = vector.load %arg3[%c0_16, %c0_17, %c0_18] : memref<2x1x192xf32, #tpu.memory_space<vmem>>, vector<1x1x192xf32>
    %28 = vector.shape_cast %27 : vector<1x1x192xf32> to vector<1x192xf32>
    %c0_19 = arith.constant 0 : index
    %c0_20 = arith.constant 0 : index
    %c0_21 = arith.constant 0 : index
    %29 = vector.load %arg4[%c0_19, %c0_20, %c0_21] : memref<2x1x192xf32, #tpu.memory_space<vmem>>, vector<1x1x192xf32>
    %30 = vector.shape_cast %29 : vector<1x1x192xf32> to vector<1x192xf32>
    %cst_22 = arith.constant dense<0.000000e+00> : vector<8xf32>
    %31 = vector.multi_reduction <add>, %0, %cst_22 [1] : vector<8x192xf32> to vector<8xf32>
    %32 = vector.shape_cast %31 : vector<8xf32> to vector<8x1xf32>
    %cst_23 = arith.constant 1.920000e+02 : f32
    %33 = vector.broadcast %cst_23 : f32 to vector<8x1xf32>
    %34 = arith.divf %32, %33 : vector<8x1xf32>
    %35 = vector.broadcast %34 : vector<8x1xf32> to vector<8x192xf32>
    %36 = arith.subf %0, %35 : vector<8x192xf32>
    %37 = arith.mulf %36, %36 : vector<8x192xf32>
    %cst_24 = arith.constant dense<0.000000e+00> : vector<8xf32>
    %38 = vector.multi_reduction <add>, %37, %cst_24 [1] : vector<8x192xf32> to vector<8xf32>
    %39 = vector.shape_cast %38 : vector<8xf32> to vector<8x1xf32>
    %cst_25 = arith.constant 1.920000e+02 : f32
    %40 = vector.broadcast %cst_25 : f32 to vector<8x1xf32>
    %41 = arith.divf %39, %40 : vector<8x1xf32>
    %42 = vector.broadcast %34 : vector<8x1xf32> to vector<8x192xf32>
    %43 = arith.subf %0, %42 : vector<8x192xf32>
    %cst_26 = arith.constant 9.99999974E-6 : f32
    %44 = vector.broadcast %cst_26 : f32 to vector<8x1xf32>
    %45 = arith.addf %41, %44 : vector<8x1xf32>
    %46 = math.rsqrt %45 : vector<8x1xf32>
    %47 = vector.broadcast %46 : vector<8x1xf32> to vector<8x192xf32>
    %48 = arith.mulf %43, %47 : vector<8x192xf32>
    %49 = vector.broadcast %28 : vector<1x192xf32> to vector<8x192xf32>
    %50 = arith.mulf %48, %49 : vector<8x192xf32>
    %51 = vector.broadcast %30 : vector<1x192xf32> to vector<8x192xf32>
    %52 = arith.addf %50, %51 : vector<8x192xf32>
    %53 = arith.truncf %52 : vector<8x192xf32> to vector<8x192xbf16>
    %c0_27 = arith.constant 0 : index
    %c0_28 = arith.constant 0 : index
    %c0_29 = arith.constant 0 : index
    %54 = vector.load %arg5[%c0_27, %c0_28, %c0_29] : memref<2x192x192xbf16, #tpu.memory_space<vmem>>, vector<1x192x192xbf16>
    %55 = vector.shape_cast %54 : vector<1x192x192xbf16> to vector<192x192xbf16>
    %cst_30 = arith.constant dense<0.000000e+00> : vector<8x192xf32>
    %56 = tpu.matmul %53, %55, %cst_30 {dimension_numbers = #tpu.dot_dimension_numbers<[1], [0], [0], [1], [0, 0, 1, 1], [], []>} : vector<8x192xbf16>, vector<192x192xbf16>, vector<8x192xf32> -> vector<8x192xf32>
    %c0_31 = arith.constant 0 : index
    %c0_32 = arith.constant 0 : index
    %c0_33 = arith.constant 0 : index
    %57 = vector.load %arg6[%c0_31, %c0_32, %c0_33] : memref<2x1x192xf32, #tpu.memory_space<vmem>>, vector<1x1x192xf32>
    %58 = vector.shape_cast %57 : vector<1x1x192xf32> to vector<1x192xf32>
    %59 = vector.broadcast %58 : vector<1x192xf32> to vector<8x192xf32>
    %60 = arith.addf %56, %59 : vector<8x192xf32>
    %c0_34 = arith.constant 0 : index
    %c0_35 = arith.constant 0 : index
    %c0_36 = arith.constant 0 : index
    %61 = vector.load %arg7[%c0_34, %c0_35, %c0_36] : memref<2x192x192xbf16, #tpu.memory_space<vmem>>, vector<1x192x192xbf16>
    %62 = vector.shape_cast %61 : vector<1x192x192xbf16> to vector<192x192xbf16>
    %cst_37 = arith.constant dense<0.000000e+00> : vector<8x192xf32>
    %63 = tpu.matmul %53, %62, %cst_37 {dimension_numbers = #tpu.dot_dimension_numbers<[1], [0], [0], [1], [0, 0, 1, 1], [], []>} : vector<8x192xbf16>, vector<192x192xbf16>, vector<8x192xf32> -> vector<8x192xf32>
    %c0_38 = arith.constant 0 : index
    %c0_39 = arith.constant 0 : index
    %c0_40 = arith.constant 0 : index
    %64 = vector.load %arg8[%c0_38, %c0_39, %c0_40] : memref<2x1x192xf32, #tpu.memory_space<vmem>>, vector<1x1x192xf32>
    %65 = vector.shape_cast %64 : vector<1x1x192xf32> to vector<1x192xf32>
    %66 = vector.broadcast %65 : vector<1x192xf32> to vector<8x192xf32>
    %67 = arith.addf %63, %66 : vector<8x192xf32>
    %c0_41 = arith.constant 0 : index
    %c0_42 = arith.constant 0 : index
    %c0_43 = arith.constant 0 : index
    %68 = vector.load %arg9[%c0_41, %c0_42, %c0_43] : memref<2x192x192xbf16, #tpu.memory_space<vmem>>, vector<1x192x192xbf16>
    %69 = vector.shape_cast %68 : vector<1x192x192xbf16> to vector<192x192xbf16>
    %cst_44 = arith.constant dense<0.000000e+00> : vector<8x192xf32>
    %70 = tpu.matmul %53, %69, %cst_44 {dimension_numbers = #tpu.dot_dimension_numbers<[1], [0], [0], [1], [0, 0, 1, 1], [], []>} : vector<8x192xbf16>, vector<192x192xbf16>, vector<8x192xf32> -> vector<8x192xf32>
    %c0_45 = arith.constant 0 : index
    %c0_46 = arith.constant 0 : index
    %c0_47 = arith.constant 0 : index
    %71 = vector.load %arg10[%c0_45, %c0_46, %c0_47] : memref<2x1x192xf32, #tpu.memory_space<vmem>>, vector<1x1x192xf32>
    %72 = vector.shape_cast %71 : vector<1x1x192xf32> to vector<1x192xf32>
    %73 = vector.broadcast %72 : vector<1x192xf32> to vector<8x192xf32>
    %74 = arith.addf %70, %73 : vector<8x192xf32>
    %75 = arith.truncf %67 : vector<8x192xf32> to vector<8x192xbf16>
    %cst_48 = arith.constant 0.000000e+00 : f32
    %76 = vector.broadcast %cst_48 : f32 to vector<8x192xf32>
    %c0_i32 = arith.constant 0 : i32
    %c8_i32 = arith.constant 8 : i32
    %77 = arith.addi %c0_i32, %c8_i32 : i32
    %c1_i32 = arith.constant 1 : i32
    %78 = scf.for %arg24 = %c0_i32 to %77 step %c1_i32 iter_args(%arg25 = %76) -> (vector<8x192xf32>)  : i32 {
      %c24_i32 = arith.constant 24 : i32
      %332 = arith.muli %arg24, %c24_i32 : i32
      %333 = vector.broadcast %332 : i32 to vector<1x192xi32>
      %334 = arith.cmpi sge, %26, %333 : vector<1x192xi32>
      %c24_i32_195 = arith.constant 24 : i32
      %335 = arith.addi %332, %c24_i32_195 : i32
      %336 = vector.broadcast %335 : i32 to vector<1x192xi32>
      %337 = arith.cmpi slt, %26, %336 : vector<1x192xi32>
      %338 = arith.andi %334, %337 : vector<1x192xi1>
      %339 = arith.extui %338 : vector<1x192xi1> to vector<1x192xi32>
      %340 = arith.sitofp %339 : vector<1x192xi32> to vector<1x192xf32>
      %341 = vector.broadcast %340 : vector<1x192xf32> to vector<8x192xf32>
      %342 = arith.mulf %60, %341 : vector<8x192xf32>
      %343 = arith.truncf %342 : vector<8x192xf32> to vector<8x192xbf16>
      %cst_196 = arith.constant dense<0.000000e+00> : vector<8x8xf32>
      %344 = tpu.matmul %343, %75, %cst_196 {dimension_numbers = #tpu.dot_dimension_numbers<[1], [1], [0], [0], [0, 0, 1, 0], [], []>} : vector<8x192xbf16>, vector<8x192xbf16>, vector<8x8xf32> -> vector<8x8xf32>
      %cst_197 = arith.constant 0.204124153 : f32
      %345 = vector.broadcast %cst_197 : f32 to vector<8x8xf32>
      %346 = arith.mulf %344, %345 : vector<8x8xf32>
      %cst_198 = arith.constant -1.000000e+30 : f32
      %347 = vector.broadcast %cst_198 : f32 to vector<8x8xf32>
      %348 = arith.select %12, %346, %347 : vector<8x8xi1>, vector<8x8xf32>
      %cst_199 = arith.constant dense<0xFF800000> : vector<8xf32>
      %349 = vector.multi_reduction <maximumf>, %348, %cst_199 [1] : vector<8x8xf32> to vector<8xf32>
      %350 = vector.shape_cast %349 : vector<8xf32> to vector<8x1xf32>
      %351 = vector.broadcast %350 : vector<8x1xf32> to vector<8x8xf32>
      %352 = arith.subf %348, %351 : vector<8x8xf32>
      %353 = math.exp %352 : vector<8x8xf32>
      %cst_200 = arith.constant dense<0.000000e+00> : vector<8xf32>
      %354 = vector.multi_reduction <add>, %353, %cst_200 [1] : vector<8x8xf32> to vector<8xf32>
      %355 = vector.shape_cast %354 : vector<8xf32> to vector<8x1xf32>
      %356 = tpu.reciprocal %355 {approx = true} : vector<8x1xf32> -> vector<8x1xf32>
      %357 = vector.broadcast %356 : vector<8x1xf32> to vector<8x8xf32>
      %358 = arith.mulf %353, %357 : vector<8x8xf32>
      %359 = arith.truncf %358 : vector<8x8xf32> to vector<8x8xbf16>
      %360 = vector.broadcast %340 : vector<1x192xf32> to vector<8x192xf32>
      %361 = arith.mulf %74, %360 : vector<8x192xf32>
      %362 = arith.truncf %361 : vector<8x192xf32> to vector<8x192xbf16>
      %cst_201 = arith.constant dense<0.000000e+00> : vector<8x192xf32>
      %363 = tpu.matmul %359, %362, %cst_201 {dimension_numbers = #tpu.dot_dimension_numbers<[1], [0], [0], [1], [0, 0, 1, 1], [], []>} : vector<8x8xbf16>, vector<8x192xbf16>, vector<8x192xf32> -> vector<8x192xf32>
      %364 = arith.addf %arg25, %363 : vector<8x192xf32>
      scf.yield %364 : vector<8x192xf32>
    }
    %c8_i32_49 = arith.constant 8 : i32
    %79 = arith.truncf %78 : vector<8x192xf32> to vector<8x192xbf16>
    %c0_50 = arith.constant 0 : index
    %c0_51 = arith.constant 0 : index
    %c0_52 = arith.constant 0 : index
    %80 = vector.load %arg11[%c0_50, %c0_51, %c0_52] : memref<2x192x192xbf16, #tpu.memory_space<vmem>>, vector<1x192x192xbf16>
    %81 = vector.shape_cast %80 : vector<1x192x192xbf16> to vector<192x192xbf16>
    %cst_53 = arith.constant dense<0.000000e+00> : vector<8x192xf32>
    %82 = tpu.matmul %79, %81, %cst_53 {dimension_numbers = #tpu.dot_dimension_numbers<[1], [0], [0], [1], [0, 0, 1, 1], [], []>} : vector<8x192xbf16>, vector<192x192xbf16>, vector<8x192xf32> -> vector<8x192xf32>
    %c0_54 = arith.constant 0 : index
    %c0_55 = arith.constant 0 : index
    %c0_56 = arith.constant 0 : index
    %83 = vector.load %arg12[%c0_54, %c0_55, %c0_56] : memref<2x1x192xf32, #tpu.memory_space<vmem>>, vector<1x1x192xf32>
    %84 = vector.shape_cast %83 : vector<1x1x192xf32> to vector<1x192xf32>
    %85 = vector.broadcast %84 : vector<1x192xf32> to vector<8x192xf32>
    %86 = arith.addf %82, %85 : vector<8x192xf32>
    %cst_57 = arith.constant dense<0.000000e+00> : vector<8x192xf32>
    %87 = tpu.matmul %25, %53, %cst_57 {dimension_numbers = #tpu.dot_dimension_numbers<[1], [0], [0], [1], [0, 0, 1, 1], [], []>} : vector<8x8xbf16>, vector<8x192xbf16>, vector<8x192xf32> -> vector<8x192xf32>
    %88 = arith.addf %0, %86 : vector<8x192xf32>
    %89 = arith.addf %88, %87 : vector<8x192xf32>
    %c0_58 = arith.constant 0 : index
    %c0_59 = arith.constant 0 : index
    %c0_60 = arith.constant 0 : index
    %90 = vector.load %arg13[%c0_58, %c0_59, %c0_60] : memref<2x1x192xf32, #tpu.memory_space<vmem>>, vector<1x1x192xf32>
    %91 = vector.shape_cast %90 : vector<1x1x192xf32> to vector<1x192xf32>
    %c0_61 = arith.constant 0 : index
    %c0_62 = arith.constant 0 : index
    %c0_63 = arith.constant 0 : index
    %92 = vector.load %arg14[%c0_61, %c0_62, %c0_63] : memref<2x1x192xf32, #tpu.memory_space<vmem>>, vector<1x1x192xf32>
    %93 = vector.shape_cast %92 : vector<1x1x192xf32> to vector<1x192xf32>
    %cst_64 = arith.constant dense<0.000000e+00> : vector<8xf32>
    %94 = vector.multi_reduction <add>, %89, %cst_64 [1] : vector<8x192xf32> to vector<8xf32>
    %95 = vector.shape_cast %94 : vector<8xf32> to vector<8x1xf32>
    %cst_65 = arith.constant 1.920000e+02 : f32
    %96 = vector.broadcast %cst_65 : f32 to vector<8x1xf32>
    %97 = arith.divf %95, %96 : vector<8x1xf32>
    %98 = vector.broadcast %97 : vector<8x1xf32> to vector<8x192xf32>
    %99 = arith.subf %89, %98 : vector<8x192xf32>
    %100 = arith.mulf %99, %99 : vector<8x192xf32>
    %cst_66 = arith.constant dense<0.000000e+00> : vector<8xf32>
    %101 = vector.multi_reduction <add>, %100, %cst_66 [1] : vector<8x192xf32> to vector<8xf32>
    %102 = vector.shape_cast %101 : vector<8xf32> to vector<8x1xf32>
    %cst_67 = arith.constant 1.920000e+02 : f32
    %103 = vector.broadcast %cst_67 : f32 to vector<8x1xf32>
    %104 = arith.divf %102, %103 : vector<8x1xf32>
    %105 = vector.broadcast %97 : vector<8x1xf32> to vector<8x192xf32>
    %106 = arith.subf %89, %105 : vector<8x192xf32>
    %cst_68 = arith.constant 9.99999974E-6 : f32
    %107 = vector.broadcast %cst_68 : f32 to vector<8x1xf32>
    %108 = arith.addf %104, %107 : vector<8x1xf32>
    %109 = math.rsqrt %108 : vector<8x1xf32>
    %110 = vector.broadcast %109 : vector<8x1xf32> to vector<8x192xf32>
    %111 = arith.mulf %106, %110 : vector<8x192xf32>
    %112 = vector.broadcast %91 : vector<1x192xf32> to vector<8x192xf32>
    %113 = arith.mulf %111, %112 : vector<8x192xf32>
    %114 = vector.broadcast %93 : vector<1x192xf32> to vector<8x192xf32>
    %115 = arith.addf %113, %114 : vector<8x192xf32>
    %116 = arith.truncf %115 : vector<8x192xf32> to vector<8x192xbf16>
    %c0_69 = arith.constant 0 : index
    %c0_70 = arith.constant 0 : index
    %c0_71 = arith.constant 0 : index
    %117 = vector.load %arg15[%c0_69, %c0_70, %c0_71] : memref<2x192x768xbf16, #tpu.memory_space<vmem>>, vector<1x192x768xbf16>
    %118 = vector.shape_cast %117 : vector<1x192x768xbf16> to vector<192x768xbf16>
    %cst_72 = arith.constant dense<0.000000e+00> : vector<8x768xf32>
    %119 = tpu.matmul %116, %118, %cst_72 {dimension_numbers = #tpu.dot_dimension_numbers<[1], [0], [0], [1], [0, 0, 1, 1], [], []>} : vector<8x192xbf16>, vector<192x768xbf16>, vector<8x768xf32> -> vector<8x768xf32>
    %c0_73 = arith.constant 0 : index
    %c0_74 = arith.constant 0 : index
    %c0_75 = arith.constant 0 : index
    %120 = vector.load %arg16[%c0_73, %c0_74, %c0_75] : memref<2x1x768xf32, #tpu.memory_space<vmem>>, vector<1x1x768xf32>
    %121 = vector.shape_cast %120 : vector<1x1x768xf32> to vector<1x768xf32>
    %122 = vector.broadcast %121 : vector<1x768xf32> to vector<8x768xf32>
    %123 = arith.addf %119, %122 : vector<8x768xf32>
    %cst_76 = arith.constant 5.000000e-01 : f32
    %124 = vector.broadcast %cst_76 : f32 to vector<8x768xf32>
    %125 = arith.mulf %124, %123 : vector<8x768xf32>
    %cst_77 = arith.constant 0.707106769 : f32
    %126 = vector.broadcast %cst_77 : f32 to vector<8x768xf32>
    %127 = arith.mulf %123, %126 : vector<8x768xf32>
    %128 = math.absf %127 : vector<8x768xf32>
    %cst_78 = arith.constant 0.327591091 : f32
    %129 = vector.broadcast %cst_78 : f32 to vector<8x768xf32>
    %130 = arith.mulf %129, %128 : vector<8x768xf32>
    %cst_79 = arith.constant 1.000000e+00 : f32
    %131 = vector.broadcast %cst_79 : f32 to vector<8x768xf32>
    %132 = arith.addf %131, %130 : vector<8x768xf32>
    %cst_80 = arith.constant 1.000000e+00 : f32
    %133 = vector.broadcast %cst_80 : f32 to vector<8x768xf32>
    %134 = arith.divf %133, %132 : vector<8x768xf32>
    %cst_81 = arith.constant 1.06140542 : f32
    %135 = vector.broadcast %cst_81 : f32 to vector<8x768xf32>
    %136 = arith.mulf %135, %134 : vector<8x768xf32>
    %cst_82 = arith.constant 1.45315206 : f32
    %137 = vector.broadcast %cst_82 : f32 to vector<8x768xf32>
    %138 = arith.subf %136, %137 : vector<8x768xf32>
    %139 = arith.mulf %138, %134 : vector<8x768xf32>
    %cst_83 = arith.constant 1.42141378 : f32
    %140 = vector.broadcast %cst_83 : f32 to vector<8x768xf32>
    %141 = arith.addf %139, %140 : vector<8x768xf32>
    %142 = arith.mulf %141, %134 : vector<8x768xf32>
    %cst_84 = arith.constant 0.284496725 : f32
    %143 = vector.broadcast %cst_84 : f32 to vector<8x768xf32>
    %144 = arith.subf %142, %143 : vector<8x768xf32>
    %145 = arith.mulf %144, %134 : vector<8x768xf32>
    %cst_85 = arith.constant 0.254829586 : f32
    %146 = vector.broadcast %cst_85 : f32 to vector<8x768xf32>
    %147 = arith.addf %145, %146 : vector<8x768xf32>
    %148 = arith.mulf %147, %134 : vector<8x768xf32>
    %cst_86 = arith.constant 0.000000e+00 : f32
    %149 = vector.broadcast %cst_86 : f32 to vector<8x768xf32>
    %150 = arith.subf %149, %128 : vector<8x768xf32>
    %151 = arith.mulf %150, %128 : vector<8x768xf32>
    %152 = math.exp %151 : vector<8x768xf32>
    %153 = arith.mulf %148, %152 : vector<8x768xf32>
    %cst_87 = arith.constant 1.000000e+00 : f32
    %154 = vector.broadcast %cst_87 : f32 to vector<8x768xf32>
    %155 = arith.subf %154, %153 : vector<8x768xf32>
    %cst_88 = arith.constant 0.000000e+00 : f32
    %156 = vector.broadcast %cst_88 : f32 to vector<8x768xf32>
    %157 = arith.cmpf olt, %127, %156 : vector<8x768xf32>
    %cst_89 = arith.constant 0.000000e+00 : f32
    %158 = vector.broadcast %cst_89 : f32 to vector<8x768xf32>
    %159 = arith.subf %158, %155 : vector<8x768xf32>
    %160 = arith.select %157, %159, %155 : vector<8x768xi1>, vector<8x768xf32>
    %cst_90 = arith.constant 1.000000e+00 : f32
    %161 = vector.broadcast %cst_90 : f32 to vector<8x768xf32>
    %162 = arith.addf %161, %160 : vector<8x768xf32>
    %163 = arith.mulf %125, %162 : vector<8x768xf32>
    %164 = arith.truncf %163 : vector<8x768xf32> to vector<8x768xbf16>
    %c0_91 = arith.constant 0 : index
    %c0_92 = arith.constant 0 : index
    %c0_93 = arith.constant 0 : index
    %165 = vector.load %arg17[%c0_91, %c0_92, %c0_93] : memref<2x768x192xbf16, #tpu.memory_space<vmem>>, vector<1x768x192xbf16>
    %166 = vector.shape_cast %165 : vector<1x768x192xbf16> to vector<768x192xbf16>
    %cst_94 = arith.constant dense<0.000000e+00> : vector<8x192xf32>
    %167 = tpu.matmul %164, %166, %cst_94 {dimension_numbers = #tpu.dot_dimension_numbers<[1], [0], [0], [1], [0, 0, 1, 1], [], []>} : vector<8x768xbf16>, vector<768x192xbf16>, vector<8x192xf32> -> vector<8x192xf32>
    %168 = arith.addf %89, %167 : vector<8x192xf32>
    %c0_95 = arith.constant 0 : index
    %c0_96 = arith.constant 0 : index
    %c0_97 = arith.constant 0 : index
    %169 = vector.load %arg18[%c0_95, %c0_96, %c0_97] : memref<2x1x192xf32, #tpu.memory_space<vmem>>, vector<1x1x192xf32>
    %170 = vector.shape_cast %169 : vector<1x1x192xf32> to vector<1x192xf32>
    %171 = vector.broadcast %170 : vector<1x192xf32> to vector<8x192xf32>
    %172 = arith.addf %168, %171 : vector<8x192xf32>
    %c1_98 = arith.constant 1 : index
    %c0_99 = arith.constant 0 : index
    %c0_100 = arith.constant 0 : index
    %173 = vector.load %arg3[%c1_98, %c0_99, %c0_100] : memref<2x1x192xf32, #tpu.memory_space<vmem>>, vector<1x1x192xf32>
    %174 = vector.shape_cast %173 : vector<1x1x192xf32> to vector<1x192xf32>
    %c1_101 = arith.constant 1 : index
    %c0_102 = arith.constant 0 : index
    %c0_103 = arith.constant 0 : index
    %175 = vector.load %arg4[%c1_101, %c0_102, %c0_103] : memref<2x1x192xf32, #tpu.memory_space<vmem>>, vector<1x1x192xf32>
    %176 = vector.shape_cast %175 : vector<1x1x192xf32> to vector<1x192xf32>
    %cst_104 = arith.constant dense<0.000000e+00> : vector<8xf32>
    %177 = vector.multi_reduction <add>, %172, %cst_104 [1] : vector<8x192xf32> to vector<8xf32>
    %178 = vector.shape_cast %177 : vector<8xf32> to vector<8x1xf32>
    %cst_105 = arith.constant 1.920000e+02 : f32
    %179 = vector.broadcast %cst_105 : f32 to vector<8x1xf32>
    %180 = arith.divf %178, %179 : vector<8x1xf32>
    %181 = vector.broadcast %180 : vector<8x1xf32> to vector<8x192xf32>
    %182 = arith.subf %172, %181 : vector<8x192xf32>
    %183 = arith.mulf %182, %182 : vector<8x192xf32>
    %cst_106 = arith.constant dense<0.000000e+00> : vector<8xf32>
    %184 = vector.multi_reduction <add>, %183, %cst_106 [1] : vector<8x192xf32> to vector<8xf32>
    %185 = vector.shape_cast %184 : vector<8xf32> to vector<8x1xf32>
    %cst_107 = arith.constant 1.920000e+02 : f32
    %186 = vector.broadcast %cst_107 : f32 to vector<8x1xf32>
    %187 = arith.divf %185, %186 : vector<8x1xf32>
    %188 = vector.broadcast %180 : vector<8x1xf32> to vector<8x192xf32>
    %189 = arith.subf %172, %188 : vector<8x192xf32>
    %cst_108 = arith.constant 9.99999974E-6 : f32
    %190 = vector.broadcast %cst_108 : f32 to vector<8x1xf32>
    %191 = arith.addf %187, %190 : vector<8x1xf32>
    %192 = math.rsqrt %191 : vector<8x1xf32>
    %193 = vector.broadcast %192 : vector<8x1xf32> to vector<8x192xf32>
    %194 = arith.mulf %189, %193 : vector<8x192xf32>
    %195 = vector.broadcast %174 : vector<1x192xf32> to vector<8x192xf32>
    %196 = arith.mulf %194, %195 : vector<8x192xf32>
    %197 = vector.broadcast %176 : vector<1x192xf32> to vector<8x192xf32>
    %198 = arith.addf %196, %197 : vector<8x192xf32>
    %199 = arith.truncf %198 : vector<8x192xf32> to vector<8x192xbf16>
    %c1_109 = arith.constant 1 : index
    %c0_110 = arith.constant 0 : index
    %c0_111 = arith.constant 0 : index
    %200 = vector.load %arg5[%c1_109, %c0_110, %c0_111] : memref<2x192x192xbf16, #tpu.memory_space<vmem>>, vector<1x192x192xbf16>
    %201 = vector.shape_cast %200 : vector<1x192x192xbf16> to vector<192x192xbf16>
    %cst_112 = arith.constant dense<0.000000e+00> : vector<8x192xf32>
    %202 = tpu.matmul %199, %201, %cst_112 {dimension_numbers = #tpu.dot_dimension_numbers<[1], [0], [0], [1], [0, 0, 1, 1], [], []>} : vector<8x192xbf16>, vector<192x192xbf16>, vector<8x192xf32> -> vector<8x192xf32>
    %c1_113 = arith.constant 1 : index
    %c0_114 = arith.constant 0 : index
    %c0_115 = arith.constant 0 : index
    %203 = vector.load %arg6[%c1_113, %c0_114, %c0_115] : memref<2x1x192xf32, #tpu.memory_space<vmem>>, vector<1x1x192xf32>
    %204 = vector.shape_cast %203 : vector<1x1x192xf32> to vector<1x192xf32>
    %205 = vector.broadcast %204 : vector<1x192xf32> to vector<8x192xf32>
    %206 = arith.addf %202, %205 : vector<8x192xf32>
    %c1_116 = arith.constant 1 : index
    %c0_117 = arith.constant 0 : index
    %c0_118 = arith.constant 0 : index
    %207 = vector.load %arg7[%c1_116, %c0_117, %c0_118] : memref<2x192x192xbf16, #tpu.memory_space<vmem>>, vector<1x192x192xbf16>
    %208 = vector.shape_cast %207 : vector<1x192x192xbf16> to vector<192x192xbf16>
    %cst_119 = arith.constant dense<0.000000e+00> : vector<8x192xf32>
    %209 = tpu.matmul %199, %208, %cst_119 {dimension_numbers = #tpu.dot_dimension_numbers<[1], [0], [0], [1], [0, 0, 1, 1], [], []>} : vector<8x192xbf16>, vector<192x192xbf16>, vector<8x192xf32> -> vector<8x192xf32>
    %c1_120 = arith.constant 1 : index
    %c0_121 = arith.constant 0 : index
    %c0_122 = arith.constant 0 : index
    %210 = vector.load %arg8[%c1_120, %c0_121, %c0_122] : memref<2x1x192xf32, #tpu.memory_space<vmem>>, vector<1x1x192xf32>
    %211 = vector.shape_cast %210 : vector<1x1x192xf32> to vector<1x192xf32>
    %212 = vector.broadcast %211 : vector<1x192xf32> to vector<8x192xf32>
    %213 = arith.addf %209, %212 : vector<8x192xf32>
    %c1_123 = arith.constant 1 : index
    %c0_124 = arith.constant 0 : index
    %c0_125 = arith.constant 0 : index
    %214 = vector.load %arg9[%c1_123, %c0_124, %c0_125] : memref<2x192x192xbf16, #tpu.memory_space<vmem>>, vector<1x192x192xbf16>
    %215 = vector.shape_cast %214 : vector<1x192x192xbf16> to vector<192x192xbf16>
    %cst_126 = arith.constant dense<0.000000e+00> : vector<8x192xf32>
    %216 = tpu.matmul %199, %215, %cst_126 {dimension_numbers = #tpu.dot_dimension_numbers<[1], [0], [0], [1], [0, 0, 1, 1], [], []>} : vector<8x192xbf16>, vector<192x192xbf16>, vector<8x192xf32> -> vector<8x192xf32>
    %c1_127 = arith.constant 1 : index
    %c0_128 = arith.constant 0 : index
    %c0_129 = arith.constant 0 : index
    %217 = vector.load %arg10[%c1_127, %c0_128, %c0_129] : memref<2x1x192xf32, #tpu.memory_space<vmem>>, vector<1x1x192xf32>
    %218 = vector.shape_cast %217 : vector<1x1x192xf32> to vector<1x192xf32>
    %219 = vector.broadcast %218 : vector<1x192xf32> to vector<8x192xf32>
    %220 = arith.addf %216, %219 : vector<8x192xf32>
    %221 = arith.truncf %213 : vector<8x192xf32> to vector<8x192xbf16>
    %cst_130 = arith.constant 0.000000e+00 : f32
    %222 = vector.broadcast %cst_130 : f32 to vector<8x192xf32>
    %c0_i32_131 = arith.constant 0 : i32
    %c8_i32_132 = arith.constant 8 : i32
    %223 = arith.addi %c0_i32_131, %c8_i32_132 : i32
    %c1_i32_133 = arith.constant 1 : i32
    %224 = scf.for %arg24 = %c0_i32_131 to %223 step %c1_i32_133 iter_args(%arg25 = %222) -> (vector<8x192xf32>)  : i32 {
      %c24_i32 = arith.constant 24 : i32
      %332 = arith.muli %arg24, %c24_i32 : i32
      %333 = vector.broadcast %332 : i32 to vector<1x192xi32>
      %334 = arith.cmpi sge, %26, %333 : vector<1x192xi32>
      %c24_i32_195 = arith.constant 24 : i32
      %335 = arith.addi %332, %c24_i32_195 : i32
      %336 = vector.broadcast %335 : i32 to vector<1x192xi32>
      %337 = arith.cmpi slt, %26, %336 : vector<1x192xi32>
      %338 = arith.andi %334, %337 : vector<1x192xi1>
      %339 = arith.extui %338 : vector<1x192xi1> to vector<1x192xi32>
      %340 = arith.sitofp %339 : vector<1x192xi32> to vector<1x192xf32>
      %341 = vector.broadcast %340 : vector<1x192xf32> to vector<8x192xf32>
      %342 = arith.mulf %206, %341 : vector<8x192xf32>
      %343 = arith.truncf %342 : vector<8x192xf32> to vector<8x192xbf16>
      %cst_196 = arith.constant dense<0.000000e+00> : vector<8x8xf32>
      %344 = tpu.matmul %343, %221, %cst_196 {dimension_numbers = #tpu.dot_dimension_numbers<[1], [1], [0], [0], [0, 0, 1, 0], [], []>} : vector<8x192xbf16>, vector<8x192xbf16>, vector<8x8xf32> -> vector<8x8xf32>
      %cst_197 = arith.constant 0.204124153 : f32
      %345 = vector.broadcast %cst_197 : f32 to vector<8x8xf32>
      %346 = arith.mulf %344, %345 : vector<8x8xf32>
      %cst_198 = arith.constant -1.000000e+30 : f32
      %347 = vector.broadcast %cst_198 : f32 to vector<8x8xf32>
      %348 = arith.select %12, %346, %347 : vector<8x8xi1>, vector<8x8xf32>
      %cst_199 = arith.constant dense<0xFF800000> : vector<8xf32>
      %349 = vector.multi_reduction <maximumf>, %348, %cst_199 [1] : vector<8x8xf32> to vector<8xf32>
      %350 = vector.shape_cast %349 : vector<8xf32> to vector<8x1xf32>
      %351 = vector.broadcast %350 : vector<8x1xf32> to vector<8x8xf32>
      %352 = arith.subf %348, %351 : vector<8x8xf32>
      %353 = math.exp %352 : vector<8x8xf32>
      %cst_200 = arith.constant dense<0.000000e+00> : vector<8xf32>
      %354 = vector.multi_reduction <add>, %353, %cst_200 [1] : vector<8x8xf32> to vector<8xf32>
      %355 = vector.shape_cast %354 : vector<8xf32> to vector<8x1xf32>
      %356 = tpu.reciprocal %355 {approx = true} : vector<8x1xf32> -> vector<8x1xf32>
      %357 = vector.broadcast %356 : vector<8x1xf32> to vector<8x8xf32>
      %358 = arith.mulf %353, %357 : vector<8x8xf32>
      %359 = arith.truncf %358 : vector<8x8xf32> to vector<8x8xbf16>
      %360 = vector.broadcast %340 : vector<1x192xf32> to vector<8x192xf32>
      %361 = arith.mulf %220, %360 : vector<8x192xf32>
      %362 = arith.truncf %361 : vector<8x192xf32> to vector<8x192xbf16>
      %cst_201 = arith.constant dense<0.000000e+00> : vector<8x192xf32>
      %363 = tpu.matmul %359, %362, %cst_201 {dimension_numbers = #tpu.dot_dimension_numbers<[1], [0], [0], [1], [0, 0, 1, 1], [], []>} : vector<8x8xbf16>, vector<8x192xbf16>, vector<8x192xf32> -> vector<8x192xf32>
      %364 = arith.addf %arg25, %363 : vector<8x192xf32>
      scf.yield %364 : vector<8x192xf32>
    }
    %c8_i32_134 = arith.constant 8 : i32
    %225 = arith.truncf %224 : vector<8x192xf32> to vector<8x192xbf16>
    %c1_135 = arith.constant 1 : index
    %c0_136 = arith.constant 0 : index
    %c0_137 = arith.constant 0 : index
    %226 = vector.load %arg11[%c1_135, %c0_136, %c0_137] : memref<2x192x192xbf16, #tpu.memory_space<vmem>>, vector<1x192x192xbf16>
    %227 = vector.shape_cast %226 : vector<1x192x192xbf16> to vector<192x192xbf16>
    %cst_138 = arith.constant dense<0.000000e+00> : vector<8x192xf32>
    %228 = tpu.matmul %225, %227, %cst_138 {dimension_numbers = #tpu.dot_dimension_numbers<[1], [0], [0], [1], [0, 0, 1, 1], [], []>} : vector<8x192xbf16>, vector<192x192xbf16>, vector<8x192xf32> -> vector<8x192xf32>
    %c1_139 = arith.constant 1 : index
    %c0_140 = arith.constant 0 : index
    %c0_141 = arith.constant 0 : index
    %229 = vector.load %arg12[%c1_139, %c0_140, %c0_141] : memref<2x1x192xf32, #tpu.memory_space<vmem>>, vector<1x1x192xf32>
    %230 = vector.shape_cast %229 : vector<1x1x192xf32> to vector<1x192xf32>
    %231 = vector.broadcast %230 : vector<1x192xf32> to vector<8x192xf32>
    %232 = arith.addf %228, %231 : vector<8x192xf32>
    %cst_142 = arith.constant dense<0.000000e+00> : vector<8x192xf32>
    %233 = tpu.matmul %25, %199, %cst_142 {dimension_numbers = #tpu.dot_dimension_numbers<[1], [0], [0], [1], [0, 0, 1, 1], [], []>} : vector<8x8xbf16>, vector<8x192xbf16>, vector<8x192xf32> -> vector<8x192xf32>
    %234 = arith.addf %172, %232 : vector<8x192xf32>
    %235 = arith.addf %234, %233 : vector<8x192xf32>
    %c1_143 = arith.constant 1 : index
    %c0_144 = arith.constant 0 : index
    %c0_145 = arith.constant 0 : index
    %236 = vector.load %arg13[%c1_143, %c0_144, %c0_145] : memref<2x1x192xf32, #tpu.memory_space<vmem>>, vector<1x1x192xf32>
    %237 = vector.shape_cast %236 : vector<1x1x192xf32> to vector<1x192xf32>
    %c1_146 = arith.constant 1 : index
    %c0_147 = arith.constant 0 : index
    %c0_148 = arith.constant 0 : index
    %238 = vector.load %arg14[%c1_146, %c0_147, %c0_148] : memref<2x1x192xf32, #tpu.memory_space<vmem>>, vector<1x1x192xf32>
    %239 = vector.shape_cast %238 : vector<1x1x192xf32> to vector<1x192xf32>
    %cst_149 = arith.constant dense<0.000000e+00> : vector<8xf32>
    %240 = vector.multi_reduction <add>, %235, %cst_149 [1] : vector<8x192xf32> to vector<8xf32>
    %241 = vector.shape_cast %240 : vector<8xf32> to vector<8x1xf32>
    %cst_150 = arith.constant 1.920000e+02 : f32
    %242 = vector.broadcast %cst_150 : f32 to vector<8x1xf32>
    %243 = arith.divf %241, %242 : vector<8x1xf32>
    %244 = vector.broadcast %243 : vector<8x1xf32> to vector<8x192xf32>
    %245 = arith.subf %235, %244 : vector<8x192xf32>
    %246 = arith.mulf %245, %245 : vector<8x192xf32>
    %cst_151 = arith.constant dense<0.000000e+00> : vector<8xf32>
    %247 = vector.multi_reduction <add>, %246, %cst_151 [1] : vector<8x192xf32> to vector<8xf32>
    %248 = vector.shape_cast %247 : vector<8xf32> to vector<8x1xf32>
    %cst_152 = arith.constant 1.920000e+02 : f32
    %249 = vector.broadcast %cst_152 : f32 to vector<8x1xf32>
    %250 = arith.divf %248, %249 : vector<8x1xf32>
    %251 = vector.broadcast %243 : vector<8x1xf32> to vector<8x192xf32>
    %252 = arith.subf %235, %251 : vector<8x192xf32>
    %cst_153 = arith.constant 9.99999974E-6 : f32
    %253 = vector.broadcast %cst_153 : f32 to vector<8x1xf32>
    %254 = arith.addf %250, %253 : vector<8x1xf32>
    %255 = math.rsqrt %254 : vector<8x1xf32>
    %256 = vector.broadcast %255 : vector<8x1xf32> to vector<8x192xf32>
    %257 = arith.mulf %252, %256 : vector<8x192xf32>
    %258 = vector.broadcast %237 : vector<1x192xf32> to vector<8x192xf32>
    %259 = arith.mulf %257, %258 : vector<8x192xf32>
    %260 = vector.broadcast %239 : vector<1x192xf32> to vector<8x192xf32>
    %261 = arith.addf %259, %260 : vector<8x192xf32>
    %262 = arith.truncf %261 : vector<8x192xf32> to vector<8x192xbf16>
    %c1_154 = arith.constant 1 : index
    %c0_155 = arith.constant 0 : index
    %c0_156 = arith.constant 0 : index
    %263 = vector.load %arg15[%c1_154, %c0_155, %c0_156] : memref<2x192x768xbf16, #tpu.memory_space<vmem>>, vector<1x192x768xbf16>
    %264 = vector.shape_cast %263 : vector<1x192x768xbf16> to vector<192x768xbf16>
    %cst_157 = arith.constant dense<0.000000e+00> : vector<8x768xf32>
    %265 = tpu.matmul %262, %264, %cst_157 {dimension_numbers = #tpu.dot_dimension_numbers<[1], [0], [0], [1], [0, 0, 1, 1], [], []>} : vector<8x192xbf16>, vector<192x768xbf16>, vector<8x768xf32> -> vector<8x768xf32>
    %c1_158 = arith.constant 1 : index
    %c0_159 = arith.constant 0 : index
    %c0_160 = arith.constant 0 : index
    %266 = vector.load %arg16[%c1_158, %c0_159, %c0_160] : memref<2x1x768xf32, #tpu.memory_space<vmem>>, vector<1x1x768xf32>
    %267 = vector.shape_cast %266 : vector<1x1x768xf32> to vector<1x768xf32>
    %268 = vector.broadcast %267 : vector<1x768xf32> to vector<8x768xf32>
    %269 = arith.addf %265, %268 : vector<8x768xf32>
    %cst_161 = arith.constant 5.000000e-01 : f32
    %270 = vector.broadcast %cst_161 : f32 to vector<8x768xf32>
    %271 = arith.mulf %270, %269 : vector<8x768xf32>
    %cst_162 = arith.constant 0.707106769 : f32
    %272 = vector.broadcast %cst_162 : f32 to vector<8x768xf32>
    %273 = arith.mulf %269, %272 : vector<8x768xf32>
    %274 = math.absf %273 : vector<8x768xf32>
    %cst_163 = arith.constant 0.327591091 : f32
    %275 = vector.broadcast %cst_163 : f32 to vector<8x768xf32>
    %276 = arith.mulf %275, %274 : vector<8x768xf32>
    %cst_164 = arith.constant 1.000000e+00 : f32
    %277 = vector.broadcast %cst_164 : f32 to vector<8x768xf32>
    %278 = arith.addf %277, %276 : vector<8x768xf32>
    %cst_165 = arith.constant 1.000000e+00 : f32
    %279 = vector.broadcast %cst_165 : f32 to vector<8x768xf32>
    %280 = arith.divf %279, %278 : vector<8x768xf32>
    %cst_166 = arith.constant 1.06140542 : f32
    %281 = vector.broadcast %cst_166 : f32 to vector<8x768xf32>
    %282 = arith.mulf %281, %280 : vector<8x768xf32>
    %cst_167 = arith.constant 1.45315206 : f32
    %283 = vector.broadcast %cst_167 : f32 to vector<8x768xf32>
    %284 = arith.subf %282, %283 : vector<8x768xf32>
    %285 = arith.mulf %284, %280 : vector<8x768xf32>
    %cst_168 = arith.constant 1.42141378 : f32
    %286 = vector.broadcast %cst_168 : f32 to vector<8x768xf32>
    %287 = arith.addf %285, %286 : vector<8x768xf32>
    %288 = arith.mulf %287, %280 : vector<8x768xf32>
    %cst_169 = arith.constant 0.284496725 : f32
    %289 = vector.broadcast %cst_169 : f32 to vector<8x768xf32>
    %290 = arith.subf %288, %289 : vector<8x768xf32>
    %291 = arith.mulf %290, %280 : vector<8x768xf32>
    %cst_170 = arith.constant 0.254829586 : f32
    %292 = vector.broadcast %cst_170 : f32 to vector<8x768xf32>
    %293 = arith.addf %291, %292 : vector<8x768xf32>
    %294 = arith.mulf %293, %280 : vector<8x768xf32>
    %cst_171 = arith.constant 0.000000e+00 : f32
    %295 = vector.broadcast %cst_171 : f32 to vector<8x768xf32>
    %296 = arith.subf %295, %274 : vector<8x768xf32>
    %297 = arith.mulf %296, %274 : vector<8x768xf32>
    %298 = math.exp %297 : vector<8x768xf32>
    %299 = arith.mulf %294, %298 : vector<8x768xf32>
    %cst_172 = arith.constant 1.000000e+00 : f32
    %300 = vector.broadcast %cst_172 : f32 to vector<8x768xf32>
    %301 = arith.subf %300, %299 : vector<8x768xf32>
    %cst_173 = arith.constant 0.000000e+00 : f32
    %302 = vector.broadcast %cst_173 : f32 to vector<8x768xf32>
    %303 = arith.cmpf olt, %273, %302 : vector<8x768xf32>
    %cst_174 = arith.constant 0.000000e+00 : f32
    %304 = vector.broadcast %cst_174 : f32 to vector<8x768xf32>
    %305 = arith.subf %304, %301 : vector<8x768xf32>
    %306 = arith.select %303, %305, %301 : vector<8x768xi1>, vector<8x768xf32>
    %cst_175 = arith.constant 1.000000e+00 : f32
    %307 = vector.broadcast %cst_175 : f32 to vector<8x768xf32>
    %308 = arith.addf %307, %306 : vector<8x768xf32>
    %309 = arith.mulf %271, %308 : vector<8x768xf32>
    %310 = arith.truncf %309 : vector<8x768xf32> to vector<8x768xbf16>
    %c1_176 = arith.constant 1 : index
    %c0_177 = arith.constant 0 : index
    %c0_178 = arith.constant 0 : index
    %311 = vector.load %arg17[%c1_176, %c0_177, %c0_178] : memref<2x768x192xbf16, #tpu.memory_space<vmem>>, vector<1x768x192xbf16>
    %312 = vector.shape_cast %311 : vector<1x768x192xbf16> to vector<768x192xbf16>
    %cst_179 = arith.constant dense<0.000000e+00> : vector<8x192xf32>
    %313 = tpu.matmul %310, %312, %cst_179 {dimension_numbers = #tpu.dot_dimension_numbers<[1], [0], [0], [1], [0, 0, 1, 1], [], []>} : vector<8x768xbf16>, vector<768x192xbf16>, vector<8x192xf32> -> vector<8x192xf32>
    %314 = arith.addf %235, %313 : vector<8x192xf32>
    %c1_180 = arith.constant 1 : index
    %c0_181 = arith.constant 0 : index
    %c0_182 = arith.constant 0 : index
    %315 = vector.load %arg18[%c1_180, %c0_181, %c0_182] : memref<2x1x192xf32, #tpu.memory_space<vmem>>, vector<1x1x192xf32>
    %316 = vector.shape_cast %315 : vector<1x1x192xf32> to vector<1x192xf32>
    %317 = vector.broadcast %316 : vector<1x192xf32> to vector<8x192xf32>
    %318 = arith.addf %314, %317 : vector<8x192xf32>
    %319 = arith.truncf %318 : vector<8x192xf32> to vector<8x192xbf16>
    %c0_183 = arith.constant 0 : index
    %c0_184 = arith.constant 0 : index
    %320 = vector.load %arg19[%c0_183, %c0_184] : memref<192x128xbf16, #tpu.memory_space<vmem>>, vector<192x128xbf16>
    %cst_185 = arith.constant dense<0.000000e+00> : vector<8x128xf32>
    %321 = tpu.matmul %319, %320, %cst_185 {dimension_numbers = #tpu.dot_dimension_numbers<[1], [0], [0], [1], [0, 0, 1, 1], [], []>} : vector<8x192xbf16>, vector<192x128xbf16>, vector<8x128xf32> -> vector<8x128xf32>
    %c0_186 = arith.constant 0 : index
    %c0_187 = arith.constant 0 : index
    %322 = vector.load %arg20[%c0_186, %c0_187] : memref<1x128xf32, #tpu.memory_space<vmem>>, vector<1x128xf32>
    %323 = vector.broadcast %322 : vector<1x128xf32> to vector<8x128xf32>
    %324 = arith.addf %321, %323 : vector<8x128xf32>
    %325 = arith.truncf %324 : vector<8x128xf32> to vector<8x128xbf16>
    %c0_188 = arith.constant 0 : index
    %c0_189 = arith.constant 0 : index
    %326 = vector.load %arg21[%c0_188, %c0_189] : memref<128x128xbf16, #tpu.memory_space<vmem>>, vector<128x128xbf16>
    %cst_190 = arith.constant dense<0.000000e+00> : vector<8x128xf32>
    %327 = tpu.matmul %325, %326, %cst_190 {dimension_numbers = #tpu.dot_dimension_numbers<[1], [0], [0], [1], [0, 0, 1, 1], [], []>} : vector<8x128xbf16>, vector<128x128xbf16>, vector<8x128xf32> -> vector<8x128xf32>
    %c0_191 = arith.constant 0 : index
    %c0_192 = arith.constant 0 : index
    %328 = vector.load %arg22[%c0_191, %c0_192] : memref<1x128xf32, #tpu.memory_space<vmem>>, vector<1x128xf32>
    %329 = vector.broadcast %328 : vector<1x128xf32> to vector<8x128xf32>
    %330 = arith.addf %327, %329 : vector<8x128xf32>
    %c0_193 = arith.constant 0 : index
    %c0_194 = arith.constant 0 : index
    %331 = vector.load %arg23[%c0_193, %c0_194] : memref<8x128xf32, #tpu.memory_space<vmem>>, vector<8x128xf32>
    tpu.vector_store %arg23[%c0_193, %c0_194], %330 {strides = array<i32>} : memref<8x128xf32, #tpu.memory_space<vmem>>, vector<8x128xf32>,
    return
  }
  func.func @transform_0(%arg0: i32) -> (i32, i32) {
    %c0_i32 = arith.constant 0 : i32
    %c0_i32_0 = arith.constant 0 : i32
    return %arg0, %c0_i32 : i32, i32
  }
  func.func @transform_1(%arg0: i32) -> (i32, i32, i32) {
    %c0_i32 = arith.constant 0 : i32
    %c0_i32_0 = arith.constant 0 : i32
    %c0_i32_1 = arith.constant 0 : i32
    return %c0_i32, %arg0, %c0_i32_0 : i32, i32, i32
  }
  func.func @transform_2(%arg0: i32) -> (i32, i32, i32) {
    %c0_i32 = arith.constant 0 : i32
    %c0_i32_0 = arith.constant 0 : i32
    %c0_i32_1 = arith.constant 0 : i32
    %c0_i32_2 = arith.constant 0 : i32
    return %c0_i32, %c0_i32_0, %c0_i32_1 : i32, i32, i32
  }
  func.func @transform_3(%arg0: i32) -> (i32, i32, i32) {
    %c0_i32 = arith.constant 0 : i32
    %c0_i32_0 = arith.constant 0 : i32
    %c0_i32_1 = arith.constant 0 : i32
    %c0_i32_2 = arith.constant 0 : i32
    return %c0_i32, %c0_i32_0, %c0_i32_1 : i32, i32, i32
  }
  func.func @transform_4(%arg0: i32) -> (i32, i32, i32) {
    %c0_i32 = arith.constant 0 : i32
    %c0_i32_0 = arith.constant 0 : i32
    %c0_i32_1 = arith.constant 0 : i32
    %c0_i32_2 = arith.constant 0 : i32
    return %c0_i32, %c0_i32_0, %c0_i32_1 : i32, i32, i32
  }
  func.func @transform_5(%arg0: i32) -> (i32, i32, i32) {
    %c0_i32 = arith.constant 0 : i32
    %c0_i32_0 = arith.constant 0 : i32
    %c0_i32_1 = arith.constant 0 : i32
    %c0_i32_2 = arith.constant 0 : i32
    return %c0_i32, %c0_i32_0, %c0_i32_1 : i32, i32, i32
  }
  func.func @transform_6(%arg0: i32) -> (i32, i32, i32) {
    %c0_i32 = arith.constant 0 : i32
    %c0_i32_0 = arith.constant 0 : i32
    %c0_i32_1 = arith.constant 0 : i32
    %c0_i32_2 = arith.constant 0 : i32
    return %c0_i32, %c0_i32_0, %c0_i32_1 : i32, i32, i32
  }
  func.func @transform_7(%arg0: i32) -> (i32, i32, i32) {
    %c0_i32 = arith.constant 0 : i32
    %c0_i32_0 = arith.constant 0 : i32
    %c0_i32_1 = arith.constant 0 : i32
    %c0_i32_2 = arith.constant 0 : i32
    return %c0_i32, %c0_i32_0, %c0_i32_1 : i32, i32, i32
  }
  func.func @transform_8(%arg0: i32) -> (i32, i32, i32) {
    %c0_i32 = arith.constant 0 : i32
    %c0_i32_0 = arith.constant 0 : i32
    %c0_i32_1 = arith.constant 0 : i32
    %c0_i32_2 = arith.constant 0 : i32
    return %c0_i32, %c0_i32_0, %c0_i32_1 : i32, i32, i32
  }
  func.func @transform_9(%arg0: i32) -> (i32, i32, i32) {
    %c0_i32 = arith.constant 0 : i32
    %c0_i32_0 = arith.constant 0 : i32
    %c0_i32_1 = arith.constant 0 : i32
    %c0_i32_2 = arith.constant 0 : i32
    return %c0_i32, %c0_i32_0, %c0_i32_1 : i32, i32, i32
  }
  func.func @transform_10(%arg0: i32) -> (i32, i32, i32) {
    %c0_i32 = arith.constant 0 : i32
    %c0_i32_0 = arith.constant 0 : i32
    %c0_i32_1 = arith.constant 0 : i32
    %c0_i32_2 = arith.constant 0 : i32
    return %c0_i32, %c0_i32_0, %c0_i32_1 : i32, i32, i32
  }
  func.func @transform_11(%arg0: i32) -> (i32, i32, i32) {
    %c0_i32 = arith.constant 0 : i32
    %c0_i32_0 = arith.constant 0 : i32
    %c0_i32_1 = arith.constant 0 : i32
    %c0_i32_2 = arith.constant 0 : i32
    return %c0_i32, %c0_i32_0, %c0_i32_1 : i32, i32, i32
  }
  func.func @transform_12(%arg0: i32) -> (i32, i32, i32) {
    %c0_i32 = arith.constant 0 : i32
    %c0_i32_0 = arith.constant 0 : i32
    %c0_i32_1 = arith.constant 0 : i32
    %c0_i32_2 = arith.constant 0 : i32
    return %c0_i32, %c0_i32_0, %c0_i32_1 : i32, i32, i32
  }
  func.func @transform_13(%arg0: i32) -> (i32, i32, i32) {
    %c0_i32 = arith.constant 0 : i32
    %c0_i32_0 = arith.constant 0 : i32
    %c0_i32_1 = arith.constant 0 : i32
    %c0_i32_2 = arith.constant 0 : i32
    return %c0_i32, %c0_i32_0, %c0_i32_1 : i32, i32, i32
  }
  func.func @transform_14(%arg0: i32) -> (i32, i32, i32) {
    %c0_i32 = arith.constant 0 : i32
    %c0_i32_0 = arith.constant 0 : i32
    %c0_i32_1 = arith.constant 0 : i32
    %c0_i32_2 = arith.constant 0 : i32
    return %c0_i32, %c0_i32_0, %c0_i32_1 : i32, i32, i32
  }
  func.func @transform_15(%arg0: i32) -> (i32, i32, i32) {
    %c0_i32 = arith.constant 0 : i32
    %c0_i32_0 = arith.constant 0 : i32
    %c0_i32_1 = arith.constant 0 : i32
    %c0_i32_2 = arith.constant 0 : i32
    return %c0_i32, %c0_i32_0, %c0_i32_1 : i32, i32, i32
  }
  func.func @transform_16(%arg0: i32) -> (i32, i32, i32) {
    %c0_i32 = arith.constant 0 : i32
    %c0_i32_0 = arith.constant 0 : i32
    %c0_i32_1 = arith.constant 0 : i32
    %c0_i32_2 = arith.constant 0 : i32
    return %c0_i32, %c0_i32_0, %c0_i32_1 : i32, i32, i32
  }
  func.func @transform_17(%arg0: i32) -> (i32, i32, i32) {
    %c0_i32 = arith.constant 0 : i32
    %c0_i32_0 = arith.constant 0 : i32
    %c0_i32_1 = arith.constant 0 : i32
    %c0_i32_2 = arith.constant 0 : i32
    return %c0_i32, %c0_i32_0, %c0_i32_1 : i32, i32, i32
  }
  func.func @transform_18(%arg0: i32) -> (i32, i32) {
    %c0_i32 = arith.constant 0 : i32
    %c0_i32_0 = arith.constant 0 : i32
    %c0_i32_1 = arith.constant 0 : i32
    return %c0_i32, %c0_i32_0 : i32, i32
  }
  func.func @transform_19(%arg0: i32) -> (i32, i32) {
    %c0_i32 = arith.constant 0 : i32
    %c0_i32_0 = arith.constant 0 : i32
    %c0_i32_1 = arith.constant 0 : i32
    return %c0_i32, %c0_i32_0 : i32, i32
  }
  func.func @transform_20(%arg0: i32) -> (i32, i32) {
    %c0_i32 = arith.constant 0 : i32
    %c0_i32_0 = arith.constant 0 : i32
    %c0_i32_1 = arith.constant 0 : i32
    return %c0_i32, %c0_i32_0 : i32, i32
  }
  func.func @transform_21(%arg0: i32) -> (i32, i32) {
    %c0_i32 = arith.constant 0 : i32
    %c0_i32_0 = arith.constant 0 : i32
    %c0_i32_1 = arith.constant 0 : i32
    return %c0_i32, %c0_i32_0 : i32, i32
  }
  func.func @transform_22(%arg0: i32) -> (i32, i32) {
    %c0_i32 = arith.constant 0 : i32
    %c0_i32_0 = arith.constant 0 : i32
    return %arg0, %c0_i32 : i32, i32
  }
}

</mosaic_0001>

<bundles_post_ra>
// kernel: forward.1
= control target key start
LH: loop header
LB: loop body
LE: loop exit
PB: predicated region body
PF: predicated region fallthrough
CT: control target
= control target key end

     0   :  { %s10936_s0 = inlined_call_operand.vmem [shape: f32[16,192], index: 0, kind: input, shape index: {}]   ;;  %s10937_s1 = inlined_call_operand.vmem [shape: f32[4,16,4], index: 1, kind: input, shape index: {}]   ;;  %s10938_s2 = inlined_call_operand.vmem [shape: f32[2,1,192], index: 2, kind: input, shape index: {}]   ;;  %s10939_s3 = inlined_call_operand.vmem [shape: f32[2,1,192], index: 3, kind: input, shape index: {}]   ;;  %s10940_s4 = inlined_call_operand.vmem [shape: bf16[2,192,192], index: 4, kind: input, shape index: {}]   ;;  %s10941_s5 = inlined_call_operand.vmem [shape: f32[2,1,192], index: 5, kind: input, shape index: {}]   ;;  %s10942_s6 = inlined_call_operand.vmem [shape: bf16[2,192,192], index: 6, kind: input, shape index: {}]   ;;  %s10943_s7 = inlined_call_operand.vmem [shape: f32[2,1,192], index: 7, kind: input, shape index: {}]   ;;  %s10944_s8 = inlined_call_operand.vmem [shape: bf16[2,192,192], index: 8, kind: input, shape index: {}]   ;;  %s10945_s9 = inlined_call_operand.vmem [shape: f32[2,1,192], index: 9, kind: input, shape index: {}]   ;;  %s10946_s10 = inlined_call_operand.vmem [shape: bf16[2,192,192], index: 10, kind: input, shape index: {}]   ;;  %s10947_s11 = inlined_call_operand.vmem [shape: f32[2,1,192], index: 11, kind: input, shape index: {}]   ;;  %s10948_s12 = inlined_call_operand.vmem [shape: f32[2,1,192], index: 12, kind: input, shape index: {}]   ;;  %s10949_s13 = inlined_call_operand.vmem [shape: f32[2,1,192], index: 13, kind: input, shape index: {}]   ;;  %s10950_s14 = inlined_call_operand.vmem [shape: bf16[2,192,768], index: 14, kind: input, shape index: {}]   ;;  %s10951_s15 = inlined_call_operand.vmem [shape: f32[2,1,768], index: 15, kind: input, shape index: {}]   ;;  %s10952_s16 = inlined_call_operand.vmem [shape: bf16[2,768,192], index: 16, kind: input, shape index: {}]   ;;  %s10953_s17 = inlined_call_operand.vmem [shape: f32[2,1,192], index: 17, kind: input, shape index: {}]   ;;  %s10954_s18 = inlined_call_operand.vmem [shape: bf16[192,128], index: 18, kind: input, shape index: {}]   ;;  %s10955_s19 = inlined_call_operand.vmem [shape: f32[1,128], index: 19, kind: input, shape index: {}]   ;;  %s10956_s20 = inlined_call_operand.vmem [shape: bf16[128,128], index: 20, kind: input, shape index: {}]   ;;  %s10957_s21 = inlined_call_operand.vmem [shape: f32[1,128], index: 21, kind: input, shape index: {}]   ;;  %s10958_s22 = inlined_call_operand.hbm [shape: f32[16,128], index: 22, kind: output, shape index: {}]  }
   0x1   :  { %10971 = sst [smem:[#allocation13_spill]] %s10936_s0 }
   0x2   :  { %10972 = sst [smem:[#allocation14_spill]] %s10937_s1 }
   0x3   :  { %10973 = sst [smem:[#allocation15_spill]] %s10938_s2 }
   0x4   :  { %10974 = sst [smem:[#allocation16_spill]] %s10939_s3 }
   0x5   :  { %10975 = sst [smem:[#allocation17_spill]] %s10940_s4 }
   0x6   :  { %10976 = sst [smem:[#allocation18_spill]] %s10941_s5 }
   0x7   :  { %10977 = sst [smem:[#allocation19_spill]] %s10942_s6 }
   0x8   :  { %10978 = sst [smem:[#allocation20_spill]] %s10958_s22 }
   0x9   :  { %27 = vsyncpa [#allocation4], 0 }
   0xa   :  { %29 = vsyncpa [#allocation4 + $0x1], 0  ;;  %s8609_s3 = smov 0   ;;  %s8611_s28 = smov 0  }
   0xb   :  { %s8613_s29 = smov 0   ;;  %s8615_s30 = smov 0  }
   0xc LB: > { %10979 = sst [smem:[#allocation6_spill]] %s8448_s3  ;;  %s8630_s4 = sadd.s32 4294967295, %s8460_s30   ;;  %s8460_s30 = sphi %s8615_s30, %s11011_s30   ;;  %s8456_s29 = sphi %s8613_s29, %s11014_s29   ;;  %s8452_s28 = sphi %s8611_s28, %s11013_s28   ;;  %s8448_s3 = sphi %s8609_s3, %s11012_s3  }
   0xd   : > { %10980 = sst [smem:[#allocation7_spill]] %s8452_s28  ;;  %s6442_s0 = sadd.s32 4294967294, %s8460_s30  }
   0xe   : > { %10981 = sst [smem:[#allocation8_spill]] %s8456_s29  ;;  %s8634_s23 = sadd.s32 1, %s8460_s30  }
   0xf   : > { %10982 = sst [smem:[#allocation9_spill]] %s8460_s30  ;;  %s68_s1 = sadd.s32 1, %s8456_s29 }
  0x10   : > { %10983 = sst [smem:[#allocation10_spill]] %s8634_s23  ;;  %s65_s5 = ssub.s32 %s8460_s30, %s8634_s23 }
  0x11   : > { %p75_p0 = scmp.ne.s32.totalorder %s8456_s29, %s8452_s28  ;;  %p66_p1 = scmp.eq.s32.totalorder %s65_s5, 0 }
  0x12   : > { %p76_p2 = scmp.eq.s32.totalorder %s8460_s30, 0  ;;  %p525_p3 = scmp.eq.s32.totalorder %s8630_s4, 1 }
  0x13   : > { %p530_p4 = scmp.ne.s32.totalorder %s8452_s28, %s8448_s3  ;;  %p531_p7 = scmp.eq.s32.totalorder %s6442_s0, 1 }
  0x14   : > { %s8646_s24 = scalar_select %p66_p1, %s8456_s29, %s68_s1  }
  0x15   : > { %p77_p5 = por %p76_p2, %p75_p0  ;;  %p8648_p6 = por %p525_p3, %p75_p0 }
  0x16   : > { %10984 = sst [smem:[#allocation11_spill]] %s8646_s24  ;;  %p8652_p8 = por %p531_p7, %p530_p4 }
  0x17   : > { %p6444_p9 = scmp.ge.s32.totalorder %s8460_s30, 2 }
  0x18   : > { %s10986_s25 = scalar_select %p8652_p8, 1, 0 }
  0x19   : > { %607 = sbr.rel (%p6444_p9) target bundleno = 44 (0x2c), region = 96 }
  0x1a   : > { %10987 = sst [smem:[#allocation12_spill]] %s10986_s25 }
  0x20   : > { %618 = sbr.rel (!%p77_p5) target bundleno = 44 (0x2c), region = 104  ;;  %s620_s26 = sand.u32 (%p77_p5), 1, %s8456_s29  }
  0x21   : > { %s6446_s2 = sshll.u32 (%p77_p5), %s8460_s30, 3  ;;  %s6445_s27 = sshll.u32 (%p77_p5), %s620_s26, 5 }
  0x22   : > { %s10988_s24 = sld [smem:[#allocation14_spill]] (%p77_p5)  ;;  %s622_s0 = scalar_lea.vmem (%p77_p5), [#allocation2], %s6445_s27 }
  0x28   : > { %s624_s23 = scalar_lea.vmem %s10988_s24, %s6446_s2 }
  0x29   : > { %v658_v0 = vld [vmem:[%s624_s23] sm:$0xff]  ;;  %v660_v1 = vld [vmem:[%s624_s23 + $0x10] sm:$0xff] }
  0x2a   : > { %v662_v2 = vld [vmem:[%s624_s23 + $0x20] sm:$0xff]  ;;  %659 = vst [vmem:[%s622_s0] sm:$0xff] %v658_v0  ;;  %661 = vst [vmem:[%s622_s0 + $0x8] sm:$0xff] %v660_v1  ;;  %v664_v3 = vld [vmem:[%s624_s23 + $0x30] sm:$0xff] }
  0x2b   : > { %663 = vst [vmem:[%s622_s0 + $0x10] sm:$0xff] %v662_v2  ;;  %665 = vst [vmem:[%s622_s0 + $0x18] sm:$0xff] %v664_v3 }
  0x2c PF: > { %p6447_p10 = scmp.ge.s32.totalorder %s8460_s30, 1  ;;  %p670_p11 = scmp.lt.s32.totalorder %s8460_s30, 3 }
  0x2e   : > { %p671_p12 = pnand %p6447_p10, %p670_p11 }
  0x2f   : > { %p743_p13 = scmp.lt.s32.totalorder (!%p671_p12), %s8630_s4, 1  ;;  %s8668_s24 = sand.u32 (!%p671_p12), 1, %s8452_s28   ;;  %v8486_v4 = vmov (!%p671_p12), 0.0   ;;  %vm8487_vm0 = vmmov (!%p671_p12), 0   ;;  %vm758_vm1 = vcmask (!%p671_p12), 31744   ;;  %vm929_vm2 = vcmask (!%p671_p12), 523264  }
  0x30   : > { %674 = sbr.rel (%p671_p12) target bundleno = 5439 (0x153f), region = 142  ;;  %7356 = vmatprep.subr.mxu1 (!%p671_p12), %v8486_v4  ;;  %s6448_s23 = sshll.u32 (!%p671_p12), %s8668_s24, 5  ;;  %7358 = vmatprep.mubr.msk.f32.mxu1 (!%p671_p12), %vm8487_vm0, %v8486_v4  ;;  %v924_v59 = vlaneseq (!%p671_p12)  ;;  %vm916_vm4 = vcmask (!%p671_p12), 64512  }
  0x31   : > { %s679_s1 = scalar_lea.vmem (!%p671_p12), [#allocation2], %s6448_s23  ;;  %s10989_s29 = sld [smem:[#allocation13_spill]] (!%p671_p12) }
  0x32   : > { %v6452_v5 = vld [vmem:[%s679_s1 + $0x8] sm:$0xff] (!%p671_p12)  ;;  %v751_v6 = vld [vmem:[%s679_s1] sm:$0xff] (!%p671_p12)  ;;  %v6454_v7 = vld [vmem:[%s679_s1 + $0x18] sm:$0xff] (!%p671_p12)  ;;  %s10990_s23 = sld [smem:[#allocation17_spill]] (!%p671_p12)  ;;  %s10991_s0 = sld [smem:[#allocation19_spill]] (!%p671_p12)  ;;  %v8827_v63 = vand.u32 (!%p671_p12), 127, %v924_v59 }
  0x33   : > { %7357 = vmatpush3.xpose.msk.msra.mxu1 (!%p671_p12), %vm758_vm1, %v6452_v5  ;;  %v6453_v11 = vld [vmem:[%s679_s1 + $0x10] sm:$0xff] (!%p671_p12)  ;;  %s10992_s5 = sld [smem:[#allocation15_spill]] (!%p671_p12)  ;;  %s10995_s30 = sshll.u32 (!%p671_p12), %s8668_s24, 3 }
  0x34   : > { %7361 = vmatprep.subr.mxu1 (!%p671_p12), %v8486_v4  ;;  %v8833_v1 = vadd.s32 (!%p671_p12), 128, %v8827_v63  ;;  %s9003_s26 = scalar_lea.vmem (!%p671_p12), [#allocation3], %s10995_s30  ;;  %s9009_s3 = smov (!%p671_p12), 0  }
  0x36   : > { %7359 = vmatmul.mubr.msk.f32.vlgmr.msra.gmra.mrb[0].mxu1 (!%p671_p12), %vm758_vm1, %v751_v6 }
  0x37   : > { %s744_s2 = scalar_select %p743_p13, %s8630_s4, 1  ;;  %7362 = vmatpush3.xpose.msk.msra.mxu1 %vm758_vm1, %v6454_v7  ;;  %7363 = vmatprep.mubr.msk.f32.mxu1 %vm8487_vm0, %v8486_v4 }
  0x38   : > { %v7494_v13 = vld [vmem:[%s10990_s23 + $0x4] ss:$8 sps:$4 sm:$0xff]   ;;  %v7496_v14 = vld [vmem:[%s10990_s23] ss:$8 sps:$4 sm:$0xff]   ;;  %v7500_v17 = vld [vmem:[%s10990_s23 + $0x14] ss:$8 sps:$4 sm:$0xff]  }
  0x39   : > { %s7342_s27 = sshll.u32 %s744_s2, 4  ;;  %v7497_v15 = vld [vmem:[%s10991_s0] ss:$8 sps:$4 sm:$0xff]   ;;  %v7499_v16 = vld [vmem:[%s10991_s0 + $0x4] ss:$8 sps:$4 sm:$0xff]   ;;  %1136 = vmatprep.subr.bf16.mxu0 %v7494_v13  ;;  %s10993_s2 = sld [smem:[#allocation16_spill]] }
  0x3a   : > { %s747_s28 = scalar_lea.vmem %s10989_s29, %s7342_s27  ;;  %7364 = vmatmul.mubr.msk.f32.vlgmr.msra.gmra.mrb[2].mxu1 %vm758_vm1, %v6453_v11  ;;  %v7505_v18 = vld [vmem:[%s10991_s0 + $0x14] ss:$8 sps:$4 sm:$0xff]   ;;  %1137 = vmatpush1.bf16.msra.mxu0 %v7496_v14  ;;  %v7502_v19 = vld [vmem:[%s10990_s23 + $0x10] ss:$8 sps:$4 sm:$0xff]   ;;  %v7506_v21 = vld [vmem:[%s10990_s23 + $0x24] ss:$8 sps:$4 sm:$0xff]  }
  0x3b   : > { %v8680_v8 = vld [vmem:[%s747_s28] sm:$0xff]  ;;  %v8682_v9 = vld [vmem:[%s747_s28 + $0x8] sm:$0xff]  ;;  %1333 = vmatprep.subr.bf16.mxu1 %v7499_v16  ;;  %1138 = vmatprep.subr.bf16.mxu0 %v7500_v17  ;;  %v7503_v20 = vld [vmem:[%s10991_s0 + $0x10] ss:$8 sps:$4 sm:$0xff]  }
  0x3c   : > { %v930_v10 = vsel %vm929_vm2, %v8682_v9, 0.0  ;;  %1334 = vmatpush1.bf16.msra.mxu1 %v7497_v15  ;;  %v7511_v22 = vld [vmem:[%s10991_s0 + $0x24] ss:$8 sps:$4 sm:$0xff]   ;;  %v7508_v23 = vld [vmem:[%s10990_s23 + $0x20] ss:$8 sps:$4 sm:$0xff]  }
  0x3d   : > { %v931_v12 = vadd.f32 %v930_v10, %v8680_v8  ;;  %1335 = vmatprep.subr.bf16.mxu1 %v7505_v18  ;;  %v7509_v24 = vld [vmem:[%s10991_s0 + $0x20] ss:$8 sps:$4 sm:$0xff]   ;;  %v7512_v25 = vld [vmem:[%s10990_s23 + $0x34] ss:$8 sps:$4 sm:$0xff]   ;;  %v7514_v27 = vld [vmem:[%s10990_s23 + $0x30] ss:$8 sps:$4 sm:$0xff]  }
  0x3e   : > { %1139 = vmatpush1.bf16.msra.mxu0 %v7502_v19  ;;  %v7517_v26 = vld [vmem:[%s10991_s0 + $0x34] ss:$8 sps:$4 sm:$0xff]   ;;  %v7515_v28 = vld [vmem:[%s10991_s0 + $0x30] ss:$8 sps:$4 sm:$0xff]   ;;  %v7518_v29 = vld [vmem:[%s10990_s23 + $0x44] ss:$8 sps:$4 sm:$0xff]  }
  0x3f   : > { %932 = vadd.xlane.f32.xlu0 %v931_v12  ;;  %1140 = vmatprep.subr.bf16.mxu0 %v7506_v21  ;;  %v7523_v30 = vld [vmem:[%s10991_s0 + $0x44] ss:$8 sps:$4 sm:$0xff]   ;;  %v7520_v31 = vld [vmem:[%s10990_s23 + $0x40] ss:$8 sps:$4 sm:$0xff]   ;;  %v7524_v33 = vld [vmem:[%s10990_s23 + $0x54] ss:$8 sps:$4 sm:$0xff]  }
  0x40   : > { %1336 = vmatpush1.bf16.msra.mxu1 %v7503_v20  ;;  %v7521_v32 = vld [vmem:[%s10991_s0 + $0x40] ss:$8 sps:$4 sm:$0xff]   ;;  %v7529_v34 = vld [vmem:[%s10991_s0 + $0x54] ss:$8 sps:$4 sm:$0xff]   ;;  %v7526_v35 = vld [vmem:[%s10990_s23 + $0x50] ss:$8 sps:$4 sm:$0xff]  }
  0x41   : > { %1337 = vmatprep.subr.bf16.mxu1 %v7511_v22  ;;  %v7527_v36 = vld [vmem:[%s10991_s0 + $0x50] ss:$8 sps:$4 sm:$0xff]   ;;  %v7530_v37 = vld [vmem:[%s10990_s23 + $0x64] ss:$8 sps:$4 sm:$0xff]   ;;  %v7532_v46 = vld [vmem:[%s10990_s23 + $0x60] ss:$8 sps:$4 sm:$0xff]  }
  0x42   : > { %1141 = vmatpush1.bf16.msra.mxu0 %v7508_v23  ;;  %v7535_v47 = vld [vmem:[%s10991_s0 + $0x64] ss:$8 sps:$4 sm:$0xff]   ;;  %v7533_v48 = vld [vmem:[%s10991_s0 + $0x60] ss:$8 sps:$4 sm:$0xff]   ;;  %v7536_v49 = vld [vmem:[%s10990_s23 + $0x74] ss:$8 sps:$4 sm:$0xff]  }
  0x43   : > { %1142 = vmatprep.subr.bf16.mxu0 %v7512_v25  ;;  %v7538_v50 = vld [vmem:[%s10990_s23 + $0x70] ss:$8 sps:$4 sm:$0xff]   ;;  %v7541_v51 = vld [vmem:[%s10991_s0 + $0x74] ss:$8 sps:$4 sm:$0xff]   ;;  %v7542_v53 = vld [vmem:[%s10990_s23 + $0x84] ss:$8 sps:$4 sm:$0xff]  }
  0x44   : > { %1338 = vmatpush1.bf16.msra.mxu1 %v7509_v24  ;;  %v7539_v52 = vld [vmem:[%s10991_s0 + $0x70] ss:$8 sps:$4 sm:$0xff]   ;;  %v7544_v54 = vld [vmem:[%s10990_s23 + $0x80] ss:$8 sps:$4 sm:$0xff]   ;;  %v7547_v56 = vld [vmem:[%s10991_s0 + $0x84] ss:$8 sps:$4 sm:$0xff]  }
  0x45   : > { %1339 = vmatprep.subr.bf16.mxu1 %v7517_v26  ;;  %v7545_v55 = vld [vmem:[%s10991_s0 + $0x80] ss:$8 sps:$4 sm:$0xff]   ;;  %v7548_v57 = vld [vmem:[%s10990_s23 + $0x94] ss:$8 sps:$4 sm:$0xff]   ;;  %v7550_v60 = vld [vmem:[%s10990_s23 + $0x90] ss:$8 sps:$4 sm:$0xff]  }
  0x46   : > { %1143 = vmatpush1.bf16.msra.mxu0 %v7514_v27  ;;  %v7553_v58 = vld [vmem:[%s10991_s0 + $0x94] ss:$8 sps:$4 sm:$0xff]   ;;  %v7551_v61 = vld [vmem:[%s10991_s0 + $0x90] ss:$8 sps:$4 sm:$0xff]   ;;  %v7554_v62 = vld [vmem:[%s10990_s23 + $0xa4] ss:$8 sps:$4 sm:$0xff]  }
  0x47   : > { %1144 = vmatprep.subr.bf16.mxu0 %v7518_v29  ;;  %v7559_v0 = vld [vmem:[%s10991_s0 + $0xa4] ss:$8 sps:$4 sm:$0xff]   ;;  %v7556_v2 = vld [vmem:[%s10990_s23 + $0xa0] ss:$8 sps:$4 sm:$0xff]   ;;  %v7560_v5 = vld [vmem:[%s10990_s23 + $0xb4] ss:$8 sps:$4 sm:$0xff]  }
  0x48   : > { %1340 = vmatpush1.bf16.msra.mxu1 %v7515_v28  ;;  %v7557_v3 = vld [vmem:[%s10991_s0 + $0xa0] ss:$8 sps:$4 sm:$0xff]   ;;  %v7565_v6 = vld [vmem:[%s10991_s0 + $0xb4] ss:$8 sps:$4 sm:$0xff]   ;;  %v7562_v7 = vld [vmem:[%s10990_s23 + $0xb0] ss:$8 sps:$4 sm:$0xff]  }
  0x49   : > { %1341 = vmatprep.subr.bf16.mxu1 %v7523_v30  ;;  %v7563_v10 = vld [vmem:[%s10991_s0 + $0xb0] ss:$8 sps:$4 sm:$0xff]   ;;  %v7568_v11 = vld [vmem:[%s10944_s8 + $0x4] ss:$8 sps:$4 sm:$0xff]   ;;  %v8865_v24 = vshrl.u32 %v924_v59, 7 }
  0x4a   : > { %1145 = vmatpush1.bf16.msra.mxu0 %v7520_v31  ;;  %v927_v27 = vld [vmem:[%s10992_s5] sm:$0x3]  ;;  %v7595_v59 = vld [vmem:[%s10944_s8 + $0x94] ss:$8 sps:$4 sm:$0xff]   ;;  %s10994_s5 = sld [smem:[#allocation18_spill]] }
  0x4b   : > { %1146 = vmatprep.subr.bf16.mxu0 %v7524_v33  ;;  %v8868_v25 = vsub.s32 1, %v8865_v24  ;;  %v8871_v26 = vsub.s32 0, %v8865_v24  ;;  %v928_v28 = vld [vmem:[%s10993_s2] sm:$0x3] }
  0x4c   : > { %1342 = vmatpush1.bf16.msra.mxu1 %v7521_v32 }
  0x4d   : > { %1343 = vmatprep.subr.bf16.mxu1 %v7529_v34  ;;  %v957_v29 = vrot.slane %v927_v27, %v8868_v25  ;;  %v953_v30 = vrot.slane %v927_v27, %v8871_v26  ;;  %v970_v33 = vrot.slane %v928_v28, %v8868_v25 }
  0x4e   : > { %1147 = vmatpush1.bf16.msra.mxu0 %v7526_v35  ;;  %v966_v35 = vrot.slane %v928_v28, %v8871_v26 }
  0x4f   : > { %1148 = vmatprep.subr.bf16.mxu0 %v7530_v37 }
  0x50   : > { %1344 = vmatpush1.bf16.msra.mxu1 %v7527_v36 }
  0x51   : > { %1345 = vmatprep.subr.bf16.mxu1 %v7535_v47  ;;  %v7577_v47 = vld [vmem:[%s10944_s8 + $0x34] ss:$8 sps:$4 sm:$0xff]  }
  0x52   : > { %1149 = vmatpush1.bf16.msra.mxu0 %v7532_v46  ;;  %v7572_v46 = vld [vmem:[%s10944_s8 + $0x20] ss:$8 sps:$4 sm:$0xff]  }
  0x53   : > { %1150 = vmatprep.subr.bf16.mxu0 %v7536_v49  ;;  %v7580_v49 = vld [vmem:[%s10944_s8 + $0x44] ss:$8 sps:$4 sm:$0xff]  }
  0x54   : > { %1346 = vmatpush1.bf16.msra.mxu1 %v7533_v48  ;;  %v7575_v48 = vld [vmem:[%s10944_s8 + $0x30] ss:$8 sps:$4 sm:$0xff]  }
  0x55   : > { %1347 = vmatprep.subr.bf16.mxu1 %v7541_v51  ;;  %v7583_v51 = vld [vmem:[%s10944_s8 + $0x54] ss:$8 sps:$4 sm:$0xff]  }
  0x56   : > { %1151 = vmatpush1.bf16.msra.mxu0 %v7538_v50  ;;  %v7578_v50 = vld [vmem:[%s10944_s8 + $0x40] ss:$8 sps:$4 sm:$0xff]  }
  0x57   : > { %1152 = vmatprep.subr.bf16.mxu0 %v7542_v53  ;;  %v7586_v53 = vld [vmem:[%s10944_s8 + $0x64] ss:$8 sps:$4 sm:$0xff]  }
  0x58   : > { %1348 = vmatpush1.bf16.msra.mxu1 %v7539_v52  ;;  %v7581_v52 = vld [vmem:[%s10944_s8 + $0x50] ss:$8 sps:$4 sm:$0xff]  }
  0x59   : > { %1349 = vmatprep.subr.bf16.mxu1 %v7547_v56  ;;  %v7587_v56 = vld [vmem:[%s10944_s8 + $0x70] ss:$8 sps:$4 sm:$0xff]  }
  0x5a   : > { %1153 = vmatpush1.bf16.msra.mxu0 %v7544_v54  ;;  %v7584_v54 = vld [vmem:[%s10944_s8 + $0x60] ss:$8 sps:$4 sm:$0xff]  }
  0x5b   : > { %1154 = vmatprep.subr.bf16.mxu0 %v7548_v57  ;;  %v7592_v57 = vld [vmem:[%s10944_s8 + $0x84] ss:$8 sps:$4 sm:$0xff]  }
  0x5c   : > { %1350 = vmatpush1.bf16.msra.mxu1 %v7545_v55  ;;  %v7589_v55 = vld [vmem:[%s10944_s8 + $0x74] ss:$8 sps:$4 sm:$0xff]  }
  0x5d   : > { %1351 = vmatprep.subr.bf16.mxu1 %v7553_v58  ;;  %v7590_v58 = vld [vmem:[%s10944_s8 + $0x80] ss:$8 sps:$4 sm:$0xff]  }
  0x5e   : > { %1155 = vmatpush1.bf16.msra.mxu0 %v7550_v60  ;;  %v7593_v60 = vld [vmem:[%s10944_s8 + $0x90] ss:$8 sps:$4 sm:$0xff]  }
  0x5f   : > { %1156 = vmatprep.subr.bf16.mxu0 %v7554_v62  ;;  %v7596_v62 = vld [vmem:[%s10944_s8 + $0xa0] ss:$8 sps:$4 sm:$0xff]  }
  0x60   : > { %1352 = vmatpush1.bf16.msra.mxu1 %v7551_v61  ;;  %v7598_v61 = vld [vmem:[%s10944_s8 + $0xa4] ss:$8 sps:$4 sm:$0xff]  }
  0x61   : > { %1353 = vmatprep.subr.bf16.mxu1 %v7559_v0  ;;  %v7601_v0 = vld [vmem:[%s10944_s8 + $0xb4] ss:$8 sps:$4 sm:$0xff]  }
  0x62   : > { %1157 = vmatpush1.bf16.msra.mxu0 %v7556_v2  ;;  %v7599_v2 = vld [vmem:[%s10944_s8 + $0xb0] ss:$8 sps:$4 sm:$0xff]  }
  0x63   : > { %1158 = vmatprep.subr.bf16.mxu0 %v7560_v5 }
  0x64   : > { %1354 = vmatpush1.bf16.msra.mxu1 %v7557_v3 }
  0x65   : > { %1355 = vmatprep.subr.bf16.mxu1 %v7565_v6 }
  0x66   : > { %1159 = vmatpush1.bf16.msra.mxu0 %v7562_v7 }
  0x67   : > { %1530 = vmatprep.subr.bf16.mxu0 %v7568_v11  ;;  %v1001_v11 = vld [vmem:[%s10994_s5] sm:$0x3] }
  0x68   : > { %1356 = vmatpush1.bf16.msra.mxu1 %v7563_v10 }
  0xcc   : > { %v933_v38 = vpop.xlane.xlu0 %932 }
  0xcd   : > { %v935_v39 = vmul.f32 0.0052083335, %v933_v38 }
  0xcf   : > { %v8769_v40 = vsub.f32 %v8680_v8, %v935_v39  ;;  %v8772_v41 = vsub.f32 %v8682_v9, %v935_v39 }
  0xd1   : > { %v938_v42 = vmul.f32 %v8769_v40, %v8769_v40  ;;  %v939_v43 = vmul.f32 %v8772_v41, %v8772_v41 }
  0xd3   : > { %v940_v44 = vsel %vm929_vm2, %v939_v43, 0.0  ;;  %v7566_v43 = vld [vmem:[%s10944_s8] ss:$8 sps:$4 sm:$0xff]  }
  0xd4   : > { %v941_v45 = vadd.f32 %v940_v44, %v938_v42 }
  0xd6   : > { %942 = vadd.xlane.f32.xlu0 %v941_v45  ;;  %v7574_v45 = vld [vmem:[%s10944_s8 + $0x24] ss:$8 sps:$4 sm:$0xff]  }
 0x109   : > { %v831_v12 = vpop.f32.mrb[0].mxu1 }
 0x10a   : > { %v912_v13 = vmul.f32 -0.001953125, %v831_v12  ;;  %v7360_v14 = vpop.f32.mrb[1].mxu1  ;;  %v1201_v12 = vld [vmem:[%s10943_s7] sm:$0x3] }
 0x10b   : > { %v1206_v14 = vrot.slane %v1201_v12, %v8871_v26 }
 0x10c   : > { %v913_v15 = vmul.f32 1.442695, %v912_v13  ;;  %v1006_v13 = vrot.slane %v1001_v11, %v8871_v26 }
 0x10d   : > { %v8856_v16 = vpop.f32.mrb[2].mxu1 }
 0x10e   : > { %7602 = vpow2.f32 %v913_v15  ;;  %v7365_v17 = vpop.f32.mrb[3].mxu1  ;;  %vm911_vm3 = vcmp.lt.f32.partialorder %v8856_v16, 0.5  ;;  %v1010_v15 = vrot.slane %v1001_v11, %v8868_v25 }
 0x10f   : > { %v1210_v17 = vrot.slane %v1201_v12, %v8868_v25 }
 0x118   : > { %v7603_v18 = vpop.eup %7602 }
 0x119   : > { %v8861_v19 = vsel %vm911_vm3, %v7603_v18, 0.0 }
 0x11a   : > { %v917_v20 = vsel %vm916_vm4, %v8861_v19, 0.0 }
 0x11b   : > { %918 = vadd.xlane.f32.xlu1 %v917_v20 }
 0x163   : > { %v943_v21 = vpop.xlane.xlu0 %942 }
 0x164   : > { %v944_v22 = vmul.f32 0.0052083335, %v943_v21 }
 0x166   : > { %v945_v23 = vadd.f32 1e-05, %v944_v22 }
 0x168   : > { %7604 = vrsqrt.f32 %v945_v23 }
 0x172   : > { %v7605_v31 = vpop.eup %7604 }
 0x173   : > { %v948_v32 = vmul.f32 %v7605_v31, %v8772_v41  ;;  %v947_v34 = vmul.f32 %v7605_v31, %v8769_v40  ;;  %v7571_v41 = vld [vmem:[%s10944_s8 + $0x14] ss:$8 sps:$4 sm:$0xff]   ;;  %v7569_v40 = vld [vmem:[%s10944_s8 + $0x10] ss:$8 sps:$4 sm:$0xff]  }
 0x175   : > { %v961_v36 = vmul.f32 %v957_v29, %v948_v32  ;;  %v960_v37 = vmul.f32 %v953_v30, %v947_v34 }
 0x177   : > { %v974_v38 = vadd.f32 %v970_v33, %v961_v36  ;;  %v973_v39 = vadd.f32 %v966_v35, %v960_v37  ;;  %v1398_v35 = vld [vmem:[%s10945_s9] sm:$0x3] }
 0x178   : > { %v1403_v36 = vrot.slane %v1398_v35, %v8871_v26  ;;  %v1407_v37 = vrot.slane %v1398_v35, %v8868_v25 }
 0x179   : > { %v8885_v42 = vpack.c.bf16 %v974_v38, %v974_v38  ;;  %v8890_v44 = vpack.c.bf16 %v973_v39, %v973_v39 }
 0x17b   : > { %6483 = vmatprep.mubr.msk.bf16.mxu0 %vm929_vm2, %v8885_v42  ;;  %6508 = vmatprep.mubr.msk.bf16.mxu1 %vm929_vm2, %v8885_v42 }
 0x17c   : > { %1169 = vmatmul.mubr.bf16.vlgmr.msra.gmra.mrb[0].mxu0 %v8890_v44  ;;  %1366 = vmatmul.mubr.bf16.vlgmr.msra.gmra.mrb[4].mxu1 %v8890_v44 }
 0x17d   : > { %1531 = vmatpush1.bf16.msra.mxu0 %v7566_v43  ;;  %6533 = vmatprep.mubr.msk.bf16.mxu0 %vm929_vm2, %v8885_v42 }
 0x17e   : > { %1532 = vmatprep.subr.bf16.mxu0 %v7571_v41 }
 0x181   : > { %1533 = vmatpush1.bf16.msra.mxu0 %v7569_v40 }
 0x182   : > { %1534 = vmatprep.subr.bf16.mxu0 %v7574_v45 }
 0x185   : > { %1535 = vmatpush1.bf16.msra.mxu0 %v7572_v46  ;;  %v9005_v46 = vmov 0.0  }
 0x186   : > { %1536 = vmatprep.subr.bf16.mxu0 %v7577_v47  ;;  %v9007_v47 = vmov 0.0  }
 0x189   : > { %1537 = vmatpush1.bf16.msra.mxu0 %v7575_v48 }
 0x18a   : > { %1538 = vmatprep.subr.bf16.mxu0 %v7580_v49 }
 0x18d   : > { %1539 = vmatpush1.bf16.msra.mxu0 %v7578_v50 }
 0x18e   : > { %1540 = vmatprep.subr.bf16.mxu0 %v7583_v51 }
 0x191   : > { %1541 = vmatpush1.bf16.msra.mxu0 %v7581_v52 }
 0x192   : > { %1542 = vmatprep.subr.bf16.mxu0 %v7586_v53 }
 0x195   : > { %1543 = vmatpush1.bf16.msra.mxu0 %v7584_v54 }
 0x196   : > { %1544 = vmatprep.subr.bf16.mxu0 %v7589_v55 }
 0x199   : > { %1545 = vmatpush1.bf16.msra.mxu0 %v7587_v56 }
 0x19a   : > { %1546 = vmatprep.subr.bf16.mxu0 %v7592_v57 }
 0x19d   : > { %1547 = vmatpush1.bf16.msra.mxu0 %v7590_v58 }
 0x19e   : > { %1548 = vmatprep.subr.bf16.mxu0 %v7595_v59 }
 0x1a1   : > { %1549 = vmatpush1.bf16.msra.mxu0 %v7593_v60 }
 0x1a2   : > { %1550 = vmatprep.subr.bf16.mxu0 %v7598_v61 }
 0x1a5   : > { %1551 = vmatpush1.bf16.msra.mxu0 %v7596_v62 }
 0x1a6   : > { %1552 = vmatprep.subr.bf16.mxu0 %v7601_v0 }
 0x1a8   : > { %v919_v3 = vpop.xlane.xlu1 %918 }
 0x1a9   : > { %1553 = vmatpush1.bf16.msra.mxu0 %v7599_v2  ;;  %7606 = vrcp.f32 %v919_v3 }
 0x1ac   : > { %1563 = vmatmul.mubr.bf16.vlgmr.msra.gmra.mrb[4].mxu0 %v8890_v44 }
 0x1b3   : > { %v7607_v5 = vpop.eup %7606 }
 0x1b4   : > { %v921_v6 = vmul.f32 0.26894143, %v7607_v5 }
 0x1b6   : > { %v922_v7 = vmul.f32 %v921_v6, %v8861_v19 }
 0x1b8   : > { %v8968_v10 = vpack.c.bf16 %v922_v7, %v922_v7 }
 0x24f   : > { %v1170_v18 = vpop.f32.mrb[0].mxu0  ;;  %v1367_v19 = vpop.f32.mrb[4].mxu1 }
 0x250   : > { %v8980_v20 = vadd.f32 %v1170_v18, %v1006_v13  ;;  %v8982_v21 = vadd.f32 %v1367_v19, %v1206_v14  ;;  %v1172_v22 = vpop.f32.mrb[1].mxu0  ;;  %v1369_v23 = vpop.f32.mrb[5].mxu1 }
 0x251   : > { %v8984_v27 = vadd.f32 %v1172_v22, %v1010_v15  ;;  %v8986_v28 = vadd.f32 %v1369_v23, %v1210_v17  ;;  %v1174_v29 = vpop.f32.mrb[2].mxu0  ;;  %v1371_v30 = vpop.f32.mrb[6].mxu1 }
 0x252   : > { %v1571_v31 = vpack.c.bf16 %v8982_v21, %v8982_v21  ;;  %v1175_v32 = vpop.f32.mrb[3].mxu0  ;;  %v1372_v33 = vpop.f32.mrb[7].mxu1 }
 0x253   : > { %v1572_v34 = vpack.c.bf16 %v8986_v28, %v8986_v28 }
 0x27f   : > { %v1564_v38 = vpop.f32.mrb[4].mxu0 }
 0x280   : > { %v8997_v39 = vadd.f32 %v1564_v38, %v1403_v36  ;;  %v1566_v43 = vpop.f32.mrb[5].mxu0 }
 0x281   : > { %v8999_v41 = vadd.f32 %v1566_v43, %v1407_v37  ;;  %v1568_v40 = vpop.f32.mrb[6].mxu0 }
 0x282   : > { %v1569_v45 = vpop.f32.mrb[7].mxu0 }
 0x283 LB: >> { %6536 = vmatprep.subr.msk.bf16.mxu0 %vm929_vm2, %v1572_v34  ;;  %s1581_s25 = smul.u32 24, %s8472_s3  ;;  %v8488_v50 = vmov 0.0   ;;  %vm1666_vm11 = vcmask 1043456   ;;  %v8489_v13 = vmov 0   ;;  %s1578_s3 = sadd.s32 1, %s8472_s3   ;;  %s8472_s3 = sphi %s9009_s3, %s1578_s3   ;;  %v8468_v47 = vphi %v9007_v47, %v10998_v47   ;;  %v8464_v46 = vphi %v9005_v46, %v10997_v46  }
 0x284   : >> { %1606 = vmatpush1.bf16.xpose.msra.mxu0 %v1571_v31  ;;  %1705 = vmatprep.mubr.bf16.mxu1 %v8489_v13  ;;  %p1575_p0 = scmp.ge.s32.totalorder %s1578_s3, 8  }
 0x285   : >> { %v1582_v48 = vstv %s1581_s25  ;;  %s1585_s22 = sadd.s32 24, %s1581_s25  ;;  %v7612_v37 = vld [vmem:[%s10946_s10 + $0x4] ss:$8 sps:$4 sm:$0xff] (%p1575_p0)   ;;  %v7614_v43 = vld [vmem:[%s10946_s10] ss:$8 sps:$4 sm:$0xff] (%p1575_p0)   ;;  %s10999_s1 = sld [smem:[#allocation17_spill]] (%p1575_p0) }
 0x286   : >> { %vm1583_vm5 = vcmp.ge.s32.totalorder %v8827_v63, %v1582_v48  ;;  %vm1584_vm6 = vcmp.ge.s32.totalorder %v8833_v1, %v1582_v48  ;;  %v1586_v49 = vstv %s1585_s22  ;;  %1877 = vmatprep.subr.bf16.mxu0 (%p1575_p0), %v7612_v37  ;;  %v7615_v40 = vld [vmem:[%s10946_s10 + $0x14] ss:$8 sps:$4 sm:$0xff] (%p1575_p0)   ;;  %v7618_v21 = vld [vmem:[%s10946_s10 + $0x24] ss:$8 sps:$4 sm:$0xff] (%p1575_p0)   ;;  %v7623_v31 = vld [vmem:[%s10946_s10 + $0x30] ss:$8 sps:$4 sm:$0xff] (%p1575_p0)  }
 0x287   : >> { %vm1587_vm7 = vcmp.lt.s32.totalorder %v8827_v63, %v1586_v49  ;;  %vm1588_vm8 = vcmp.lt.s32.totalorder %v8833_v1, %v1586_v49  ;;  %v7621_v28 = vld [vmem:[%s10946_s10 + $0x34] ss:$8 sps:$4 sm:$0xff] (%p1575_p0)   ;;  %v7624_v34 = vld [vmem:[%s10946_s10 + $0x44] ss:$8 sps:$4 sm:$0xff] (%p1575_p0)   ;;  %v7629_v45 = vld [vmem:[%s10946_s10 + $0x50] ss:$8 sps:$4 sm:$0xff] (%p1575_p0)  }
 0x288   : >> { %vm1589_vm9 = vmand %vm1583_vm5, %vm1587_vm7  ;;  %v7633_v48 = vld [vmem:[%s10946_s10 + $0x74] ss:$8 sps:$4 sm:$0xff] (%p1575_p0)   ;;  %v7635_v49 = vld [vmem:[%s10946_s10 + $0x70] ss:$8 sps:$4 sm:$0xff] (%p1575_p0)   ;;  %s11000_s3 = sld [smem:[#allocation19_spill]] (%p1575_p0)  ;;  %s11001_s22 = sld [smem:[#allocation15_spill]] (%p1575_p0) }
 0x289   : >> { %vm1590_vm10 = vmand %vm1584_vm6, %vm1588_vm8  ;;  %v6534_v51 = vsel %vm1589_vm9, 1.0, %v8488_v50  ;;  %v7669_v37 = vld [vmem:[%s10950_s14 + $0xa0] ss:$24 sps:$4 sm:$0xff] (%p1575_p0)   ;;  %s11002_s5 = sld [smem:[#allocation16_spill]] (%p1575_p0)  ;;  %s11003_s30 = sld [smem:[#allocation18_spill]] (%p1575_p0) }
 0x28a   : >> { %v6535_v52 = vsel %vm1590_vm10, 1.0, %v8488_v50  ;;  %v1595_v53 = vmul.f32 %v6534_v51, %v8980_v20  ;;  %v1659_v12 = vmul.f32 %v6534_v51, %v8997_v39  ;;  %v7617_v20 = vld [vmem:[%s10946_s10 + $0x10] ss:$8 sps:$4 sm:$0xff] (%p1575_p0)   ;;  %v7626_v39 = vld [vmem:[%s10946_s10 + $0x40] ss:$8 sps:$4 sm:$0xff] (%p1575_p0)   ;;  %s10052_s23 = smov (%p1575_p0), 0  }
 0x28b   : >> { %v1596_v54 = vmul.f32 %v6535_v52, %v8984_v27  ;;  %v1660_v11 = vmul.f32 %v6535_v52, %v8999_v41  ;;  %v7620_v27 = vld [vmem:[%s10946_s10 + $0x20] ss:$8 sps:$4 sm:$0xff] (%p1575_p0)   ;;  %v7627_v41 = vld [vmem:[%s10946_s10 + $0x54] ss:$8 sps:$4 sm:$0xff] (%p1575_p0)   ;;  %v7636_v50 = vld [vmem:[%s10946_s10 + $0x84] ss:$8 sps:$4 sm:$0xff] (%p1575_p0)  }
 0x28c   : >> { %v1597_v55 = vpack.c.bf16 %v1595_v53, %v1595_v53  ;;  %v1661_v15 = vpack.c.bf16 %v1659_v12, %v1659_v12  ;;  %v7638_v51 = vld [vmem:[%s10946_s10 + $0x80] ss:$8 sps:$4 sm:$0xff] (%p1575_p0)   ;;  %v7639_v52 = vld [vmem:[%s10946_s10 + $0x94] ss:$8 sps:$4 sm:$0xff] (%p1575_p0)   ;;  %v7641_v53 = vld [vmem:[%s10946_s10 + $0x90] ss:$8 sps:$4 sm:$0xff] (%p1575_p0)  }
 0x28d   : >> { %v1598_v56 = vpack.c.bf16 %v1596_v54, %v1596_v54  ;;  %v1662_v14 = vpack.c.bf16 %v1660_v11, %v1660_v11  ;;  %v7642_v54 = vld [vmem:[%s10946_s10 + $0xa4] ss:$8 sps:$4 sm:$0xff] (%p1575_p0)  }
 0x28e   : >> { %v1668_v17 = vsel %vm1666_vm11, %v1661_v15, 0  ;;  %v7653_v15 = vld [vmem:[%s10950_s14 + $0x14] ss:$24 sps:$4 sm:$0xff] (%p1575_p0)  }
 0x28f   : >> { %6537 = vmatprep.mubr.msk.bf16.mxu0 %vm929_vm2, %v1598_v56  ;;  %6538 = vmatprep.subr.msk.bf16.mxu1 %vm1666_vm11, %v1662_v14  ;;  %v7645_v56 = vld [vmem:[%s10946_s10 + $0xb4] ss:$8 sps:$4 sm:$0xff] (%p1575_p0)   ;;  %v7651_v14 = vld [vmem:[%s10950_s14 + $0x10] ss:$24 sps:$4 sm:$0xff] (%p1575_p0)  }
 0x290   : >> { %1638 = vmatmul.mubr.bf16.vlgmr.msra.gmra.mrb[0].mxu0 %v1597_v55  ;;  %1674 = vmatpush1.bf16.msra.mxu1 %v1668_v17  ;;  %v7644_v55 = vld [vmem:[%s10946_s10 + $0xa0] ss:$8 sps:$4 sm:$0xff] (%p1575_p0)   ;;  %v7654_v17 = vld [vmem:[%s10950_s14 + $0x34] ss:$24 sps:$4 sm:$0xff] (%p1575_p0)  }
 0x291   : > { %1878 = vmatpush1.bf16.msra.mxu0 (%p1575_p0), %v7614_v43  ;;  %v7677_v43 = vld [vmem:[%s10950_s14 + $0xd4] ss:$24 sps:$4 sm:$0xff] (%p1575_p0)  }
 0x292   : > { %1879 = vmatprep.subr.bf16.mxu0 (%p1575_p0), %v7615_v40  ;;  %v7674_v40 = vld [vmem:[%s10950_s14 + $0xc0] ss:$24 sps:$4 sm:$0xff] (%p1575_p0)  }
 0x295   : > { %1880 = vmatpush1.bf16.msra.mxu0 (%p1575_p0), %v7617_v20  ;;  %v7675_v20 = vld [vmem:[%s10950_s14 + $0xd0] ss:$24 sps:$4 sm:$0xff] (%p1575_p0)  }
 0x296   : > { %1881 = vmatprep.subr.bf16.mxu0 (%p1575_p0), %v7618_v21  ;;  %v7678_v21 = vld [vmem:[%s10950_s14 + $0xf4] ss:$24 sps:$4 sm:$0xff] (%p1575_p0)  }
 0x299   : > { %1882 = vmatpush1.bf16.msra.mxu0 (%p1575_p0), %v7620_v27  ;;  %v7683_v27 = vld [vmem:[%s10950_s14 + $0x104] ss:$24 sps:$4 sm:$0xff] (%p1575_p0)  }
 0x29a   : > { %1883 = vmatprep.subr.bf16.mxu0 (%p1575_p0), %v7621_v28  ;;  %v7680_v28 = vld [vmem:[%s10950_s14 + $0xf0] ss:$24 sps:$4 sm:$0xff] (%p1575_p0)  }
 0x29d   : > { %1884 = vmatpush1.bf16.msra.mxu0 (%p1575_p0), %v7623_v31  ;;  %v7681_v31 = vld [vmem:[%s10950_s14 + $0x100] ss:$24 sps:$4 sm:$0xff] (%p1575_p0)  }
 0x29e   : > { %1885 = vmatprep.subr.bf16.mxu0 (%p1575_p0), %v7624_v34  ;;  %v7684_v34 = vld [vmem:[%s10950_s14 + $0x124] ss:$24 sps:$4 sm:$0xff] (%p1575_p0)  }
 0x2a1   : > { %1886 = vmatpush1.bf16.msra.mxu0 (%p1575_p0), %v7626_v39 }
 0x2a2   : > { %1887 = vmatprep.subr.bf16.mxu0 (%p1575_p0), %v7627_v41 }
 0x2a5   : > { %1888 = vmatpush1.bf16.msra.mxu0 (%p1575_p0), %v7629_v45 }
 0x363   : >> { %v1639_v57 = vpop.f32.mrb[0].mxu0 }
 0x364   : >> { %v1645_v58 = vmul.f32 0.20412415, %v1639_v57  ;;  %v1641_v59 = vpop.f32.mrb[1].mxu0  ;;  %v7647_v57 = vld [vmem:[%s10946_s10 + $0xb0] ss:$8 sps:$4 sm:$0xff] (%p1575_p0)  }
 0x365   : >> { %v1642_v60 = vpop.f32.mrb[2].mxu0  ;;  %v1923_v59 = vsel (%p1575_p0), %vm1666_vm11, %v8890_v44, 0 }
 0x366   : >> { %v1643_v61 = vpop.f32.mrb[3].mxu0  ;;  %v1646_v62 = vsel %vm911_vm3, %v1645_v58, -1e+30  ;;  %v8490_v60 = vmov (%p1575_p0), 0  }
 0x367   : >> { %v1647_v0 = vsel %vm916_vm4, %v1646_v62, -inf  ;;  %v1742_v61 = vld [vmem:[%s10947_s11] sm:$0x3] (%p1575_p0) }
 0x368   : >> { %1648 = vmax.xlane.f32.xlu0 %v1647_v0  ;;  %v1747_v0 = vrot.slane (%p1575_p0), %v1742_v61, %v8871_v26 }
 0x36a   : > { %v7386_v44 = vadd.f32 (%p1575_p0), %v1747_v0, %v8680_v8  ;;  %v7650_v8 = vld [vmem:[%s10950_s14] ss:$24 sps:$4 sm:$0xff] (%p1575_p0)   ;;  %v7702_v0 = vld [vmem:[%s10950_s14 + $0x1b4] ss:$24 sps:$4 sm:$0xff] (%p1575_p0)  }
 0x3f5   : >> { %v1649_v2 = vpop.xlane.xlu0 %1648 }
 0x3f6   : >> { %v1650_v3 = vsub.f32 %v1646_v62, %v1649_v2  ;;  %v1751_v62 = vrot.slane (%p1575_p0), %v1742_v61, %v8868_v25  ;;  %v7699_v61 = vld [vmem:[%s10950_s14 + $0x190] ss:$24 sps:$4 sm:$0xff] (%p1575_p0)  }
 0x3f8   : >> { %v1651_v5 = vmul.f32 1.442695, %v1650_v3 }
 0x3fa   : >> { %7608 = vpow2.f32 %v1651_v5 }
 0x404   : >> { %v7609_v6 = vpop.eup %7608 }
 0x405   : >> { %v1653_v7 = vsel %vm916_vm4, %v7609_v6, 0.0 }
 0x406   : >> { %1654 = vadd.xlane.f32.xlu0 %v1653_v7 }
 0x493   : >> { %v1655_v18 = vpop.xlane.xlu0 %1654 }
 0x494   : >> { %7610 = vrcp.f32 %v1655_v18  ;;  %v7659_v18 = vld [vmem:[%s10950_s14 + $0x44] ss:$24 sps:$4 sm:$0xff] (%p1575_p0)  }
 0x49e   : >> { %v7611_v19 = vpop.eup %7610 }
 0x49f   : >> { %v1657_v22 = vmul.f32 %v7611_v19, %v7609_v6  ;;  %v7656_v19 = vld [vmem:[%s10950_s14 + $0x30] ss:$24 sps:$4 sm:$0xff] (%p1575_p0)  }
 0x4a1   : >> { %v1658_v23 = vpack.c.bf16 %v1657_v22, %v1657_v22  ;;  %v7657_v22 = vld [vmem:[%s10950_s14 + $0x40] ss:$24 sps:$4 sm:$0xff] (%p1575_p0)  }
 0x4a3   : >> { %6539 = vmatmul.mubr.msk.bf16.vlgmr.msra.gmra.mrb[0].mxu1 %vm916_vm4, %v1658_v23  ;;  %v7660_v23 = vld [vmem:[%s10950_s14 + $0x64] ss:$24 sps:$4 sm:$0xff] (%p1575_p0)  }
 0x574   : > { %1577 = sbr.rel (!%p1575_p0) target bundleno = 643 (0x283), region = 222 }
 0x576   : >> { %v1707_v29 = vpop.f32.mrb[0].mxu1 }
 0x577   : >> { %v9040_v47 = vadd.f32 %v8468_v47, %v1707_v29   ;;  %v1709_v32 = vpop.f32.mrb[1].mxu1  ;;  %v7665_v29 = vld [vmem:[%s10950_s14 + $0x74] ss:$24 sps:$4 sm:$0xff] (%p1575_p0)  }
 0x578   : >> { %v1715_v33 = vadd.f32 %v8464_v46, %v1709_v32   ;;  %v1711_v35 = vpop.f32.mrb[2].mxu1  ;;  %v7663_v32 = vld [vmem:[%s10950_s14 + $0x70] ss:$24 sps:$4 sm:$0xff] (%p1575_p0)  }
 0x579   : >> { %v10996_v30 = vmov %v9040_v47  ;;  %v1712_v36 = vpop.f32.mrb[3].mxu1  ;;  %v7671_v35 = vld [vmem:[%s10950_s14 + $0xa4] ss:$24 sps:$4 sm:$0xff] (%p1575_p0)  }
 0x57a   : >> { %v10997_v46 = vmov %v1715_v33  ;;  %v10998_v47 = vmov %v10996_v30  ;;  %v1717_v38 = vpack.c.bf16 (%p1575_p0), %v1715_v33, %v1715_v33  ;;  %v1716_v58 = vpack.c.bf16 (%p1575_p0), %v10996_v30, %v10996_v30  ;;  %v7662_v30 = vld [vmem:[%s10950_s14 + $0x60] ss:$24 sps:$4 sm:$0xff] (%p1575_p0)   ;;  %v7666_v33 = vld [vmem:[%s10950_s14 + $0x94] ss:$24 sps:$4 sm:$0xff] (%p1575_p0)   ;;  %v7668_v36 = vld [vmem:[%s10950_s14 + $0x90] ss:$24 sps:$4 sm:$0xff] (%p1575_p0)  }
 0x57b   : > { %v7630_v46 = vld [vmem:[%s10946_s10 + $0x64] ss:$8 sps:$4 sm:$0xff]   ;;  %v7632_v47 = vld [vmem:[%s10946_s10 + $0x60] ss:$8 sps:$4 sm:$0xff]  }
 0x57c   : > { %6564 = vmatprep.mubr.msk.bf16.mxu0 %vm929_vm2, %v1717_v38  ;;  %1889 = vmatprep.subr.bf16.mxu0 %v7630_v46  ;;  %v7672_v38 = vld [vmem:[%s10950_s14 + $0xc4] ss:$24 sps:$4 sm:$0xff]  }
 0x57d   : > { %1890 = vmatpush1.bf16.msra.mxu0 %v7632_v47 }
 0x57e   : > { %1891 = vmatprep.subr.bf16.mxu0 %v7633_v48 }
 0x581   : > { %1892 = vmatpush1.bf16.msra.mxu0 %v7635_v49 }
 0x582   : > { %1893 = vmatprep.subr.bf16.mxu0 %v7636_v50 }
 0x585   : > { %1894 = vmatpush1.bf16.msra.mxu0 %v7638_v51  ;;  %v7686_v51 = vld [vmem:[%s10950_s14 + $0x120] ss:$24 sps:$4 sm:$0xff]  }
 0x586   : > { %1895 = vmatprep.subr.bf16.mxu0 %v7639_v52  ;;  %v7689_v52 = vld [vmem:[%s10950_s14 + $0x134] ss:$24 sps:$4 sm:$0xff]  }
 0x589   : > { %1896 = vmatpush1.bf16.msra.mxu0 %v7641_v53  ;;  %v7687_v53 = vld [vmem:[%s10950_s14 + $0x130] ss:$24 sps:$4 sm:$0xff]  }
 0x58a   : > { %1897 = vmatprep.subr.bf16.mxu0 %v7642_v54  ;;  %v7690_v54 = vld [vmem:[%s10950_s14 + $0x154] ss:$24 sps:$4 sm:$0xff]  }
 0x58d   : > { %1898 = vmatpush1.bf16.msra.mxu0 %v7644_v55  ;;  %v7692_v55 = vld [vmem:[%s10950_s14 + $0x150] ss:$24 sps:$4 sm:$0xff]  }
 0x58e   : > { %1899 = vmatprep.subr.bf16.mxu0 %v7645_v56  ;;  %v7695_v56 = vld [vmem:[%s10950_s14 + $0x164] ss:$24 sps:$4 sm:$0xff]  }
 0x591   : > { %1900 = vmatpush1.bf16.msra.mxu0 %v7647_v57  ;;  %v7693_v57 = vld [vmem:[%s10950_s14 + $0x160] ss:$24 sps:$4 sm:$0xff]  }
 0x592   : > { %6565 = vmatprep.subr.msk.bf16.mxu0 %vm1666_vm11, %v8885_v42  ;;  %v7388_v42 = vadd.f32 %v1751_v62, %v8682_v9  ;;  %v7648_v9 = vld [vmem:[%s10950_s14 + $0x4] ss:$24 sps:$4 sm:$0xff]   ;;  %v7701_v62 = vld [vmem:[%s10950_s14 + $0x194] ss:$24 sps:$4 sm:$0xff]  }
 0x593   : > { %2487 = vmatprep.subr.bf16.mxu1 %v7648_v9  ;;  %v7719_v9 = vld [vmem:[%s10950_s14 + $0x224] ss:$24 sps:$4 sm:$0xff]  }
 0x594   : > { %1910 = vmatmul.mubr.bf16.vlgmr.msra.gmra.mrb[0].mxu0 %v1716_v58  ;;  %2488 = vmatpush1.bf16.msra.mxu1 %v7650_v8  ;;  %v7696_v58 = vld [vmem:[%s10950_s14 + $0x184] ss:$24 sps:$4 sm:$0xff]   ;;  %v7716_v8 = vld [vmem:[%s10950_s14 + $0x210] ss:$24 sps:$4 sm:$0xff]  }
 0x595   : > { %1928 = vmatpush1.bf16.msra.mxu0 %v1923_v59  ;;  %1959 = vmatprep.mubr.bf16.mxu0 %v8490_v60  ;;  %v7698_v59 = vld [vmem:[%s10950_s14 + $0x180] ss:$24 sps:$4 sm:$0xff]  }
 0x596   : > { %2569 = vmatprep.subr.bf16.mxu0 %v7653_v15  ;;  %2489 = vmatprep.subr.bf16.mxu1 %v7654_v17  ;;  %v7722_v15 = vld [vmem:[%s10950_s14 + $0xc] ss:$24 sps:$4 sm:$0xff]  }
 0x598   : > { %2490 = vmatpush1.bf16.msra.mxu1 %v7656_v19 }
 0x599   : > { %2491 = vmatprep.subr.bf16.mxu1 %v7660_v23  ;;  %v1973_v23 = vld [vmem:[%s10949_s13] sm:$0x3] }
 0x59c   : > { %2492 = vmatpush1.bf16.msra.mxu1 %v7662_v30 }
 0x59d   : > { %2493 = vmatprep.subr.bf16.mxu1 %v7666_v33 }
 0x5a0   : > { %6566 = vmatmul.mubr.msk.bf16.vlgmr.msra.gmra.mrb[0].mxu0 %vm916_vm4, %v8968_v10  ;;  %2494 = vmatpush1.bf16.msra.mxu1 %v7668_v36 }
 0x5a1   : > { %2570 = vmatpush1.bf16.msra.mxu0 %v7651_v14  ;;  %2495 = vmatprep.subr.bf16.mxu1 %v7672_v38  ;;  %v7717_v14 = vld [vmem:[%s10950_s14 + $0x220] ss:$24 sps:$4 sm:$0xff]  }
 0x5a2   : > { %2571 = vmatprep.subr.bf16.mxu0 %v7659_v18 }
 0x5a4   : > { %2496 = vmatpush1.bf16.msra.mxu1 %v7674_v40 }
 0x5a5   : > { %2572 = vmatpush1.bf16.msra.mxu0 %v7657_v22  ;;  %2497 = vmatprep.subr.bf16.mxu1 %v7678_v21  ;;  %v1972_v22 = vld [vmem:[%s10948_s12] sm:$0x3] }
 0x5a6   : > { %2573 = vmatprep.subr.bf16.mxu0 %v7665_v29  ;;  %v2000_v29 = vrot.slane %v1972_v22, %v8868_v25  ;;  %v1996_v30 = vrot.slane %v1972_v22, %v8871_v26  ;;  %v7777_v22 = vld [vmem:[%s10952_s16 + $0x70] ss:$8 sps:$4 sm:$0xff]  }
 0x5a8   : > { %2498 = vmatpush1.bf16.msra.mxu1 %v7680_v28 }
 0x5a9   : > { %2574 = vmatpush1.bf16.msra.mxu0 %v7663_v32  ;;  %2499 = vmatprep.subr.bf16.mxu1 %v7684_v34  ;;  %v7723_v34 = vld [vmem:[%s10950_s14 + $0x38] ss:$24 sps:$4 sm:$0xff]  }
 0x5aa   : > { %2575 = vmatprep.subr.bf16.mxu0 %v7671_v35  ;;  %v2013_v35 = vrot.slane %v1973_v23, %v8868_v25 }
 0x5ac   : > { %2500 = vmatpush1.bf16.msra.mxu1 %v7686_v51  ;;  %v7740_v51 = vld [vmem:[%s10950_s14 + $0x12c] ss:$24 sps:$4 sm:$0xff]  }
 0x5ad   : > { %2576 = vmatpush1.bf16.msra.mxu0 %v7669_v37  ;;  %2501 = vmatprep.subr.bf16.mxu1 %v7690_v54  ;;  %v2009_v37 = vrot.slane %v1973_v23, %v8871_v26  ;;  %v7741_v54 = vld [vmem:[%s10950_s14 + $0x158] ss:$24 sps:$4 sm:$0xff]   ;;  %v7782_v23 = vld [vmem:[%s10952_s16 + $0x84] ss:$8 sps:$4 sm:$0xff]  }
 0x5ae   : > { %2577 = vmatprep.subr.bf16.mxu0 %v7677_v43 }
 0x5b0   : > { %2502 = vmatpush1.bf16.msra.mxu1 %v7692_v55  ;;  %v7746_v55 = vld [vmem:[%s10950_s14 + $0x18c] ss:$24 sps:$4 sm:$0xff]  }
 0x5b1   : > { %2578 = vmatpush1.bf16.msra.mxu0 %v7675_v20  ;;  %2503 = vmatprep.subr.bf16.mxu1 %v7696_v58  ;;  %v7747_v58 = vld [vmem:[%s10950_s14 + $0x1b8] ss:$24 sps:$4 sm:$0xff]  }
 0x5b2   : > { %2579 = vmatprep.subr.bf16.mxu0 %v7683_v27  ;;  %v7720_v27 = vld [vmem:[%s10950_s14 + $0x8] ss:$24 sps:$4 sm:$0xff]  }
 0x5b4   : > { %2504 = vmatpush1.bf16.msra.mxu1 %v7698_v59  ;;  %v7752_v59 = vld [vmem:[%s10950_s14 + $0x1ec] ss:$24 sps:$4 sm:$0xff]  }
 0x5b5   : > { %2580 = vmatpush1.bf16.msra.mxu0 %v7681_v31  ;;  %2505 = vmatprep.subr.bf16.mxu1 %v7702_v0  ;;  %v7725_v31 = vld [vmem:[%s10950_s14 + $0x3c] ss:$24 sps:$4 sm:$0xff]   ;;  %v7753_v0 = vld [vmem:[%s10950_s14 + $0x218] ss:$24 sps:$4 sm:$0xff]  }
 0x5b6   : > { %2581 = vmatprep.subr.bf16.mxu0 %v7689_v52  ;;  %v7738_v52 = vld [vmem:[%s10950_s14 + $0x128] ss:$24 sps:$4 sm:$0xff]  }
 0x5b9   : > { %2582 = vmatpush1.bf16.msra.mxu0 %v7687_v53  ;;  %v7743_v53 = vld [vmem:[%s10950_s14 + $0x15c] ss:$24 sps:$4 sm:$0xff]  }
 0x5ba   : > { %2583 = vmatprep.subr.bf16.mxu0 %v7695_v56  ;;  %v7744_v56 = vld [vmem:[%s10950_s14 + $0x188] ss:$24 sps:$4 sm:$0xff]  }
 0x5bd   : > { %2584 = vmatpush1.bf16.msra.mxu0 %v7693_v57  ;;  %v7749_v57 = vld [vmem:[%s10950_s14 + $0x1bc] ss:$24 sps:$4 sm:$0xff]  }
 0x5be   : > { %2585 = vmatprep.subr.bf16.mxu0 %v7701_v62  ;;  %v7755_v62 = vld [vmem:[%s10950_s14 + $0x21c] ss:$24 sps:$4 sm:$0xff]  }
 0x5c1   : > { %2586 = vmatpush1.bf16.msra.mxu0 %v7699_v61  ;;  %v7750_v61 = vld [vmem:[%s10950_s14 + $0x1e8] ss:$24 sps:$4 sm:$0xff]  }
 0x673   : > { %v1961_v2 = vpop.f32.mrb[0].mxu0 }
 0x674   : > { %v1963_v3 = vpop.f32.mrb[1].mxu0  ;;  %v9141_v7 = vadd.f32 %v7386_v44, %v1961_v2  ;;  %v7704_v44 = vld [vmem:[%s10950_s14 + $0x1b0] ss:$24 sps:$4 sm:$0xff]   ;;  %v7705_v2 = vld [vmem:[%s10950_s14 + $0x1c0] ss:$24 sps:$4 sm:$0xff]  }
 0x675   : > { %v9139_v5 = vadd.f32 %v7388_v42, %v1963_v3  ;;  %v1965_v6 = vpop.f32.mrb[2].mxu0  ;;  %v7707_v42 = vld [vmem:[%s10950_s14 + $0x1c4] ss:$24 sps:$4 sm:$0xff]   ;;  %2506 = vmatpush1.bf16.msra.mxu1 %v7704_v44  ;;  %v7756_v44 = vld [vmem:[%s10952_s16] ss:$8 sps:$4 sm:$0xff]  }
 0x676   : > { %v1966_v11 = vpop.f32.mrb[3].mxu0  ;;  %v7708_v3 = vld [vmem:[%s10950_s14 + $0x1e4] ss:$24 sps:$4 sm:$0xff]   ;;  %2587 = vmatprep.subr.bf16.mxu0 %v7707_v42  ;;  %v7713_v6 = vld [vmem:[%s10950_s14 + $0x1f4] ss:$24 sps:$4 sm:$0xff]  }
 0x677   : > { %v1974_v12 = vsel %vm929_vm2, %v9139_v5, 0.0  ;;  %v7710_v11 = vld [vmem:[%s10950_s14 + $0x1e0] ss:$24 sps:$4 sm:$0xff]   ;;  %2588 = vmatpush1.bf16.msra.mxu0 %v7705_v2  ;;  %2507 = vmatprep.subr.bf16.mxu1 %v7708_v3  ;;  %v7758_v42 = vld [vmem:[%s10952_s16 + $0x4] ss:$8 sps:$4 sm:$0xff]  }
 0x678   : > { %v1975_v13 = vadd.f32 %v9141_v7, %v1974_v12  ;;  %v7711_v12 = vld [vmem:[%s10950_s14 + $0x1f0] ss:$24 sps:$4 sm:$0xff]   ;;  %2589 = vmatprep.subr.bf16.mxu0 %v7713_v6  ;;  %v7761_v2 = vld [vmem:[%s10952_s16 + $0x14] ss:$8 sps:$4 sm:$0xff]   ;;  %v7764_v6 = vld [vmem:[%s10952_s16 + $0x24] ss:$8 sps:$4 sm:$0xff]  }
 0x679   : > { %2508 = vmatpush1.bf16.msra.mxu1 %v7710_v11  ;;  %v7759_v3 = vld [vmem:[%s10952_s16 + $0x10] ss:$8 sps:$4 sm:$0xff]   ;;  %v7762_v11 = vld [vmem:[%s10952_s16 + $0x20] ss:$8 sps:$4 sm:$0xff]  }
 0x67a   : > { %1976 = vadd.xlane.f32.xlu0 %v1975_v13  ;;  %v7714_v13 = vld [vmem:[%s10950_s14 + $0x214] ss:$24 sps:$4 sm:$0xff]  }
 0x67b   : > { %2590 = vmatpush1.bf16.msra.mxu0 %v7711_v12  ;;  %2509 = vmatprep.subr.bf16.mxu1 %v7714_v13  ;;  %v7767_v12 = vld [vmem:[%s10952_s16 + $0x34] ss:$8 sps:$4 sm:$0xff]   ;;  %v7765_v13 = vld [vmem:[%s10952_s16 + $0x30] ss:$8 sps:$4 sm:$0xff]  }
 0x67c   : > { %2591 = vmatprep.subr.bf16.mxu0 %v7719_v9  ;;  %v7770_v9 = vld [vmem:[%s10952_s16 + $0x44] ss:$8 sps:$4 sm:$0xff]  }
 0x67d   : > { %2510 = vmatpush1.bf16.msra.mxu1 %v7716_v8  ;;  %v7768_v8 = vld [vmem:[%s10952_s16 + $0x40] ss:$8 sps:$4 sm:$0xff]  }
 0x67e   : > { %2528 = vmatprep.subr.bf16.mxu1 %v7722_v15  ;;  %v7771_v15 = vld [vmem:[%s10952_s16 + $0x50] ss:$8 sps:$4 sm:$0xff]  }
 0x67f   : > { %2592 = vmatpush1.bf16.msra.mxu0 %v7717_v14  ;;  %v7773_v14 = vld [vmem:[%s10952_s16 + $0x54] ss:$8 sps:$4 sm:$0xff]  }
 0x707   : > { %v1977_v39 = vpop.xlane.xlu0 %1976 }
 0x708   : > { %v1978_v41 = vmul.f32 0.0052083335, %v1977_v39  ;;  %v7728_v39 = vld [vmem:[%s10950_s14 + $0x6c] ss:$24 sps:$4 sm:$0xff]  }
 0x70a   : > { %v9222_v45 = vsub.f32 %v9141_v7, %v1978_v41  ;;  %v9225_v46 = vsub.f32 %v9139_v5, %v1978_v41  ;;  %v7726_v41 = vld [vmem:[%s10950_s14 + $0x68] ss:$24 sps:$4 sm:$0xff]  }
 0x70c   : > { %v1981_v47 = vmul.f32 %v9222_v45, %v9222_v45  ;;  %v1982_v48 = vmul.f32 %v9225_v46, %v9225_v46 }
 0x70e   : > { %v1983_v49 = vsel %vm929_vm2, %v1982_v48, 0.0  ;;  %v7732_v48 = vld [vmem:[%s10950_s14 + $0xc8] ss:$24 sps:$4 sm:$0xff]  }
 0x70f   : > { %v1984_v50 = vadd.f32 %v1983_v49, %v1981_v47  ;;  %v7734_v47 = vld [vmem:[%s10950_s14 + $0xcc] ss:$24 sps:$4 sm:$0xff]   ;;  %v7737_v49 = vld [vmem:[%s10950_s14 + $0xfc] ss:$24 sps:$4 sm:$0xff]  }
 0x711   : > { %1985 = vadd.xlane.f32.xlu0 %v1984_v50  ;;  %v7735_v50 = vld [vmem:[%s10950_s14 + $0xf8] ss:$24 sps:$4 sm:$0xff]  }
 0x79e   : > { %v1986_v17 = vpop.xlane.xlu0 %1985 }
 0x79f   : > { %v1987_v18 = vmul.f32 0.0052083335, %v1986_v17  ;;  %v7776_v17 = vld [vmem:[%s10952_s16 + $0x64] ss:$8 sps:$4 sm:$0xff]  }
 0x7a1   : > { %v1988_v19 = vadd.f32 1e-05, %v1987_v18  ;;  %v7774_v18 = vld [vmem:[%s10952_s16 + $0x60] ss:$8 sps:$4 sm:$0xff]  }
 0x7a3   : > { %8008 = vrsqrt.f32 %v1988_v19  ;;  %v7779_v19 = vld [vmem:[%s10952_s16 + $0x74] ss:$8 sps:$4 sm:$0xff]  }
 0x7ad   : > { %v8009_v32 = vpop.eup %8008 }
 0x7ae   : > { %v1991_v33 = vmul.f32 %v8009_v32, %v9225_v46  ;;  %v1990_v36 = vmul.f32 %v8009_v32, %v9222_v45  ;;  %v7731_v45 = vld [vmem:[%s10950_s14 + $0x9c] ss:$24 sps:$4 sm:$0xff]   ;;  %v7729_v46 = vld [vmem:[%s10950_s14 + $0x98] ss:$24 sps:$4 sm:$0xff]  }
 0x7af   : > { %v7783_v32 = vld [vmem:[%s10952_s16 + $0x90] ss:$8 sps:$4 sm:$0xff]  }
 0x7b0   : > { %v2004_v38 = vmul.f32 %v2000_v29, %v1991_v33  ;;  %v2003_v43 = vmul.f32 %v1996_v30, %v1990_v36  ;;  %v7780_v29 = vld [vmem:[%s10952_s16 + $0x80] ss:$8 sps:$4 sm:$0xff]   ;;  %v7785_v30 = vld [vmem:[%s10952_s16 + $0x94] ss:$8 sps:$4 sm:$0xff]   ;;  %v7788_v33 = vld [vmem:[%s10952_s16 + $0xa4] ss:$8 sps:$4 sm:$0xff]  }
 0x7b1   : > { %v7791_v36 = vld [vmem:[%s10952_s16 + $0xb4] ss:$8 sps:$4 sm:$0xff]  }
 0x7b2   : > { %v2017_v40 = vadd.f32 %v2013_v35, %v2004_v38  ;;  %v2016_v20 = vadd.f32 %v2009_v37, %v2003_v43  ;;  %v7786_v35 = vld [vmem:[%s10952_s16 + $0xa0] ss:$8 sps:$4 sm:$0xff]   ;;  %v7789_v37 = vld [vmem:[%s10952_s16 + $0xb0] ss:$8 sps:$4 sm:$0xff]   ;;  %v7794_v38 = vld [vmem:[%s10952_s16 + $0xc4] ss:$8 sps:$4 sm:$0xff]  }
 0x7b3   : > { %v7797_v43 = vld [vmem:[%s10952_s16 + $0x104] ss:$8 sps:$4 sm:$0xff]  }
 0x7b4   : > { %v2019_v21 = vpack.c.bf16 %v2017_v40, %v2017_v40  ;;  %v2018_v28 = vpack.c.bf16 %v2016_v20, %v2016_v20  ;;  %v7792_v40 = vld [vmem:[%s10952_s16 + $0xc0] ss:$8 sps:$4 sm:$0xff]   ;;  %3395 = vmatprep.subr.bf16.mxu0 %v7797_v43 }
 0x7b5   : > { %v7795_v20 = vld [vmem:[%s10952_s16 + $0x100] ss:$8 sps:$4 sm:$0xff]  }
 0x7b6   : > { %6639 = vmatprep.mubr.msk.bf16.mxu1 %vm929_vm2, %v2019_v21  ;;  %6641 = vmatprep.mubr.msk.bf16.mxu0 %vm929_vm2, %v2019_v21 }
 0x7b7   : > { %2520 = vmatmul.mubr.bf16.vlgmr.msra.gmra.mrb[0].mxu1 %v2018_v28  ;;  %2602 = vmatmul.mubr.bf16.vlgmr.msra.gmra.mrb[4].mxu0 %v2018_v28 }
 0x7b8   : > { %2529 = vmatpush1.bf16.msra.mxu1 %v7720_v27  ;;  %6640 = vmatprep.mubr.msk.bf16.mxu1 %vm929_vm2, %v2019_v21  ;;  %v7800_v21 = vld [vmem:[%s10952_s16 + $0xd4] ss:$8 sps:$4 sm:$0xff]  }
 0x7b9   : > { %2530 = vmatprep.subr.bf16.mxu1 %v7725_v31  ;;  %3396 = vmatpush1.bf16.msra.mxu0 %v7795_v20  ;;  %v7803_v27 = vld [vmem:[%s10952_s16 + $0x114] ss:$8 sps:$4 sm:$0xff]   ;;  %v7801_v31 = vld [vmem:[%s10952_s16 + $0x110] ss:$8 sps:$4 sm:$0xff]  }
 0x7ba   : > { %3397 = vmatprep.subr.bf16.mxu0 %v7803_v27 }
 0x7bc   : > { %2531 = vmatpush1.bf16.msra.mxu1 %v7723_v34  ;;  %v7806_v34 = vld [vmem:[%s10952_s16 + $0xe4] ss:$8 sps:$4 sm:$0xff]  }
 0x7bd   : > { %2532 = vmatprep.subr.bf16.mxu1 %v7728_v39  ;;  %3398 = vmatpush1.bf16.msra.mxu0 %v7801_v31  ;;  %v7809_v39 = vld [vmem:[%s10952_s16 + $0x124] ss:$8 sps:$4 sm:$0xff]  }
 0x7be   : > { %3399 = vmatprep.subr.bf16.mxu0 %v7809_v39 }
 0x7c0   : > { %2533 = vmatpush1.bf16.msra.mxu1 %v7726_v41  ;;  %v7804_v41 = vld [vmem:[%s10952_s16 + $0xe0] ss:$8 sps:$4 sm:$0xff]  }
 0x7c1   : > { %2534 = vmatprep.subr.bf16.mxu1 %v7731_v45  ;;  %v7807_v45 = vld [vmem:[%s10952_s16 + $0x120] ss:$8 sps:$4 sm:$0xff]  }
 0x7c2   : > { %3400 = vmatpush1.bf16.msra.mxu0 %v7807_v45 }
 0x7c4   : > { %2535 = vmatpush1.bf16.msra.mxu1 %v7729_v46  ;;  %v7812_v46 = vld [vmem:[%s10952_s16 + $0xf4] ss:$8 sps:$4 sm:$0xff]  }
 0x7c5   : > { %2536 = vmatprep.subr.bf16.mxu1 %v7734_v47  ;;  %v7815_v47 = vld [vmem:[%s10952_s16 + $0x134] ss:$8 sps:$4 sm:$0xff]  }
 0x7c6   : > { %3401 = vmatprep.subr.bf16.mxu0 %v7815_v47 }
 0x7c8   : > { %2537 = vmatpush1.bf16.msra.mxu1 %v7732_v48  ;;  %v7810_v48 = vld [vmem:[%s10952_s16 + $0xf0] ss:$8 sps:$4 sm:$0xff]  }
 0x7c9   : > { %2538 = vmatprep.subr.bf16.mxu1 %v7737_v49  ;;  %v7813_v49 = vld [vmem:[%s10952_s16 + $0x130] ss:$8 sps:$4 sm:$0xff]  }
 0x7ca   : > { %3402 = vmatpush1.bf16.msra.mxu0 %v7813_v49 }
 0x7cc   : > { %2539 = vmatpush1.bf16.msra.mxu1 %v7735_v50  ;;  %v7818_v50 = vld [vmem:[%s10952_s16 + $0x144] ss:$8 sps:$4 sm:$0xff]  }
 0x7cd   : > { %2540 = vmatprep.subr.bf16.mxu1 %v7740_v51  ;;  %v7821_v51 = vld [vmem:[%s10952_s16 + $0x204] ss:$8 sps:$4 sm:$0xff]   ;;  %3403 = vmatprep.subr.bf16.mxu0 %v7818_v50 }
 0x7d0   : > { %2541 = vmatpush1.bf16.msra.mxu1 %v7738_v52  ;;  %v7816_v52 = vld [vmem:[%s10952_s16 + $0x140] ss:$8 sps:$4 sm:$0xff]  }
 0x7d1   : > { %2542 = vmatprep.subr.bf16.mxu1 %v7743_v53  ;;  %3404 = vmatpush1.bf16.msra.mxu0 %v7816_v52  ;;  %v7824_v53 = vld [vmem:[%s10952_s16 + $0x154] ss:$8 sps:$4 sm:$0xff]  }
 0x7d2   : > { %3405 = vmatprep.subr.bf16.mxu0 %v7824_v53 }
 0x7d4   : > { %2543 = vmatpush1.bf16.msra.mxu1 %v7741_v54  ;;  %v7822_v54 = vld [vmem:[%s10952_s16 + $0x150] ss:$8 sps:$4 sm:$0xff]  }
 0x7d5   : > { %2544 = vmatprep.subr.bf16.mxu1 %v7746_v55  ;;  %3406 = vmatpush1.bf16.msra.mxu0 %v7822_v54  ;;  %v7830_v55 = vld [vmem:[%s10952_s16 + $0x164] ss:$8 sps:$4 sm:$0xff]  }
 0x7d6   : > { %3407 = vmatprep.subr.bf16.mxu0 %v7830_v55 }
 0x7d8   : > { %2545 = vmatpush1.bf16.msra.mxu1 %v7744_v56  ;;  %v7828_v56 = vld [vmem:[%s10952_s16 + $0x160] ss:$8 sps:$4 sm:$0xff]  }
 0x7d9   : > { %2546 = vmatprep.subr.bf16.mxu1 %v7749_v57  ;;  %3408 = vmatpush1.bf16.msra.mxu0 %v7828_v56  ;;  %v7836_v57 = vld [vmem:[%s10952_s16 + $0x174] ss:$8 sps:$4 sm:$0xff]  }
 0x7da   : > { %3409 = vmatprep.subr.bf16.mxu0 %v7836_v57 }
 0x7dc   : > { %2547 = vmatpush1.bf16.msra.mxu1 %v7747_v58  ;;  %v7834_v58 = vld [vmem:[%s10952_s16 + $0x170] ss:$8 sps:$4 sm:$0xff]  }
 0x7dd   : > { %2548 = vmatprep.subr.bf16.mxu1 %v7752_v59  ;;  %3410 = vmatpush1.bf16.msra.mxu0 %v7834_v58  ;;  %v7842_v59 = vld [vmem:[%s10952_s16 + $0x184] ss:$8 sps:$4 sm:$0xff]  }
 0x7de   : > { %3411 = vmatprep.subr.bf16.mxu0 %v7842_v59 }
 0x7e0   : > { %2549 = vmatpush1.bf16.msra.mxu1 %v7750_v61  ;;  %v7840_v61 = vld [vmem:[%s10952_s16 + $0x180] ss:$8 sps:$4 sm:$0xff]  }
 0x7e1   : > { %2550 = vmatprep.subr.bf16.mxu1 %v7755_v62  ;;  %3412 = vmatpush1.bf16.msra.mxu0 %v7840_v61  ;;  %v7848_v62 = vld [vmem:[%s10952_s16 + $0x194] ss:$8 sps:$4 sm:$0xff]  }
 0x7e2   : > { %3413 = vmatprep.subr.bf16.mxu0 %v7848_v62 }
 0x7e4   : > { %2551 = vmatpush1.bf16.msra.mxu1 %v7753_v0  ;;  %v7846_v0 = vld [vmem:[%s10952_s16 + $0x190] ss:$8 sps:$4 sm:$0xff]  }
 0x7e5   : > { %3354 = vmatprep.subr.bf16.mxu1 %v7758_v42  ;;  %3414 = vmatpush1.bf16.msra.mxu0 %v7846_v0  ;;  %v7854_v42 = vld [vmem:[%s10952_s16 + $0x1a4] ss:$8 sps:$4 sm:$0xff]  }
 0x7e6   : > { %3415 = vmatprep.subr.bf16.mxu0 %v7854_v42 }
 0x7e7   : > { %2561 = vmatmul.mubr.bf16.vlgmr.msra.gmra.mrb[4].mxu1 %v2018_v28  ;;  %v7798_v28 = vld [vmem:[%s10952_s16 + $0xd0] ss:$8 sps:$4 sm:$0xff]  }
 0x7e8   : > { %3355 = vmatpush1.bf16.msra.mxu1 %v7756_v44  ;;  %v7852_v44 = vld [vmem:[%s10952_s16 + $0x1a0] ss:$8 sps:$4 sm:$0xff]  }
 0x7e9   : > { %3356 = vmatprep.subr.bf16.mxu1 %v7761_v2  ;;  %3416 = vmatpush1.bf16.msra.mxu0 %v7852_v44  ;;  %v7860_v2 = vld [vmem:[%s10952_s16 + $0x1b4] ss:$8 sps:$4 sm:$0xff]  }
 0x7ea   : > { %3417 = vmatprep.subr.bf16.mxu0 %v7860_v2 }
 0x7ec   : > { %3357 = vmatpush1.bf16.msra.mxu1 %v7759_v3  ;;  %v7858_v3 = vld [vmem:[%s10952_s16 + $0x1b0] ss:$8 sps:$4 sm:$0xff]  }
 0x7ed   : > { %3358 = vmatprep.subr.bf16.mxu1 %v7764_v6  ;;  %3418 = vmatpush1.bf16.msra.mxu0 %v7858_v3  ;;  %v7866_v6 = vld [vmem:[%s10952_s16 + $0x1c4] ss:$8 sps:$4 sm:$0xff]  }
 0x7ee   : > { %3419 = vmatprep.subr.bf16.mxu0 %v7866_v6 }
 0x7f0   : > { %3359 = vmatpush1.bf16.msra.mxu1 %v7762_v11  ;;  %v7864_v11 = vld [vmem:[%s10952_s16 + $0x1c0] ss:$8 sps:$4 sm:$0xff]  }
 0x7f1   : > { %3360 = vmatprep.subr.bf16.mxu1 %v7767_v12  ;;  %3420 = vmatpush1.bf16.msra.mxu0 %v7864_v11  ;;  %v7872_v12 = vld [vmem:[%s10952_s16 + $0x1d4] ss:$8 sps:$4 sm:$0xff]  }
 0x7f2   : > { %3421 = vmatprep.subr.bf16.mxu0 %v7872_v12 }
 0x7f4   : > { %3361 = vmatpush1.bf16.msra.mxu1 %v7765_v13  ;;  %v7870_v13 = vld [vmem:[%s10952_s16 + $0x1d0] ss:$8 sps:$4 sm:$0xff]  }
 0x7f5   : > { %3362 = vmatprep.subr.bf16.mxu1 %v7770_v9  ;;  %3422 = vmatpush1.bf16.msra.mxu0 %v7870_v13  ;;  %v7878_v9 = vld [vmem:[%s10952_s16 + $0x1e4] ss:$8 sps:$4 sm:$0xff]  }
 0x7f6   : > { %3423 = vmatprep.subr.bf16.mxu0 %v7878_v9 }
 0x7f8   : > { %3363 = vmatpush1.bf16.msra.mxu1 %v7768_v8  ;;  %v7876_v8 = vld [vmem:[%s10952_s16 + $0x1e0] ss:$8 sps:$4 sm:$0xff]  }
 0x7f9   : > { %3364 = vmatprep.subr.bf16.mxu1 %v7773_v14  ;;  %v7884_v14 = vld [vmem:[%s10952_s16 + $0x1f4] ss:$8 sps:$4 sm:$0xff]   ;;  %3424 = vmatpush1.bf16.msra.mxu0 %v7876_v8 }
 0x7fa   : > { %3425 = vmatprep.subr.bf16.mxu0 %v7884_v14 }
 0x7fc   : > { %3365 = vmatpush1.bf16.msra.mxu1 %v7771_v15  ;;  %v7882_v15 = vld [vmem:[%s10952_s16 + $0x1f0] ss:$8 sps:$4 sm:$0xff]  }
 0x7fd   : > { %3366 = vmatprep.subr.bf16.mxu1 %v7776_v17  ;;  %3426 = vmatpush1.bf16.msra.mxu0 %v7882_v15  ;;  %v9586_v17 = vld [vmem:[%s10951_s15] sm:$0x3f] }
 0x800   : > { %3367 = vmatpush1.bf16.msra.mxu1 %v7774_v18  ;;  %v2116_v18 = vsub.s32 5, %v8865_v24 }
 0x801   : > { %3368 = vmatprep.subr.bf16.mxu1 %v7779_v19  ;;  %v2097_v19 = vrot.slane %v9586_v17, %v8871_v26 }
 0x804   : > { %3369 = vmatpush1.bf16.msra.mxu1 %v7777_v22  ;;  %v2101_v22 = vrot.slane %v9586_v17, %v8868_v25 }
 0x805   : > { %3370 = vmatprep.subr.bf16.mxu1 %v7782_v23  ;;  %v2117_v23 = vrot.slane %v9586_v17, %v2116_v18 }
 0x808   : > { %3371 = vmatpush1.bf16.msra.mxu1 %v7780_v29 }
 0x809   : > { %3372 = vmatprep.subr.bf16.mxu1 %v7785_v30 }
 0x80c   : > { %3373 = vmatpush1.bf16.msra.mxu1 %v7783_v32 }
 0x80d   : > { %3374 = vmatprep.subr.bf16.mxu1 %v7788_v33 }
 0x810   : > { %3375 = vmatpush1.bf16.msra.mxu1 %v7786_v35 }
 0x811   : > { %3376 = vmatprep.subr.bf16.mxu1 %v7791_v36 }
 0x814   : > { %3377 = vmatpush1.bf16.msra.mxu1 %v7789_v37 }
 0x815   : > { %3378 = vmatprep.subr.bf16.mxu1 %v7794_v38 }
 0x818   : > { %3379 = vmatpush1.bf16.msra.mxu1 %v7792_v40 }
 0x819   : > { %3380 = vmatprep.subr.bf16.mxu1 %v7800_v21 }
 0x81c   : > { %3381 = vmatpush1.bf16.msra.mxu1 %v7798_v28 }
 0x81d   : > { %3382 = vmatprep.subr.bf16.mxu1 %v7806_v34 }
 0x820   : > { %3383 = vmatpush1.bf16.msra.mxu1 %v7804_v41 }
 0x821   : > { %3384 = vmatprep.subr.bf16.mxu1 %v7812_v46 }
 0x824   : > { %3385 = vmatpush1.bf16.msra.mxu1 %v7810_v48 }
 0x825   : > { %3436 = vmatprep.subr.bf16.mxu1 %v7821_v51  ;;  %v2112_v51 = vsub.s32 4, %v8865_v24 }
 0x827   : > { %v2113_v58 = vrot.slane %v9586_v17, %v2112_v51 }
 0x88a   : > { %v2521_v29 = vpop.f32.mrb[0].mxu1  ;;  %v2603_v30 = vpop.f32.mrb[4].mxu0 }
 0x88b   : > { %v9596_v32 = vadd.f32 %v2521_v29, %v2097_v19  ;;  %v2523_v33 = vpop.f32.mrb[1].mxu1  ;;  %v2605_v35 = vpop.f32.mrb[5].mxu0  ;;  %v9618_v6 = vadd.f32 %v2603_v30, %v2113_v58 }
 0x88c   : > { %v9598_v36 = vadd.f32 %v2523_v33, %v2101_v22  ;;  %v9600_v37 = vadd.f32 %v2605_v35, %v2117_v23  ;;  %v2525_v38 = vpop.f32.mrb[2].mxu1  ;;  %v2607_v43 = vpop.f32.mrb[6].mxu0 }
 0x88d   : > { %v9603_v40 = vmul.f32 0.70710677, %v9596_v32  ;;  %v2526_v46 = vpop.f32.mrb[3].mxu1  ;;  %v2608_v47 = vpop.f32.mrb[7].mxu0  ;;  %v9621_v22 = vmul.f32 0.70710677, %v9618_v6 }
 0x88e   : > { %v9606_v20 = vmul.f32 0.70710677, %v9598_v36  ;;  %v9609_v21 = vmul.f32 0.70710677, %v9600_v37 }
 0x88f   : > { %v2622_v27 = vand.u32 2147483647, %v9603_v40  ;;  %v9624_v43 = vand.u32 2147483647, %v9621_v22  ;;  %vm2742_vm12 = vcmp.lt.f32.partialorder %v9603_v40, 0.0  ;;  %vm2746_vm5 = vcmp.lt.f32.partialorder %v9621_v22, 0.0 }
 0x890   : > { %v2623_v28 = vand.u32 2147483647, %v9606_v20  ;;  %v2627_v31 = vand.u32 2147483647, %v9609_v21  ;;  %vm2743_vm13 = vcmp.lt.f32.partialorder %v9606_v20, 0.0  ;;  %vm2747_vm14 = vcmp.lt.f32.partialorder %v9609_v21, 0.0 }
 0x891   : > { %v2628_v34 = vmul.f32 0.3275911, %v2622_v27  ;;  %v2706_v50 = vsub.f32 0.0, %v2622_v27  ;;  %v2632_v46 = vmul.f32 0.3275911, %v9624_v43 }
 0x892   : > { %v2629_v39 = vmul.f32 0.3275911, %v2623_v28  ;;  %v2633_v45 = vmul.f32 0.3275911, %v2627_v31  ;;  %v2707_v54 = vsub.f32 0.0, %v2623_v28  ;;  %v2711_v56 = vsub.f32 0.0, %v2627_v31 }
 0x893   : > { %v2634_v41 = vadd.f32 1.0, %v2628_v34  ;;  %v2712_v53 = vmul.f32 %v2706_v50, %v2622_v27  ;;  %v2638_v58 = vadd.f32 1.0, %v2632_v46  ;;  %v7897_v22 = vld [vmem:[%s10952_s16 + $0x2f0] ss:$8 sps:$4 sm:$0xff]  }
 0x894   : > { %v2635_v48 = vadd.f32 1.0, %v2629_v39  ;;  %v2639_v49 = vadd.f32 1.0, %v2633_v45  ;;  %v2713_v62 = vmul.f32 %v2707_v54, %v2623_v28  ;;  %v2717_v2 = vmul.f32 %v2711_v56, %v2627_v31 }
 0x895   : > { %8010 = vrcp.f32 %v2634_v41  ;;  %v2718_v61 = vmul.f32 1.442695, %v2712_v53  ;;  %v2108_v53 = vsub.s32 3, %v8865_v24 }
 0x896   : > { %8012 = vrcp.f32 %v2635_v48  ;;  %v2720_v13 = vmul.f32 1.442695, %v2713_v62  ;;  %v2728_v15 = vmul.f32 1.442695, %v2717_v2 }
 0x897   : > { %8014 = vrcp.f32 %v2639_v49  ;;  %v2104_v49 = vsub.s32 2, %v8865_v24  ;;  %v2109_v2 = vrot.slane %v9586_v17, %v2108_v53 }
 0x898   : > { %8016 = vpow2.f32 %v2718_v61 }
 0x899   : > { %8018 = vpow2.f32 %v2720_v13 }
 0x89a   : > { %8020 = vpow2.f32 %v2728_v15 }
 0x89b   : > { %8022 = vrcp.f32 %v2638_v58  ;;  %v7831_v58 = vld [vmem:[%s10952_s16 + $0x220] ss:$8 sps:$4 sm:$0xff]  }
 0x89f   : > { %v8011_v52 = vpop.eup %8010 }
 0x8a0   : > { %v2652_v55 = vmul.f32 1.0614054, %v8011_v52  ;;  %v8013_v59 = vpop.eup %8012 }
 0x8a1   : > { %v2653_v42 = vmul.f32 1.0614054, %v8013_v59  ;;  %v8015_v44 = vpop.eup %8014 }
 0x8a2   : > { %v6642_v57 = vadd.f32 -1.4531521, %v2652_v55  ;;  %v2657_v12 = vmul.f32 1.0614054, %v8015_v44  ;;  %v8017_v41 = vpop.eup %8016 }
 0x8a3   : > { %v6643_v11 = vadd.f32 -1.4531521, %v2653_v42  ;;  %v8019_v56 = vpop.eup %8018 }
 0x8a4   : > { %v2664_v0 = vmul.f32 %v8011_v52, %v6642_v57  ;;  %v6647_v14 = vadd.f32 -1.4531521, %v2657_v12  ;;  %v8021_v62 = vpop.eup %8020 }
 0x8a5   : > { %v2665_v8 = vmul.f32 %v8013_v59, %v6643_v11 }
 0x8a6   : > { %v2670_v3 = vadd.f32 1.4214138, %v2664_v0  ;;  %v2669_v29 = vmul.f32 %v8015_v44, %v6647_v14  ;;  %v2105_v0 = vrot.slane %v9586_v17, %v2104_v49  ;;  %v2611_v17 = vmul.f32 0.5, %v9598_v36 }
 0x8a7   : > { %v2671_v23 = vadd.f32 1.4214138, %v2665_v8  ;;  %v2610_v8 = vmul.f32 0.5, %v9596_v32  ;;  %v2615_v32 = vmul.f32 0.5, %v9600_v37 }
 0x8a8   : > { %v2676_v9 = vmul.f32 %v8011_v52, %v2670_v3  ;;  %v2675_v38 = vadd.f32 1.4214138, %v2669_v29 }
 0x8a9   : > { %v2677_v35 = vmul.f32 %v8013_v59, %v2671_v23 }
 0x8aa   : > { %v6648_v19 = vadd.f32 -0.28449672, %v2676_v9  ;;  %v2681_v28 = vmul.f32 %v8015_v44, %v2675_v38 }
 0x8ab   : > { %v6649_v27 = vadd.f32 -0.28449672, %v2677_v35 }
 0x8ac   : > { %v2688_v33 = vmul.f32 %v8011_v52, %v6648_v19  ;;  %v6653_v39 = vadd.f32 -0.28449672, %v2681_v28 }
 0x8ad   : > { %v2689_v34 = vmul.f32 %v8013_v59, %v6649_v27 }
 0x8ae   : > { %v2694_v30 = vadd.f32 0.2548296, %v2688_v33  ;;  %v2693_v48 = vmul.f32 %v8015_v44, %v6653_v39  ;;  %v7819_v39 = vld [vmem:[%s10952_s16 + $0x200] ss:$8 sps:$4 sm:$0xff]  }
 0x8af   : > { %v2695_v47 = vadd.f32 0.2548296, %v2689_v34 }
 0x8b0   : > { %v2700_v31 = vmul.f32 %v8011_v52, %v2694_v30  ;;  %v2699_v55 = vadd.f32 0.2548296, %v2693_v48 }
 0x8b1   : > { %v2701_v54 = vmul.f32 %v8013_v59, %v2695_v47  ;;  %v7827_v47 = vld [vmem:[%s10952_s16 + $0x214] ss:$8 sps:$4 sm:$0xff]  }
 0x8b2   : > { %v2730_v45 = vmul.f32 %v8017_v41, %v2700_v31  ;;  %v2705_v52 = vmul.f32 %v8015_v44, %v2699_v55  ;;  %v7825_v55 = vld [vmem:[%s10952_s16 + $0x210] ss:$8 sps:$4 sm:$0xff]  }
 0x8b3   : > { %v2731_v61 = vmul.f32 %v8019_v56, %v2701_v54  ;;  %v7833_v56 = vld [vmem:[%s10952_s16 + $0x224] ss:$8 sps:$4 sm:$0xff]  }
 0x8b4   : > { %v2736_v50 = vsub.f32 1.0, %v2730_v45  ;;  %v2735_v59 = vmul.f32 %v8021_v62, %v2705_v52 }
 0x8b5   : > { %v2737_v3 = vsub.f32 1.0, %v2731_v61  ;;  %v7839_v61 = vld [vmem:[%s10952_s16 + $0x234] ss:$8 sps:$4 sm:$0xff]  }
 0x8b6   : > { %v2748_v57 = vsub.f32 0.0, %v2736_v50  ;;  %v2741_v9 = vsub.f32 1.0, %v2735_v59 }
 0x8b7   : > { %v2749_v13 = vsub.f32 0.0, %v2737_v3 }
 0x8b8   : > { %v2754_v42 = vsel %vm2742_vm12, %v2748_v57, %v2736_v50  ;;  %v2753_v23 = vsub.f32 0.0, %v2741_v9  ;;  %v9659_v50 = vpop.eup %8022 }
 0x8b9   : > { %v2760_v11 = vadd.f32 1.0, %v2754_v42  ;;  %v2755_v19 = vsel %vm2743_vm13, %v2749_v13, %v2737_v3  ;;  %v2656_v57 = vmul.f32 1.0614054, %v9659_v50  ;;  %v7837_v42 = vld [vmem:[%s10952_s16 + $0x230] ss:$8 sps:$4 sm:$0xff]  }
 0x8ba   : > { %v2562_v12 = vpop.f32.mrb[4].mxu1  ;;  %v2761_v35 = vadd.f32 1.0, %v2755_v19  ;;  %v2759_v30 = vsel %vm2747_vm14, %v2753_v23, %v2741_v9  ;;  %v7851_v19 = vld [vmem:[%s10952_s16 + $0x254] ss:$8 sps:$4 sm:$0xff]  }
 0x8bb   : > { %v9637_v44 = vadd.f32 %v2562_v12, %v2105_v0  ;;  %v2564_v40 = vpop.f32.mrb[5].mxu1  ;;  %v2766_v20 = vmul.f32 %v2760_v11, %v2610_v8  ;;  %v2765_v31 = vadd.f32 1.0, %v2759_v30  ;;  %v6646_v52 = vadd.f32 -1.4531521, %v2656_v57 }
 0x8bc   : > { %v9640_v14 = vadd.f32 %v2564_v40, %v2109_v2  ;;  %v2566_v15 = vpop.f32.mrb[6].mxu1  ;;  %v2767_v28 = vmul.f32 %v2761_v35, %v2611_v17  ;;  %v7845_v2 = vld [vmem:[%s10952_s16 + $0x244] ss:$8 sps:$4 sm:$0xff]   ;;  %v7843_v40 = vld [vmem:[%s10952_s16 + $0x240] ss:$8 sps:$4 sm:$0xff]   ;;  %v2710_v35 = vsub.f32 0.0, %v9624_v43 }
 0x8bd   : > { %v9645_v29 = vmul.f32 0.70710677, %v9637_v44  ;;  %v2567_v33 = vpop.f32.mrb[7].mxu1  ;;  %v2771_v41 = vmul.f32 %v2765_v31, %v2615_v32  ;;  %v2772_v45 = vpack.c.bf16 %v2766_v20, %v2766_v20  ;;  %v2668_v59 = vmul.f32 %v9659_v50, %v6646_v52  ;;  %v7849_v32 = vld [vmem:[%s10952_s16 + $0x250] ss:$8 sps:$4 sm:$0xff]  }
 0x8be   : > { %v9648_v38 = vmul.f32 0.70710677, %v9640_v14  ;;  %v2773_v21 = vpack.c.bf16 %v2767_v28, %v2767_v28  ;;  %v7857_v31 = vld [vmem:[%s10952_s16 + $0x264] ss:$8 sps:$4 sm:$0xff]  }
 0x8bf   : > { %v2624_v27 = vand.u32 2147483647, %v9645_v29  ;;  %v2777_v48 = vpack.c.bf16 %v2771_v41, %v2771_v41  ;;  %v2674_v23 = vadd.f32 1.4214138, %v2668_v59  ;;  %v7855_v41 = vld [vmem:[%s10952_s16 + $0x260] ss:$8 sps:$4 sm:$0xff]  }
 0x8c0   : > { %v2625_v36 = vand.u32 2147483647, %v9648_v38  ;;  %3386 = vmatprep.mubr.bf16.mxu1 %v2773_v21  ;;  %v2716_v21 = vmul.f32 %v2710_v35, %v9624_v43  ;;  %v7861_v43 = vld [vmem:[%s10952_s16 + $0x270] ss:$8 sps:$4 sm:$0xff]   ;;  %vm2744_vm15 = vcmp.lt.f32.partialorder %v9645_v29, 0.0  ;;  %vm2745_vm1 = vcmp.lt.f32.partialorder %v9648_v38, 0.0 }
 0x8c1   : > { %v2630_v34 = vmul.f32 0.3275911, %v2624_v27  ;;  %3387 = vmatmul.mubr.bf16.vlgmr.msra.gmra.mrb[8].mxu1 %v2772_v45  ;;  %v2708_v62 = vsub.f32 0.0, %v2624_v27  ;;  %v2612_v35 = vmul.f32 0.5, %v9637_v44  ;;  %v7887_v29 = vld [vmem:[%s10952_s16 + $0x2b4] ss:$8 sps:$4 sm:$0xff]  }
 0x8c2   : > { %v2631_v46 = vmul.f32 0.3275911, %v2625_v36  ;;  %3437 = vmatpush1.bf16.msra.mxu1 %v7819_v39  ;;  %3468 = vmatprep.mubr.bf16.mxu1 %v2777_v48  ;;  %v2709_v0 = vsub.f32 0.0, %v2625_v36  ;;  %v7885_v44 = vld [vmem:[%s10952_s16 + $0x2b0] ss:$8 sps:$4 sm:$0xff]  }
 0x8c3   : > { %v2636_v37 = vadd.f32 1.0, %v2630_v34  ;;  %3438 = vmatprep.subr.bf16.mxu1 %v7827_v47  ;;  %v2714_v11 = vmul.f32 %v2708_v62, %v2624_v27  ;;  %v7863_v47 = vld [vmem:[%s10952_s16 + $0x274] ss:$8 sps:$4 sm:$0xff]  }
 0x8c4   : > { %v2637_v54 = vadd.f32 1.0, %v2631_v46  ;;  %v2715_v9 = vmul.f32 %v2709_v0, %v2625_v36  ;;  %v2680_v36 = vmul.f32 %v9659_v50, %v2674_v23 }
 0x8c5   : > { %8024 = vrcp.f32 %v2636_v37  ;;  %v2722_v17 = vmul.f32 1.442695, %v2714_v11 }
 0x8c6   : > { %8026 = vrcp.f32 %v2637_v54  ;;  %3439 = vmatpush1.bf16.msra.mxu1 %v7825_v55  ;;  %v2724_v30 = vmul.f32 1.442695, %v2715_v9  ;;  %v6652_v37 = vadd.f32 -0.28449672, %v2680_v36  ;;  %v2726_v54 = vmul.f32 1.442695, %v2716_v21 }
 0x8c7   : > { %3440 = vmatprep.subr.bf16.mxu1 %v7833_v56  ;;  %8028 = vpow2.f32 %v2722_v17 }
 0x8c8   : > { %8030 = vpow2.f32 %v2724_v30  ;;  %v7879_v30 = vld [vmem:[%s10952_s16 + $0x2a0] ss:$8 sps:$4 sm:$0xff]  }
 0x8c9   : > { %8032 = vpow2.f32 %v2726_v54  ;;  %v7894_v54 = vld [vmem:[%s10952_s16 + $0x2e0] ss:$8 sps:$4 sm:$0xff]  }
 0x8ca   : > { %3441 = vmatpush1.bf16.msra.mxu1 %v7831_v58  ;;  %v7869_v58 = vld [vmem:[%s10952_s16 + $0x284] ss:$8 sps:$4 sm:$0xff]  }
 0x8cb   : > { %3442 = vmatprep.subr.bf16.mxu1 %v7839_v61  ;;  %v2692_v61 = vmul.f32 %v9659_v50, %v6652_v37  ;;  %v7896_v37 = vld [vmem:[%s10952_s16 + $0x2e4] ss:$8 sps:$4 sm:$0xff]  }
 0x8cd   : > { %v2698_v9 = vadd.f32 0.2548296, %v2692_v61 }
 0x8ce   : > { %3443 = vmatpush1.bf16.msra.mxu1 %v7837_v42  ;;  %v7867_v42 = vld [vmem:[%s10952_s16 + $0x280] ss:$8 sps:$4 sm:$0xff]  }
 0x8cf   : > { %v8025_v3 = vpop.eup %8024  ;;  %3444 = vmatprep.subr.bf16.mxu1 %v7845_v2  ;;  %v2704_v23 = vmul.f32 %v9659_v50, %v2698_v9  ;;  %v3479_v9 = vld [vmem:[%s10953_s17] sm:$0x3] }
 0x8d0   : > { %v8027_v12 = vpop.eup %8026  ;;  %v2654_v13 = vmul.f32 1.0614054, %v8025_v3 }
 0x8d1   : > { %v2655_v8 = vmul.f32 1.0614054, %v8027_v12  ;;  %v8029_v0 = vpop.eup %8028 }
 0x8d2   : > { %v6644_v15 = vadd.f32 -1.4531521, %v2654_v13  ;;  %3445 = vmatpush1.bf16.msra.mxu1 %v7843_v40  ;;  %v8031_v59 = vpop.eup %8030  ;;  %v7875_v13 = vld [vmem:[%s10952_s16 + $0x294] ss:$8 sps:$4 sm:$0xff]  }
 0x8d3   : > { %v6645_v33 = vadd.f32 -1.4531521, %v2655_v8  ;;  %3446 = vmatprep.subr.bf16.mxu1 %v7851_v19 }
 0x8d4   : > { %v2666_v20 = vmul.f32 %v8025_v3, %v6644_v15 }
 0x8d5   : > { %v2667_v27 = vmul.f32 %v8027_v12, %v6645_v33 }
 0x8d6   : > { %v2672_v28 = vadd.f32 1.4214138, %v2666_v20  ;;  %3447 = vmatpush1.bf16.msra.mxu1 %v7849_v32 }
 0x8d7   : > { %v2673_v34 = vadd.f32 1.4214138, %v2667_v27  ;;  %3448 = vmatprep.subr.bf16.mxu1 %v7857_v31  ;;  %v8033_v27 = vpop.eup %8032 }
 0x8d8   : > { %v2678_v39 = vmul.f32 %v8025_v3, %v2672_v28  ;;  %v2613_v28 = vmul.f32 0.5, %v9640_v14  ;;  %v2734_v31 = vmul.f32 %v8033_v27, %v2704_v23  ;;  %v7890_v14 = vld [vmem:[%s10952_s16 + $0x2c4] ss:$8 sps:$4 sm:$0xff]  }
 0x8d9   : > { %v2679_v45 = vmul.f32 %v8027_v12, %v2673_v34 }
 0x8da   : > { %v6650_v46 = vadd.f32 -0.28449672, %v2678_v39  ;;  %3449 = vmatpush1.bf16.msra.mxu1 %v7855_v41  ;;  %v2740_v21 = vsub.f32 1.0, %v2734_v31  ;;  %v7888_v41 = vld [vmem:[%s10952_s16 + $0x2c0] ss:$8 sps:$4 sm:$0xff]  }
 0x8db   : > { %v6651_v48 = vadd.f32 -0.28449672, %v2679_v45  ;;  %3450 = vmatprep.subr.bf16.mxu1 %v7863_v47  ;;  %v7893_v45 = vld [vmem:[%s10952_s16 + $0x2d4] ss:$8 sps:$4 sm:$0xff]   ;;  %v7891_v47 = vld [vmem:[%s10952_s16 + $0x2d0] ss:$8 sps:$4 sm:$0xff]  }
 0x8dc   : > { %v2690_v55 = vmul.f32 %v8025_v3, %v6650_v46  ;;  %v2752_v46 = vsub.f32 0.0, %v2740_v21  ;;  %v7911_v31 = vld [vmem:[%s10944_s8 + $0xd4] ss:$8 sps:$4 sm:$0xff]  }
 0x8dd   : > { %v2691_v56 = vmul.f32 %v8027_v12, %v6651_v48 }
 0x8de   : > { %v2696_v57 = vadd.f32 0.2548296, %v2690_v55  ;;  %3451 = vmatpush1.bf16.msra.mxu1 %v7861_v43  ;;  %v2758_v48 = vsel %vm2746_vm5, %v2752_v46, %v2740_v21  ;;  %v7899_v43 = vld [vmem:[%s10952_s16 + $0x2f4] ss:$8 sps:$4 sm:$0xff]   ;;  %v7915_v21 = vld [vmem:[%s10944_s8 + $0xe0] ss:$8 sps:$4 sm:$0xff]  }
 0x8df   : > { %v2697_v52 = vadd.f32 0.2548296, %v2691_v56  ;;  %3452 = vmatprep.subr.bf16.mxu1 %v7869_v58  ;;  %v2764_v55 = vadd.f32 1.0, %v2758_v48  ;;  %v2614_v56 = vmul.f32 0.5, %v9618_v6  ;;  %v7921_v46 = vld [vmem:[%s10944_s8 + $0xf0] ss:$8 sps:$4 sm:$0xff]  }
 0x8e0   : > { %v2702_v62 = vmul.f32 %v8025_v3, %v2696_v57  ;;  %v7873_v3 = vld [vmem:[%s10952_s16 + $0x290] ss:$8 sps:$4 sm:$0xff]   ;;  %v7924_v48 = vld [vmem:[%s10999_s1 + $0x100] ss:$8 sps:$4 sm:$0xff]  }
 0x8e1   : > { %v2703_v2 = vmul.f32 %v8027_v12, %v2697_v52  ;;  %v7881_v12 = vld [vmem:[%s10952_s16 + $0x2a4] ss:$8 sps:$4 sm:$0xff]   ;;  %v2770_v57 = vmul.f32 %v2764_v55, %v2614_v56  ;;  %v7932_v55 = vld [vmem:[%s10999_s1 + $0x114] ss:$8 sps:$4 sm:$0xff]   ;;  %v7930_v56 = vld [vmem:[%s10999_s1 + $0x110] ss:$8 sps:$4 sm:$0xff]  }
 0x8e2   : > { %v2732_v11 = vmul.f32 %v8029_v0, %v2702_v62  ;;  %3453 = vmatpush1.bf16.msra.mxu1 %v7867_v42 }
 0x8e3   : > { %v2733_v40 = vmul.f32 %v8031_v59, %v2703_v2  ;;  %3454 = vmatprep.subr.bf16.mxu1 %v7875_v13  ;;  %v2776_v58 = vpack.c.bf16 %v2770_v57, %v2770_v57  ;;  %v7938_v57 = vld [vmem:[%s10999_s1 + $0x124] ss:$8 sps:$4 sm:$0xff]  }
 0x8e4   : > { %v2738_v8 = vsub.f32 1.0, %v2732_v11 }
 0x8e5   : > { %v2739_v15 = vsub.f32 1.0, %v2733_v40 }
 0x8e6   : > { %v2750_v19 = vsub.f32 0.0, %v2738_v8  ;;  %3455 = vmatpush1.bf16.msra.mxu1 %v7873_v3 }
 0x8e7   : > { %v2751_v17 = vsub.f32 0.0, %v2739_v15  ;;  %3456 = vmatprep.subr.bf16.mxu1 %v7881_v12  ;;  %v3488_v12 = vrot.slane %v3479_v9, %v8868_v25 }
 0x8e8   : > { %v2756_v33 = vsel %vm2744_vm15, %v2750_v19, %v2738_v8 }
 0x8e9   : > { %v2762_v20 = vadd.f32 1.0, %v2756_v33  ;;  %v2757_v32 = vsel %vm2745_vm1, %v2751_v17, %v2739_v15  ;;  %v3484_v33 = vrot.slane %v3479_v9, %v8871_v26  ;;  %v7944_v9 = vld [vmem:[%s10999_s1 + $0x134] ss:$8 sps:$4 sm:$0xff]  }
 0x8ea   : > { %v2763_v50 = vadd.f32 1.0, %v2757_v32  ;;  %3457 = vmatpush1.bf16.msra.mxu1 %v7879_v30 }
 0x8eb   : > { %v2768_v38 = vmul.f32 %v2762_v20, %v2612_v35  ;;  %3458 = vmatprep.subr.bf16.mxu1 %v7887_v29  ;;  %v7905_v29 = vld [vmem:[%s10944_s8 + $0xc4] ss:$8 sps:$4 sm:$0xff]  }
 0x8ec   : > { %v2769_v36 = vmul.f32 %v2763_v50, %v2613_v28  ;;  %v7900_v28 = vld [vmem:[%s10999_s1 + $0xc0] ss:$8 sps:$4 sm:$0xff]   ;;  %v7908_v50 = vld [vmem:[%s10999_s1 + $0xd4] ss:$8 sps:$4 sm:$0xff]  }
 0x8ed   : > { %v2774_v39 = vpack.c.bf16 %v2768_v38, %v2768_v38  ;;  %v7906_v38 = vld [vmem:[%s10999_s1 + $0xd0] ss:$8 sps:$4 sm:$0xff]  }
 0x8ee   : > { %v2775_v34 = vpack.c.bf16 %v2769_v36, %v2769_v36  ;;  %3459 = vmatpush1.bf16.msra.mxu1 %v7885_v44  ;;  %v7909_v36 = vld [vmem:[%s10944_s8 + $0xd0] ss:$8 sps:$4 sm:$0xff]   ;;  %v7914_v44 = vld [vmem:[%s10999_s1 + $0xe4] ss:$8 sps:$4 sm:$0xff]  }
 0x8ef   : > { %3460 = vmatprep.subr.bf16.mxu1 %v7890_v14  ;;  %v7912_v14 = vld [vmem:[%s10999_s1 + $0xe0] ss:$8 sps:$4 sm:$0xff]  }
 0x8f0   : > { %3427 = vmatprep.mubr.bf16.mxu0 %v2775_v34  ;;  %v7917_v34 = vld [vmem:[%s10944_s8 + $0xe4] ss:$8 sps:$4 sm:$0xff]  }
 0x8f1   : > { %3428 = vmatmul.mubr.bf16.vlgmr.msra.gmra.mrb[8].mxu0 %v2774_v39  ;;  %v7920_v39 = vld [vmem:[%s10999_s1 + $0xf4] ss:$8 sps:$4 sm:$0xff]  }
 0x8f2   : > { %3461 = vmatpush1.bf16.msra.mxu1 %v7888_v41  ;;  %v7923_v41 = vld [vmem:[%s10944_s8 + $0xf4] ss:$8 sps:$4 sm:$0xff]  }
 0x8f3   : > { %3462 = vmatprep.subr.bf16.mxu1 %v7893_v45  ;;  %v7918_v45 = vld [vmem:[%s10999_s1 + $0xf0] ss:$8 sps:$4 sm:$0xff]  }
 0x8f6   : > { %3463 = vmatpush1.bf16.msra.mxu1 %v7891_v47  ;;  %v7926_v47 = vld [vmem:[%s10999_s1 + $0x104] ss:$8 sps:$4 sm:$0xff]  }
 0x8f7   : > { %3464 = vmatprep.subr.bf16.mxu1 %v7896_v37  ;;  %v7929_v37 = vld [vmem:[%s10944_s8 + $0x104] ss:$8 sps:$4 sm:$0xff]  }
 0x8fa   : > { %3465 = vmatpush1.bf16.msra.mxu1 %v7894_v54  ;;  %v7927_v54 = vld [vmem:[%s10944_s8 + $0x100] ss:$8 sps:$4 sm:$0xff]  }
 0x8fb   : > { %3466 = vmatprep.subr.bf16.mxu1 %v7899_v43  ;;  %v7935_v43 = vld [vmem:[%s10944_s8 + $0x114] ss:$8 sps:$4 sm:$0xff]  }
 0x8fe   : > { %3467 = vmatpush1.bf16.msra.mxu1 %v7897_v22  ;;  %v7933_v22 = vld [vmem:[%s10944_s8 + $0x110] ss:$8 sps:$4 sm:$0xff]  }
 0x8ff   : > { %4102 = vmatprep.subr.bf16.mxu1 %v7905_v29  ;;  %v7968_v29 = vld [vmem:[%s10999_s1 + $0x174] ss:$8 sps:$4 sm:$0xff]  }
 0x901   : > { %3469 = vmatmul.mubr.bf16.vlgmr.msra.gmra.mrb[12].mxu1 %v2776_v58  ;;  %v7936_v58 = vld [vmem:[%s10999_s1 + $0x120] ss:$8 sps:$4 sm:$0xff]  }
 0x994   : > { %v3388_v61 = vpop.f32.mrb[8].mxu1 }
 0x995   : > { %v3390_v52 = vpop.f32.mrb[9].mxu1 }
 0x996   : > { %v3392_v62 = vpop.f32.mrb[10].mxu1 }
 0x997   : > { %v3393_v0 = vpop.f32.mrb[11].mxu1 }
 0x9c4   : > { %v3429_v42 = vpop.f32.mrb[8].mxu0 }
 0x9c5   : > { %v3430_v2 = vadd.f32 %v3429_v42, %v3388_v61  ;;  %v3431_v59 = vpop.f32.mrb[9].mxu0 }
 0x9c6   : > { %v3432_v11 = vadd.f32 %v3431_v59, %v3390_v52  ;;  %v3433_v13 = vpop.f32.mrb[10].mxu0 }
 0x9c7   : > { %v3434_v6 = vpop.f32.mrb[11].mxu0  ;;  %v7941_v13 = vld [vmem:[%s10944_s8 + $0x124] ss:$8 sps:$4 sm:$0xff]  }
 0x9c8   : > { %v7939_v6 = vld [vmem:[%s10944_s8 + $0x120] ss:$8 sps:$4 sm:$0xff]  }
 0x9d4   : > { %v3470_v40 = vpop.f32.mrb[12].mxu1 }
 0x9d5   : > { %v3471_v8 = vadd.f32 %v3470_v40, %v3430_v2  ;;  %v3472_v3 = vpop.f32.mrb[13].mxu1  ;;  %v7942_v40 = vld [vmem:[%s10999_s1 + $0x130] ss:$8 sps:$4 sm:$0xff]  }
 0x9d6   : > { %v3473_v15 = vadd.f32 %v3472_v3, %v3432_v11  ;;  %v3474_v19 = vpop.f32.mrb[14].mxu1  ;;  %v7945_v3 = vld [vmem:[%s10944_s8 + $0x130] ss:$8 sps:$4 sm:$0xff]  }
 0x9d7   : > { %v3477_v23 = vadd.f32 %v9141_v7, %v3471_v8  ;;  %v3475_v17 = vpop.f32.mrb[15].mxu1  ;;  %v7902_v7 = vld [vmem:[%s10999_s1 + $0xc4] ss:$8 sps:$4 sm:$0xff]   ;;  %v7947_v8 = vld [vmem:[%s10944_s8 + $0x134] ss:$8 sps:$4 sm:$0xff]  }
 0x9d8   : > { %v3478_v35 = vadd.f32 %v9139_v5, %v3473_v15  ;;  %v7903_v5 = vld [vmem:[%s10944_s8 + $0xc0] ss:$8 sps:$4 sm:$0xff]   ;;  %3704 = vmatprep.subr.bf16.mxu0 %v7902_v7  ;;  %v7950_v15 = vld [vmem:[%s10999_s1 + $0x144] ss:$8 sps:$4 sm:$0xff]   ;;  %v7956_v17 = vld [vmem:[%s10999_s1 + $0x154] ss:$8 sps:$4 sm:$0xff]  }
 0x9d9   : > { %v9770_v30 = vadd.f32 %v3484_v33, %v3477_v23  ;;  %3705 = vmatpush1.bf16.msra.mxu0 %v7900_v28  ;;  %4103 = vmatpush1.bf16.msra.mxu1 %v7903_v5  ;;  %v7948_v19 = vld [vmem:[%s10999_s1 + $0x140] ss:$8 sps:$4 sm:$0xff]   ;;  %v7954_v33 = vld [vmem:[%s10999_s1 + $0x150] ss:$8 sps:$4 sm:$0xff]   ;;  %v7962_v28 = vld [vmem:[%s10999_s1 + $0x164] ss:$8 sps:$4 sm:$0xff]  }
 0x9da   : > { %v9768_v20 = vadd.f32 %v3488_v12, %v3478_v35  ;;  %3706 = vmatprep.subr.bf16.mxu0 %v7908_v50  ;;  %4104 = vmatprep.subr.bf16.mxu1 %v7911_v31  ;;  %v7953_v12 = vld [vmem:[%s10944_s8 + $0x144] ss:$8 sps:$4 sm:$0xff]   ;;  %v7951_v23 = vld [vmem:[%s10944_s8 + $0x140] ss:$8 sps:$4 sm:$0xff]   ;;  %v7959_v35 = vld [vmem:[%s10944_s8 + $0x154] ss:$8 sps:$4 sm:$0xff]  }
 0x9db   : > { %v7963_v7 = vld [vmem:[%s10944_s8 + $0x160] ss:$8 sps:$4 sm:$0xff]   ;;  %v7965_v5 = vld [vmem:[%s10944_s8 + $0x164] ss:$8 sps:$4 sm:$0xff]   ;;  %v7971_v50 = vld [vmem:[%s10944_s8 + $0x174] ss:$8 sps:$4 sm:$0xff]  }
 0x9dc   : > { %v3497_v32 = vsel %vm929_vm2, %v9768_v20, 0.0  ;;  %v7966_v31 = vld [vmem:[%s10999_s1 + $0x170] ss:$8 sps:$4 sm:$0xff]  }
 0x9dd   : > { %v3498_v27 = vadd.f32 %v3497_v32, %v9770_v30  ;;  %3707 = vmatpush1.bf16.msra.mxu0 %v7906_v38  ;;  %4105 = vmatpush1.bf16.msra.mxu1 %v7909_v36  ;;  %v7957_v32 = vld [vmem:[%s10944_s8 + $0x150] ss:$8 sps:$4 sm:$0xff]   ;;  %v7974_v36 = vld [vmem:[%s11000_s3 + $0xc4] ss:$8 sps:$4 sm:$0xff]  }
 0x9de   : > { %3708 = vmatprep.subr.bf16.mxu0 %v7914_v44  ;;  %4106 = vmatprep.subr.bf16.mxu1 %v7917_v34  ;;  %v7969_v38 = vld [vmem:[%s10944_s8 + $0x170] ss:$8 sps:$4 sm:$0xff]  }
 0x9df   : > { %3499 = vadd.xlane.f32.xlu1 %v3498_v27  ;;  %v7960_v27 = vld [vmem:[%s10999_s1 + $0x160] ss:$8 sps:$4 sm:$0xff]  }
 0x9e1   : > { %3709 = vmatpush1.bf16.msra.mxu0 %v7912_v14  ;;  %4107 = vmatpush1.bf16.msra.mxu1 %v7915_v21  ;;  %v6750_v21 = vld [vmem:[%s11001_s22 + $0x2] sm:$0x3] }
 0x9e2   : > { %3710 = vmatprep.subr.bf16.mxu0 %v7920_v39  ;;  %4108 = vmatprep.subr.bf16.mxu1 %v7923_v41  ;;  %v6751_v39 = vld [vmem:[%s11002_s5 + $0x2] sm:$0x3]  ;;  %v3519_v41 = vrot.slane %v6750_v21, %v8871_v26 }
 0x9e5   : > { %3711 = vmatpush1.bf16.msra.mxu0 %v7918_v45  ;;  %4109 = vmatpush1.bf16.msra.mxu1 %v7921_v46  ;;  %v3523_v45 = vrot.slane %v6750_v21, %v8868_v25 }
 0x9e6   : > { %3712 = vmatprep.subr.bf16.mxu0 %v7926_v47  ;;  %4110 = vmatprep.subr.bf16.mxu1 %v7929_v37 }
 0x9e9   : > { %3713 = vmatpush1.bf16.msra.mxu0 %v7924_v48  ;;  %4111 = vmatpush1.bf16.msra.mxu1 %v7927_v54  ;;  %v3532_v48 = vrot.slane %v6751_v39, %v8871_v26  ;;  %v3536_v54 = vrot.slane %v6751_v39, %v8868_v25 }
 0x9ea   : > { %3714 = vmatprep.subr.bf16.mxu0 %v7932_v55  ;;  %4112 = vmatprep.subr.bf16.mxu1 %v7935_v43 }
 0x9ed   : > { %3715 = vmatpush1.bf16.msra.mxu0 %v7930_v56  ;;  %4113 = vmatpush1.bf16.msra.mxu1 %v7933_v22 }
 0x9ee   : > { %3716 = vmatprep.subr.bf16.mxu0 %v7938_v57  ;;  %4114 = vmatprep.subr.bf16.mxu1 %v7941_v13  ;;  %v7984_v13 = vld [vmem:[%s11000_s3 + $0x100] ss:$8 sps:$4 sm:$0xff]  }
 0x9f1   : > { %3717 = vmatpush1.bf16.msra.mxu0 %v7936_v58  ;;  %4115 = vmatpush1.bf16.msra.mxu1 %v7939_v6  ;;  %v7972_v58 = vld [vmem:[%s11000_s3 + $0xc0] ss:$8 sps:$4 sm:$0xff]   ;;  %v7989_v6 = vld [vmem:[%s11000_s3 + $0x114] ss:$8 sps:$4 sm:$0xff]  }
 0x9f2   : > { %3718 = vmatprep.subr.bf16.mxu0 %v7944_v9  ;;  %4116 = vmatprep.subr.bf16.mxu1 %v7947_v8  ;;  %v7987_v9 = vld [vmem:[%s11000_s3 + $0x110] ss:$8 sps:$4 sm:$0xff]   ;;  %v7990_v8 = vld [vmem:[%s11000_s3 + $0x120] ss:$8 sps:$4 sm:$0xff]  }
 0x9f5   : > { %3719 = vmatpush1.bf16.msra.mxu0 %v7942_v40  ;;  %4117 = vmatpush1.bf16.msra.mxu1 %v7945_v3  ;;  %v7992_v40 = vld [vmem:[%s11000_s3 + $0x124] ss:$8 sps:$4 sm:$0xff]   ;;  %v7995_v3 = vld [vmem:[%s11000_s3 + $0x134] ss:$8 sps:$4 sm:$0xff]  }
 0x9f6   : > { %3720 = vmatprep.subr.bf16.mxu0 %v7950_v15  ;;  %4118 = vmatprep.subr.bf16.mxu1 %v7953_v12  ;;  %v7993_v15 = vld [vmem:[%s11000_s3 + $0x130] ss:$8 sps:$4 sm:$0xff]   ;;  %v7996_v12 = vld [vmem:[%s11000_s3 + $0x140] ss:$8 sps:$4 sm:$0xff]  }
 0x9f9   : > { %3721 = vmatpush1.bf16.msra.mxu0 %v7948_v19  ;;  %4119 = vmatpush1.bf16.msra.mxu1 %v7951_v23  ;;  %v7998_v19 = vld [vmem:[%s11000_s3 + $0x144] ss:$8 sps:$4 sm:$0xff]   ;;  %v8001_v23 = vld [vmem:[%s11000_s3 + $0x154] ss:$8 sps:$4 sm:$0xff]  }
 0x9fa   : > { %3722 = vmatprep.subr.bf16.mxu0 %v7956_v17  ;;  %4120 = vmatprep.subr.bf16.mxu1 %v7959_v35  ;;  %v7999_v17 = vld [vmem:[%s11000_s3 + $0x150] ss:$8 sps:$4 sm:$0xff]   ;;  %v8002_v35 = vld [vmem:[%s11000_s3 + $0x160] ss:$8 sps:$4 sm:$0xff]  }
 0x9fd   : > { %3723 = vmatpush1.bf16.msra.mxu0 %v7954_v33  ;;  %4121 = vmatpush1.bf16.msra.mxu1 %v7957_v32  ;;  %v8004_v33 = vld [vmem:[%s11000_s3 + $0x164] ss:$8 sps:$4 sm:$0xff]   ;;  %v8007_v32 = vld [vmem:[%s11000_s3 + $0x174] ss:$8 sps:$4 sm:$0xff]  }
 0x9fe   : > { %3724 = vmatprep.subr.bf16.mxu0 %v7962_v28  ;;  %4122 = vmatprep.subr.bf16.mxu1 %v7965_v5  ;;  %v6776_v28 = vld [vmem:[%s11003_s30 + $0x2] sm:$0x3] }
 0x9ff   : > { %v3574_v5 = vrot.slane %v6776_v28, %v8871_v26 }
 0xa01   : > { %3725 = vmatpush1.bf16.msra.mxu0 %v7960_v27  ;;  %4123 = vmatpush1.bf16.msra.mxu1 %v7963_v7  ;;  %v8005_v27 = vld [vmem:[%s11000_s3 + $0x170] ss:$8 sps:$4 sm:$0xff]   ;;  %v6876_v7 = vld [vmem:[%s10945_s9 + $0x2] sm:$0x3] }
 0xa02   : > { %3726 = vmatprep.subr.bf16.mxu0 %v7968_v29  ;;  %4124 = vmatprep.subr.bf16.mxu1 %v7971_v50  ;;  %v3975_v29 = vrot.slane %v6876_v7, %v8871_v26  ;;  %v3578_v50 = vrot.slane %v6776_v28, %v8868_v25 }
 0xa05   : > { %3727 = vmatpush1.bf16.msra.mxu0 %v7966_v31  ;;  %4125 = vmatpush1.bf16.msra.mxu1 %v7969_v38  ;;  %v3979_v31 = vrot.slane %v6876_v7, %v8868_v25 }
 0xa06   : > { %3903 = vmatprep.subr.bf16.mxu0 %v7974_v36 }
 0xa6c   : > { %v3500_v61 = vpop.xlane.xlu1 %3499 }
 0xa6d   : > { %v3501_v52 = vmul.f32 0.0052083335, %v3500_v61 }
 0xa6f   : > { %v3502_v62 = vsub.f32 %v9770_v30, %v3501_v52  ;;  %v3503_v0 = vsub.f32 %v9768_v20, %v3501_v52  ;;  %v7977_v52 = vld [vmem:[%s11000_s3 + $0xd4] ss:$8 sps:$4 sm:$0xff]  }
 0xa71   : > { %v3504_v42 = vmul.f32 %v3502_v62, %v3502_v62  ;;  %v3505_v2 = vmul.f32 %v3503_v0, %v3503_v0 }
 0xa73   : > { %v3506_v59 = vsel %vm929_vm2, %v3505_v2, 0.0  ;;  %v7983_v2 = vld [vmem:[%s11000_s3 + $0xf4] ss:$8 sps:$4 sm:$0xff]  }
 0xa74   : > { %v3507_v11 = vadd.f32 %v3506_v59, %v3504_v42  ;;  %v7978_v42 = vld [vmem:[%s11000_s3 + $0xe0] ss:$8 sps:$4 sm:$0xff]   ;;  %v7981_v59 = vld [vmem:[%s11000_s3 + $0xf0] ss:$8 sps:$4 sm:$0xff]  }
 0xa76   : > { %3508 = vadd.xlane.f32.xlu1 %v3507_v11  ;;  %v7986_v11 = vld [vmem:[%s11000_s3 + $0x104] ss:$8 sps:$4 sm:$0xff]  }
 0xb03   : > { %v3509_v44 = vpop.xlane.xlu1 %3508 }
 0xb04   : > { %v3510_v34 = vmul.f32 0.0052083335, %v3509_v44 }
 0xb06   : > { %v3511_v14 = vadd.f32 1e-05, %v3510_v34 }
 0xb08   : > { %8034 = vrsqrt.f32 %v3511_v14 }
 0xb12   : > { %v8035_v46 = vpop.eup %8034 }
 0xb13   : > { %v3513_v47 = vmul.f32 %v8035_v46, %v3502_v62  ;;  %v3514_v37 = vmul.f32 %v8035_v46, %v3503_v0  ;;  %v7975_v62 = vld [vmem:[%s11000_s3 + $0xd0] ss:$8 sps:$4 sm:$0xff]   ;;  %v7980_v0 = vld [vmem:[%s11000_s3 + $0xe4] ss:$8 sps:$4 sm:$0xff]  }
 0xb15   : > { %v3527_v55 = vmul.f32 %v3523_v45, %v3514_v37  ;;  %v3526_v43 = vmul.f32 %v3519_v41, %v3513_v47 }
 0xb17   : > { %v3540_v56 = vadd.f32 %v3536_v54, %v3527_v55  ;;  %v3539_v22 = vadd.f32 %v3532_v48, %v3526_v43  ;;  %v6826_v48 = vld [vmem:[%s10943_s7 + $0x2] sm:$0x3] }
 0xb18   : > { %v3776_v54 = vrot.slane %v6826_v48, %v8871_v26  ;;  %v3780_v55 = vrot.slane %v6826_v48, %v8868_v25 }
 0xb19   : > { %v9935_v57 = vpack.c.bf16 %v3540_v56, %v3540_v56  ;;  %v9940_v61 = vpack.c.bf16 %v3539_v22, %v3539_v22 }
 0xb1b   : > { %6801 = vmatprep.mubr.msk.bf16.mxu0 %vm929_vm2, %v9935_v57  ;;  %6901 = vmatprep.mubr.msk.bf16.mxu1 %vm929_vm2, %v9935_v57 }
 0xb1c   : > { %3737 = vmatmul.mubr.bf16.vlgmr.msra.gmra.mrb[12].mxu0 %v9940_v61  ;;  %4135 = vmatmul.mubr.bf16.vlgmr.msra.gmra.mrb[16].mxu1 %v9940_v61 }
 0xb1d   : > { %3904 = vmatpush1.bf16.msra.mxu0 %v7972_v58  ;;  %6851 = vmatprep.mubr.msk.bf16.mxu0 %vm929_vm2, %v9935_v57 }
 0xb1e   : > { %3905 = vmatprep.subr.bf16.mxu0 %v7977_v52 }
 0xb21   : > { %3906 = vmatpush1.bf16.msra.mxu0 %v7975_v62 }
 0xb22   : > { %3907 = vmatprep.subr.bf16.mxu0 %v7980_v0 }
 0xb25   : > { %3908 = vmatpush1.bf16.msra.mxu0 %v7978_v42 }
 0xb26   : > { %3909 = vmatprep.subr.bf16.mxu0 %v7983_v2  ;;  %v10048_v2 = vmov 0.0  }
 0xb29   : > { %3910 = vmatpush1.bf16.msra.mxu0 %v7981_v59  ;;  %v10050_v59 = vmov 0.0  }
 0xb2a   : > { %3911 = vmatprep.subr.bf16.mxu0 %v7986_v11 }
 0xb2d   : > { %3912 = vmatpush1.bf16.msra.mxu0 %v7984_v13 }
 0xb2e   : > { %3913 = vmatprep.subr.bf16.mxu0 %v7989_v6 }
 0xb31   : > { %3914 = vmatpush1.bf16.msra.mxu0 %v7987_v9 }
 0xb32   : > { %3915 = vmatprep.subr.bf16.mxu0 %v7992_v40 }
 0xb35   : > { %3916 = vmatpush1.bf16.msra.mxu0 %v7990_v8 }
 0xb36   : > { %3917 = vmatprep.subr.bf16.mxu0 %v7995_v3 }
 0xb39   : > { %3918 = vmatpush1.bf16.msra.mxu0 %v7993_v15 }
 0xb3a   : > { %3919 = vmatprep.subr.bf16.mxu0 %v7998_v19 }
 0xb3d   : > { %3920 = vmatpush1.bf16.msra.mxu0 %v7996_v12 }
 0xb3e   : > { %3921 = vmatprep.subr.bf16.mxu0 %v8001_v23 }
 0xb41   : > { %3922 = vmatpush1.bf16.msra.mxu0 %v7999_v17 }
 0xb42   : > { %3923 = vmatprep.subr.bf16.mxu0 %v8004_v33 }
 0xb45   : > { %3924 = vmatpush1.bf16.msra.mxu0 %v8002_v35 }
 0xb46   : > { %3925 = vmatprep.subr.bf16.mxu0 %v8007_v32 }
 0xb49   : > { %3926 = vmatpush1.bf16.msra.mxu0 %v8005_v27 }
 0xb4c   : > { %3936 = vmatmul.mubr.bf16.vlgmr.msra.gmra.mrb[16].mxu0 %v9940_v61 }
 0xbef   : > { %v3738_v38 = vpop.f32.mrb[12].mxu0  ;;  %v4136_v36 = vpop.f32.mrb[16].mxu1 }
 0xbf0   : > { %v10027_v44 = vadd.f32 %v3738_v38, %v3574_v5  ;;  %v10029_v34 = vadd.f32 %v4136_v36, %v3975_v29  ;;  %v3740_v14 = vpop.f32.mrb[13].mxu0  ;;  %v4138_v21 = vpop.f32.mrb[17].mxu1 }
 0xbf1   : > { %v10031_v39 = vadd.f32 %v3740_v14, %v3578_v50  ;;  %v10033_v41 = vadd.f32 %v4138_v21, %v3979_v31  ;;  %v3742_v45 = vpop.f32.mrb[14].mxu0  ;;  %v4140_v46 = vpop.f32.mrb[18].mxu1 }
 0xbf2   : > { %v3743_v47 = vpop.f32.mrb[15].mxu0  ;;  %v4141_v37 = vpop.f32.mrb[19].mxu1 }
 0xc1f   : > { %v3937_v43 = vpop.f32.mrb[16].mxu0 }
 0xc20   : > { %v10040_v56 = vadd.f32 %v3937_v43, %v3776_v54  ;;  %v3939_v22 = vpop.f32.mrb[17].mxu0 }
 0xc21   : > { %v10042_v58 = vadd.f32 %v3939_v22, %v3780_v55  ;;  %v3941_v52 = vpop.f32.mrb[18].mxu0 }
 0xc22   : > { %v4143_v62 = vpack.c.bf16 %v10040_v56, %v10040_v56  ;;  %v3942_v0 = vpop.f32.mrb[19].mxu0 }
 0xc23   : > { %v4144_v42 = vpack.c.bf16 %v10042_v58, %v10042_v58 }
 0xc24 LB: >> { %s4153_s0 = smul.u32 24, %s8484_s23  ;;  %v8491_v6 = vmov 0.0   ;;  %v8492_v36 = vmov 0   ;;  %s4150_s23 = sadd.s32 1, %s8484_s23   ;;  %s8484_s23 = sphi %s10052_s23, %s4150_s23   ;;  %v8480_v59 = vphi %v10050_v59, %v11006_v59   ;;  %v8476_v2 = vphi %v10048_v2, %v11005_v2  }
 0xc25   : >> { %6904 = vmatprep.subr.msk.bf16.mxu0 %vm929_vm2, %v4144_v42  ;;  %4276 = vmatprep.mubr.bf16.mxu1 %v8492_v36  ;;  %p4147_p1 = scmp.ge.s32.totalorder %s4150_s23, 8  }
 0xc26   : >> { %4178 = vmatpush1.bf16.xpose.msra.mxu0 %v4143_v62  ;;  %v4154_v11 = vstv %s4153_s0  ;;  %s4157_s5 = sadd.s32 24, %s4153_s0  ;;  %v8046_v16 = vld [vmem:[%s10946_s10 + $0xe4] ss:$8 sps:$4 sm:$0xff] (%p4147_p1)   ;;  %v8060_v58 = vld [vmem:[%s10946_s10 + $0x120] ss:$8 sps:$4 sm:$0xff] (%p4147_p1)   ;;  %s7339_s1 = sshll.u32 (%p4147_p1), %s8630_s4, 7 }
 0xc27   : >> { %vm4155_vm6 = vcmp.ge.s32.totalorder %v8827_v63, %v4154_v11  ;;  %vm4156_vm7 = vcmp.ge.s32.totalorder %v8833_v1, %v4154_v11  ;;  %v4158_v13 = vstv %s4157_s5  ;;  %v8040_v11 = vld [vmem:[%s10946_s10 + $0xc4] ss:$8 sps:$4 sm:$0xff] (%p4147_p1)   ;;  %v8061_v62 = vld [vmem:[%s10946_s10 + $0x134] ss:$8 sps:$4 sm:$0xff] (%p4147_p1)   ;;  %v8063_v42 = vld [vmem:[%s10946_s10 + $0x130] ss:$8 sps:$4 sm:$0xff] (%p4147_p1)  }
 0xc28   : >> { %vm4159_vm8 = vcmp.lt.s32.totalorder %v8827_v63, %v4158_v13  ;;  %vm4160_vm9 = vcmp.lt.s32.totalorder %v8833_v1, %v4158_v13  ;;  %4450 = vmatprep.subr.bf16.mxu0 (%p4147_p1), %v8040_v11  ;;  %v8043_v63 = vld [vmem:[%s10946_s10 + $0xd4] ss:$8 sps:$4 sm:$0xff] (%p4147_p1)   ;;  %v8045_v1 = vld [vmem:[%s10946_s10 + $0xd0] ss:$8 sps:$4 sm:$0xff] (%p4147_p1)   ;;  %v8058_v56 = vld [vmem:[%s10946_s10 + $0x124] ss:$8 sps:$4 sm:$0xff] (%p4147_p1)  }
 0xc29   : >> { %vm4161_vm10 = vmand %vm4155_vm6, %vm4159_vm8  ;;  %v8093_v11 = vld [vmem:[%s10950_s14 + $0x2b4] ss:$24 sps:$4 sm:$0xff] (%p4147_p1)   ;;  %s6343_s3 = sshll.u32 (%p4147_p1), %s9003_s26, 4  ;;  %s11007_s0 = sld [smem:[#allocation20_spill]] (%p4147_p1)  ;;  %s10893_s3 = int_to_ptr.vmem [resolvable:$true] %s6343_s3 }
 0xc2a   : >> { %vm4162_vm12 = vmand %vm4156_vm7, %vm4160_vm9  ;;  %v6902_v9 = vsel %vm4161_vm10, 1.0, %v8491_v6  ;;  %s6330_s28 = scalar_lea.sflag (%p4147_p1), [#allocation4], %s8668_s24  ;;  %s8374_s29 = scalar_lea.vmem (%p4147_p1), %s10893_s3, 128 }
 0xc2b   : >> { %v6903_v40 = vsel %vm4162_vm12, 1.0, %v8491_v6  ;;  %v4167_v8 = vmul.f32 %v6902_v9, %v10027_v44  ;;  %v4231_v38 = vmul.f32 %v6902_v9, %v10029_v34  ;;  %v8042_v6 = vld [vmem:[%s10946_s10 + $0xc0] ss:$8 sps:$4 sm:$0xff] (%p4147_p1)   ;;  %v8051_v44 = vld [vmem:[%s10946_s10 + $0xf0] ss:$8 sps:$4 sm:$0xff] (%p4147_p1)   ;;  %p8375_p2 = scmp.ne.s32.totalorder (%p4147_p1), %s10893_s3, %s8374_s29  ;;  %s8493_s4 = smov (%p4147_p1), [#allocation3]  }
 0xc2c   : >> { %v4168_v3 = vmul.f32 %v6903_v40, %v10031_v39  ;;  %v4232_v31 = vmul.f32 %v6903_v40, %v10033_v41  ;;  %v8054_v34 = vld [vmem:[%s10946_s10 + $0x100] ss:$8 sps:$4 sm:$0xff] (%p4147_p1)   ;;  %v8055_v39 = vld [vmem:[%s10946_s10 + $0x114] ss:$8 sps:$4 sm:$0xff] (%p4147_p1)   ;;  %v8057_v41 = vld [vmem:[%s10946_s10 + $0x110] ss:$8 sps:$4 sm:$0xff] (%p4147_p1)  }
 0xc2d   : >> { %v4169_v15 = vpack.c.bf16 %v4167_v8, %v4167_v8  ;;  %v4233_v21 = vpack.c.bf16 %v4231_v38, %v4231_v38  ;;  %v8066_v9 = vld [vmem:[%s10946_s10 + $0x140] ss:$8 sps:$4 sm:$0xff] (%p4147_p1)   ;;  %v8067_v40 = vld [vmem:[%s10946_s10 + $0x154] ss:$8 sps:$4 sm:$0xff] (%p4147_p1)   ;;  %v8069_v8 = vld [vmem:[%s10946_s10 + $0x150] ss:$8 sps:$4 sm:$0xff] (%p4147_p1)   ;;  %p8376_p3 = pnand (%p4147_p1), %p8375_p2, %p8648_p6 }
 0xc2e   : >> { %v4170_v19 = vpack.c.bf16 %v4168_v3, %v4168_v3  ;;  %v4234_v14 = vpack.c.bf16 %v4232_v31, %v4232_v31  ;;  %v8070_v3 = vld [vmem:[%s10946_s10 + $0x164] ss:$8 sps:$4 sm:$0xff] (%p4147_p1)   ;;  %s8378_s2 = sshll.u32 (%p4147_p1), %s8493_s4, 4  ;;  %s8379_s2 = int_to_ptr.vmem [resolvable:$false] %s8378_s2 }
 0xc2f   : >> { %v4239_v45 = vsel %vm1666_vm11, %v4233_v21, 0  ;;  %s10891_s5 = scalar_lea.hbm (%p4147_p1), %s11007_s0, %s7339_s1  ;;  %p8377_p4 = pneg (%p4147_p1), %p8376_p3 }
 0xc30   : >> { %6905 = vmatprep.mubr.msk.bf16.mxu0 %vm929_vm2, %v4170_v19  ;;  %6906 = vmatprep.subr.msk.bf16.mxu1 %vm1666_vm11, %v4234_v14  ;;  %v8073_v19 = vld [vmem:[%s10946_s10 + $0x174] ss:$8 sps:$4 sm:$0xff] (%p4147_p1)   ;;  %s8380_s27 = scalar_lea.vmem (%p4147_p1), %s8379_s2, 256  ;;  %p8381_p5 = scmp.lt.s32.totalorder (%p4147_p1), %s10893_s3, %s8379_s2 }
 0xc31   : >> { %4210 = vmatmul.mubr.bf16.vlgmr.msra.gmra.mrb[0].mxu0 %v4169_v15  ;;  %4245 = vmatpush1.bf16.msra.mxu1 %v4239_v45  ;;  %v8072_v15 = vld [vmem:[%s10946_s10 + $0x160] ss:$8 sps:$4 sm:$0xff] (%p4147_p1)   ;;  %p8382_p7 = scmp.lt.s32.totalorder (%p4147_p1), %s8380_s27, %s8374_s29 }
 0xc32   : > { %6958 = vmatprep.subr.msk.bf16.mxu1 (%p4147_p1), %vm1666_vm11, %v9935_v57  ;;  %4451 = vmatpush1.bf16.msra.mxu0 (%p4147_p1), %v8042_v6  ;;  %v8048_v57 = vld [vmem:[%s10946_s10 + $0xe0] ss:$8 sps:$4 sm:$0xff] (%p4147_p1)   ;;  %v8096_v6 = vld [vmem:[%s10950_s14 + $0x2d4] ss:$24 sps:$4 sm:$0xff] (%p4147_p1)  }
 0xc33   : > { %4452 = vmatprep.subr.bf16.mxu0 (%p4147_p1), %v8043_v63  ;;  %v8099_v63 = vld [vmem:[%s10950_s14 + $0x2e4] ss:$24 sps:$4 sm:$0xff] (%p4147_p1)   ;;  %p8383_p10 = por (%p4147_p1), %p8382_p7, %p8381_p5 }
 0xc35   : > { %p8384_p11 = pnand (%p4147_p1), %p8383_p10, %p8377_p4 }
 0xc36   : > { %4453 = vmatpush1.bf16.msra.mxu0 (%p4147_p1), %v8045_v1  ;;  %v8094_v1 = vld [vmem:[%s10950_s14 + $0x2d0] ss:$24 sps:$4 sm:$0xff] (%p4147_p1)  }
 0xc37   : > { %4454 = vmatprep.subr.bf16.mxu0 (%p4147_p1), %v8046_v16  ;;  %v8097_v16 = vld [vmem:[%s10950_s14 + $0x2e0] ss:$24 sps:$4 sm:$0xff] (%p4147_p1)  }
 0xc3a   : > { %4455 = vmatpush1.bf16.msra.mxu0 (%p4147_p1), %v8048_v57  ;;  %v8102_v57 = vld [vmem:[%s10950_s14 + $0x304] ss:$24 sps:$4 sm:$0xff] (%p4147_p1)  }
 0xd04   : >> { %v4211_v12 = vpop.f32.mrb[0].mxu0 }
 0xd05   : >> { %v4217_v23 = vmul.f32 0.20412415, %v4211_v12  ;;  %v4213_v17 = vpop.f32.mrb[1].mxu0  ;;  %v8075_v12 = vld [vmem:[%s10946_s10 + $0x170] ss:$8 sps:$4 sm:$0xff] (%p4147_p1)  }
 0xd06   : >> { %v4214_v33 = vpop.f32.mrb[2].mxu0 }
 0xd07   : >> { %v4215_v35 = vpop.f32.mrb[3].mxu0  ;;  %v4218_v32 = vsel %vm911_vm3, %v4217_v23, -1e+30 }
 0xd08   : >> { %v4219_v27 = vsel %vm916_vm4, %v4218_v32, -inf }
 0xd09   : >> { %4220 = vmax.xlane.f32.xlu0 %v4219_v27  ;;  %v6932_v27 = vld [vmem:[%s10947_s11 + $0x2] sm:$0x3] (%p4147_p1) }
 0xd96   : >> { %v4221_v28 = vpop.xlane.xlu0 %4220 }
 0xd97   : >> { %v4222_v7 = vsub.f32 %v4218_v32, %v4221_v28  ;;  %v4320_v28 = vrot.slane (%p4147_p1), %v6932_v27, %v8871_v26 }
 0xd99   : >> { %v4223_v5 = vmul.f32 1.442695, %v4222_v7  ;;  %v4324_v7 = vrot.slane (%p4147_p1), %v6932_v27, %v8868_v25  ;;  %v8126_v27 = vld [vmem:[%s10950_s14 + $0x3c4] ss:$24 sps:$4 sm:$0xff] (%p4147_p1)  }
 0xd9b   : >> { %8036 = vpow2.f32 %v4223_v5  ;;  %v7394_v5 = vadd.f32 (%p4147_p1), %v4320_v28, %v9770_v30  ;;  %v8078_v30 = vld [vmem:[%s10950_s14 + $0x244] ss:$24 sps:$4 sm:$0xff] (%p4147_p1)   ;;  %v8124_v28 = vld [vmem:[%s10950_s14 + $0x3c0] ss:$24 sps:$4 sm:$0xff] (%p4147_p1)  }
 0xda5   : >> { %v8037_v29 = vpop.eup %8036 }
 0xda6   : >> { %v4225_v50 = vsel %vm916_vm4, %v8037_v29, 0.0 }
 0xda7   : >> { %4226 = vadd.xlane.f32.xlu0 %v4225_v50 }
 0xe34   : >> { %v4227_v46 = vpop.xlane.xlu0 %4226 }
 0xe35   : >> { %8038 = vrcp.f32 %v4227_v46 }
 0xe3f   : >> { %v8039_v47 = vpop.eup %8038 }
 0xe40   : >> { %v4229_v37 = vmul.f32 %v8039_v47, %v8037_v29  ;;  %v7397_v29 = vadd.f32 (%p4147_p1), %v4324_v7, %v9768_v20  ;;  %v8076_v20 = vld [vmem:[%s10950_s14 + $0x240] ss:$24 sps:$4 sm:$0xff] (%p4147_p1)   ;;  %v8129_v7 = vld [vmem:[%s10950_s14 + $0x3d4] ss:$24 sps:$4 sm:$0xff] (%p4147_p1)  }
 0xe42   : >> { %v4230_v48 = vpack.c.bf16 %v4229_v37, %v4229_v37 }
 0xe44   : >> { %6907 = vmatmul.mubr.msk.bf16.vlgmr.msra.gmra.mrb[0].mxu1 %vm916_vm4, %v4230_v48  ;;  %v8079_v48 = vld [vmem:[%s10950_s14 + $0x250] ss:$24 sps:$4 sm:$0xff] (%p4147_p1)  }
 0xe45   : > { %4528 = vmatprep.mubr.bf16.mxu1 (%p4147_p1), %v8490_v60 }
 0xf15   : > { %4149 = sbr.rel (!%p4147_p1) target bundleno = 3108 (0xc24), region = 233 }
 0xf17   : >> { %v4278_v54 = vpop.f32.mrb[0].mxu1 }
 0xf18   : >> { %v10083_v59 = vadd.f32 %v8480_v59, %v4278_v54   ;;  %v4280_v43 = vpop.f32.mrb[1].mxu1  ;;  %v8081_v54 = vld [vmem:[%s10950_s14 + $0x254] ss:$24 sps:$4 sm:$0xff] (%p4147_p1)  }
 0xf19   : >> { %v4286_v22 = vadd.f32 %v8476_v2, %v4280_v43   ;;  %v4282_v52 = vpop.f32.mrb[2].mxu1  ;;  %v8087_v43 = vld [vmem:[%s10950_s14 + $0x284] ss:$24 sps:$4 sm:$0xff] (%p4147_p1)  }
 0xf1a   : >> { %v11004_v55 = vmov %v10083_v59  ;;  %v4283_v0 = vpop.f32.mrb[3].mxu1  ;;  %v8085_v52 = vld [vmem:[%s10950_s14 + $0x280] ss:$24 sps:$4 sm:$0xff] (%p4147_p1)  }
 0xf1b   : >> { %v11005_v2 = vmov %v4286_v22  ;;  %v11006_v59 = vmov %v11004_v55  ;;  %v4288_v13 = vpack.c.bf16 (%p4147_p1), %v4286_v22, %v4286_v22  ;;  %v4287_v23 = vpack.c.bf16 (%p4147_p1), %v11004_v55, %v11004_v55  ;;  %v8084_v55 = vld [vmem:[%s10950_s14 + $0x274] ss:$24 sps:$4 sm:$0xff] (%p4147_p1)   ;;  %v8082_v22 = vld [vmem:[%s10950_s14 + $0x270] ss:$24 sps:$4 sm:$0xff] (%p4147_p1)   ;;  %v8090_v0 = vld [vmem:[%s10950_s14 + $0x2a4] ss:$24 sps:$4 sm:$0xff] (%p4147_p1)  }
 0xf1c   : > { %v4492_v59 = vsel %vm1666_vm11, %v9940_v61, 0  ;;  %v8049_v61 = vld [vmem:[%s10946_s10 + $0xf4] ss:$8 sps:$4 sm:$0xff]   ;;  %v8064_v2 = vld [vmem:[%s10946_s10 + $0x144] ss:$8 sps:$4 sm:$0xff]  }
 0xf1d   : > { %4497 = vmatpush1.bf16.msra.mxu1 %v4492_v59  ;;  %6957 = vmatprep.mubr.msk.bf16.mxu0 %vm929_vm2, %v4288_v13  ;;  %v8088_v59 = vld [vmem:[%s10950_s14 + $0x2a0] ss:$24 sps:$4 sm:$0xff]   ;;  %v8091_v13 = vld [vmem:[%s10950_s14 + $0x2b0] ss:$24 sps:$4 sm:$0xff]  }
 0xf1e   : > { %4456 = vmatprep.subr.bf16.mxu0 %v8049_v61  ;;  %5060 = vmatprep.subr.bf16.mxu1 %v8078_v30  ;;  %v8105_v61 = vld [vmem:[%s10950_s14 + $0x314] ss:$24 sps:$4 sm:$0xff]   ;;  %v8147_v30 = vld [vmem:[%s10950_s14 + $0x464] ss:$24 sps:$4 sm:$0xff]  }
 0xf1f   : > { %4457 = vmatpush1.bf16.msra.mxu0 %v8051_v44  ;;  %v8100_v44 = vld [vmem:[%s10950_s14 + $0x300] ss:$24 sps:$4 sm:$0xff]  }
 0xf20   : > { %6959 = vmatmul.mubr.msk.bf16.vlgmr.msra.gmra.mrb[0].mxu1 %vm916_vm4, %v8968_v10  ;;  %v8052_v10 = vld [vmem:[%s10946_s10 + $0x104] ss:$8 sps:$4 sm:$0xff]  }
 0xf21   : > { %4458 = vmatprep.subr.bf16.mxu0 %v8052_v10  ;;  %5061 = vmatpush1.bf16.msra.mxu1 %v8076_v20  ;;  %v8103_v10 = vld [vmem:[%s10950_s14 + $0x310] ss:$24 sps:$4 sm:$0xff]  }
 0xf22   : > { %5062 = vmatprep.subr.bf16.mxu1 %v8084_v55  ;;  %v8142_v20 = vld [vmem:[%s10950_s14 + $0x450] ss:$24 sps:$4 sm:$0xff]  }
 0xf23   : > { %4459 = vmatpush1.bf16.msra.mxu0 %v8054_v34  ;;  %v8108_v34 = vld [vmem:[%s10950_s14 + $0x334] ss:$24 sps:$4 sm:$0xff]  }
 0xf24   : > { %4460 = vmatprep.subr.bf16.mxu0 %v8055_v39  ;;  %v8111_v39 = vld [vmem:[%s10950_s14 + $0x344] ss:$24 sps:$4 sm:$0xff]  }
 0xf25   : > { %5063 = vmatpush1.bf16.msra.mxu1 %v8082_v22 }
 0xf26   : > { %5064 = vmatprep.subr.bf16.mxu1 %v8090_v0  ;;  %v6961_v0 = vld [vmem:[%s10949_s13 + $0x2] sm:$0x3] }
 0xf27   : > { %4461 = vmatpush1.bf16.msra.mxu0 %v8057_v41  ;;  %v8106_v41 = vld [vmem:[%s10950_s14 + $0x330] ss:$24 sps:$4 sm:$0xff]  }
 0xf28   : > { %4462 = vmatprep.subr.bf16.mxu0 %v8058_v56  ;;  %v8109_v56 = vld [vmem:[%s10950_s14 + $0x340] ss:$24 sps:$4 sm:$0xff]  }
 0xf29   : > { %5065 = vmatpush1.bf16.msra.mxu1 %v8088_v59 }
 0xf2a   : > { %5066 = vmatprep.subr.bf16.mxu1 %v8096_v6 }
 0xf2b   : > { %4463 = vmatpush1.bf16.msra.mxu0 %v8060_v58  ;;  %v8114_v58 = vld [vmem:[%s10950_s14 + $0x364] ss:$24 sps:$4 sm:$0xff]  }
 0xf2c   : > { %4464 = vmatprep.subr.bf16.mxu0 %v8061_v62  ;;  %v8112_v62 = vld [vmem:[%s10950_s14 + $0x360] ss:$24 sps:$4 sm:$0xff]  }
 0xf2d   : > { %5067 = vmatpush1.bf16.msra.mxu1 %v8094_v1  ;;  %v4580_v1 = vrot.slane %v6961_v0, %v8871_v26 }
 0xf2e   : > { %5068 = vmatprep.subr.bf16.mxu1 %v8102_v57 }
 0xf2f   : > { %4465 = vmatpush1.bf16.msra.mxu0 %v8063_v42 }
 0xf30   : > { %4466 = vmatprep.subr.bf16.mxu0 %v8064_v2 }
 0xf31   : > { %5069 = vmatpush1.bf16.msra.mxu1 %v8100_v44 }
 0xf32   : > { %5070 = vmatprep.subr.bf16.mxu1 %v8108_v34 }
 0xf33   : > { %4467 = vmatpush1.bf16.msra.mxu0 %v8066_v9 }
 0xf34   : > { %4468 = vmatprep.subr.bf16.mxu0 %v8067_v40 }
 0xf35   : > { %5071 = vmatpush1.bf16.msra.mxu1 %v8106_v41 }
 0xf36   : > { %5072 = vmatprep.subr.bf16.mxu1 %v8114_v58  ;;  %v8151_v58 = vld [vmem:[%s10950_s14 + $0x278] ss:$24 sps:$4 sm:$0xff]  }
 0xf37   : > { %4469 = vmatpush1.bf16.msra.mxu0 %v8069_v8 }
 0xf38   : > { %4470 = vmatprep.subr.bf16.mxu0 %v8070_v3 }
 0xf39   : > { %5073 = vmatpush1.bf16.msra.mxu1 %v8112_v62  ;;  %v8156_v62 = vld [vmem:[%s10950_s14 + $0x2ac] ss:$24 sps:$4 sm:$0xff]  }
 0xf3b   : > { %4471 = vmatpush1.bf16.msra.mxu0 %v8072_v15 }
 0xf3c   : > { %4472 = vmatprep.subr.bf16.mxu0 %v8073_v19 }
 0xf3f   : > { %4473 = vmatpush1.bf16.msra.mxu0 %v8075_v12  ;;  %v8117_v12 = vld [vmem:[%s10950_s14 + $0x374] ss:$24 sps:$4 sm:$0xff]  }
 0xf40   : > { %5142 = vmatprep.subr.bf16.mxu0 %v8081_v54  ;;  %v8150_v54 = vld [vmem:[%s10950_s14 + $0x24c] ss:$24 sps:$4 sm:$0xff]  }
 0xf42   : > { %4483 = vmatmul.mubr.bf16.vlgmr.msra.gmra.mrb[0].mxu0 %v4287_v23  ;;  %v8115_v23 = vld [vmem:[%s10950_s14 + $0x370] ss:$24 sps:$4 sm:$0xff]  }
 0xf43   : > { %5143 = vmatpush1.bf16.msra.mxu0 %v8079_v48  ;;  %v8145_v48 = vld [vmem:[%s10950_s14 + $0x460] ss:$24 sps:$4 sm:$0xff]  }
 0xf44   : > { %5144 = vmatprep.subr.bf16.mxu0 %v8087_v43 }
 0xf47   : > { %5145 = vmatpush1.bf16.msra.mxu0 %v8085_v52  ;;  %v6960_v52 = vld [vmem:[%s10948_s12 + $0x2] sm:$0x3] }
 0xf48   : > { %5146 = vmatprep.subr.bf16.mxu0 %v8093_v11  ;;  %v4567_v11 = vrot.slane %v6960_v52, %v8871_v26  ;;  %v4571_v59 = vrot.slane %v6960_v52, %v8868_v25  ;;  %v8205_v52 = vld [vmem:[%s10952_s16 + $0x370] ss:$8 sps:$4 sm:$0xff]  }
 0xf4b   : > { %5147 = vmatpush1.bf16.msra.mxu0 %v8091_v13 }
 0xf4c   : > { %5148 = vmatprep.subr.bf16.mxu0 %v8099_v63 }
 0xf4f   : > { %5149 = vmatpush1.bf16.msra.mxu0 %v8097_v16  ;;  %v4584_v16 = vrot.slane %v6961_v0, %v8868_v25  ;;  %v8210_v0 = vld [vmem:[%s10952_s16 + $0x384] ss:$8 sps:$4 sm:$0xff]  }
 0xf50   : > { %5150 = vmatprep.subr.bf16.mxu0 %v8105_v61 }
 0xf53   : > { %5151 = vmatpush1.bf16.msra.mxu0 %v8103_v10 }
 0xf54   : > { %5152 = vmatprep.subr.bf16.mxu0 %v8111_v39  ;;  %v8148_v39 = vld [vmem:[%s10950_s14 + $0x248] ss:$24 sps:$4 sm:$0xff]  }
 0xf57   : > { %5153 = vmatpush1.bf16.msra.mxu0 %v8109_v56  ;;  %v8153_v56 = vld [vmem:[%s10950_s14 + $0x27c] ss:$24 sps:$4 sm:$0xff]  }
 0xf58   : > { %5154 = vmatprep.subr.bf16.mxu0 %v8117_v12  ;;  %v8166_v12 = vld [vmem:[%s10950_s14 + $0x368] ss:$24 sps:$4 sm:$0xff]  }
 0xf5b   : > { %5155 = vmatpush1.bf16.msra.mxu0 %v8115_v23  ;;  %v8171_v23 = vld [vmem:[%s10950_s14 + $0x39c] ss:$24 sps:$4 sm:$0xff]  }
 0xff3   : > { %v4530_v17 = vpop.f32.mrb[0].mxu1 }
 0xff4   : > { %v4532_v33 = vpop.f32.mrb[1].mxu1 }
 0xff5   : > { %v4534_v35 = vpop.f32.mrb[2].mxu1 }
 0xff6   : > { %v4535_v32 = vpop.f32.mrb[3].mxu1  ;;  %v8123_v35 = vld [vmem:[%s10950_s14 + $0x3a4] ss:$24 sps:$4 sm:$0xff]  }
 0xff7   : > { %v8121_v32 = vld [vmem:[%s10950_s14 + $0x3a0] ss:$24 sps:$4 sm:$0xff]   ;;  %5156 = vmatprep.subr.bf16.mxu0 %v8123_v35 }
 0xff8   : > { %5157 = vmatpush1.bf16.msra.mxu0 %v8121_v32  ;;  %v8172_v35 = vld [vmem:[%s10950_s14 + $0x3c8] ss:$24 sps:$4 sm:$0xff]   ;;  %v8177_v32 = vld [vmem:[%s10950_s14 + $0x3fc] ss:$24 sps:$4 sm:$0xff]  }
 0xff9   : > { %5158 = vmatprep.subr.bf16.mxu0 %v8129_v7  ;;  %v8178_v7 = vld [vmem:[%s10950_s14 + $0x428] ss:$24 sps:$4 sm:$0xff]  }
0x1015   : > { %v4484_v50 = vpop.f32.mrb[0].mxu0 }
0x1016   : > { %v7395_v31 = vadd.f32 %v7394_v5, %v4484_v50  ;;  %v4486_v38 = vpop.f32.mrb[1].mxu0  ;;  %v8127_v5 = vld [vmem:[%s10950_s14 + $0x3d0] ss:$24 sps:$4 sm:$0xff]  }
0x1017   : > { %v7398_v36 = vadd.f32 %v7397_v29, %v4486_v38  ;;  %v4488_v14 = vpop.f32.mrb[2].mxu0  ;;  %5159 = vmatpush1.bf16.msra.mxu0 %v8127_v5  ;;  %v8132_v29 = vld [vmem:[%s10950_s14 + $0x3f4] ss:$24 sps:$4 sm:$0xff]   ;;  %v8130_v50 = vld [vmem:[%s10950_s14 + $0x3f0] ss:$24 sps:$4 sm:$0xff]  }
0x1018   : > { %v10182_v21 = vadd.f32 %v7395_v31, %v4530_v17  ;;  %v4489_v45 = vpop.f32.mrb[3].mxu0  ;;  %v8120_v17 = vld [vmem:[%s10950_s14 + $0x394] ss:$24 sps:$4 sm:$0xff]   ;;  %v8135_v31 = vld [vmem:[%s10950_s14 + $0x404] ss:$24 sps:$4 sm:$0xff]  }
0x1019   : > { %v10184_v46 = vadd.f32 %v7398_v36, %v4532_v33  ;;  %v8118_v33 = vld [vmem:[%s10950_s14 + $0x390] ss:$24 sps:$4 sm:$0xff]   ;;  %5074 = vmatprep.subr.bf16.mxu1 %v8120_v17  ;;  %v8133_v38 = vld [vmem:[%s10950_s14 + $0x400] ss:$24 sps:$4 sm:$0xff]   ;;  %5160 = vmatprep.subr.bf16.mxu0 %v8135_v31  ;;  %v8138_v36 = vld [vmem:[%s10950_s14 + $0x424] ss:$24 sps:$4 sm:$0xff]  }
0x101a   : > { %5075 = vmatpush1.bf16.msra.mxu1 %v8118_v33  ;;  %v8136_v14 = vld [vmem:[%s10950_s14 + $0x420] ss:$24 sps:$4 sm:$0xff]   ;;  %v8141_v45 = vld [vmem:[%s10950_s14 + $0x434] ss:$24 sps:$4 sm:$0xff]  }
0x101b   : > { %v4545_v47 = vsel %vm929_vm2, %v10184_v46, 0.0  ;;  %5076 = vmatprep.subr.bf16.mxu1 %v8126_v27  ;;  %5161 = vmatpush1.bf16.msra.mxu0 %v8133_v38  ;;  %v8169_v17 = vld [vmem:[%s10950_s14 + $0x398] ss:$24 sps:$4 sm:$0xff]   ;;  %v8174_v33 = vld [vmem:[%s10950_s14 + $0x3cc] ss:$24 sps:$4 sm:$0xff]  }
0x101c   : > { %v4546_v37 = vadd.f32 %v10182_v21, %v4545_v47  ;;  %v8139_v47 = vld [vmem:[%s10950_s14 + $0x430] ss:$24 sps:$4 sm:$0xff]   ;;  %5162 = vmatprep.subr.bf16.mxu0 %v8141_v45  ;;  %v8183_v5 = vld [vmem:[%s10950_s14 + $0x45c] ss:$24 sps:$4 sm:$0xff]  }
0x101d   : > { %v8175_v27 = vld [vmem:[%s10950_s14 + $0x3f8] ss:$24 sps:$4 sm:$0xff]   ;;  %v8184_v31 = vld [vmem:[%s10952_s16 + $0x300] ss:$8 sps:$4 sm:$0xff]   ;;  %v8189_v38 = vld [vmem:[%s10952_s16 + $0x314] ss:$8 sps:$4 sm:$0xff]  }
0x101e   : > { %4547 = vadd.xlane.f32.xlu0 %v4546_v37  ;;  %5077 = vmatpush1.bf16.msra.mxu1 %v8124_v28  ;;  %v8144_v37 = vld [vmem:[%s10950_s14 + $0x454] ss:$24 sps:$4 sm:$0xff]   ;;  %v8190_v45 = vld [vmem:[%s10952_s16 + $0x320] ss:$8 sps:$4 sm:$0xff]  }
0x101f   : > { %5078 = vmatprep.subr.bf16.mxu1 %v8132_v29  ;;  %5163 = vmatpush1.bf16.msra.mxu0 %v8139_v47  ;;  %v8180_v28 = vld [vmem:[%s10950_s14 + $0x42c] ss:$24 sps:$4 sm:$0xff]   ;;  %v8181_v29 = vld [vmem:[%s10950_s14 + $0x458] ss:$24 sps:$4 sm:$0xff]   ;;  %v8195_v47 = vld [vmem:[%s10952_s16 + $0x334] ss:$8 sps:$4 sm:$0xff]  }
0x1020   : > { %5164 = vmatprep.subr.bf16.mxu0 %v8147_v30  ;;  %v8196_v30 = vld [vmem:[%s10952_s16 + $0x340] ss:$8 sps:$4 sm:$0xff]  }
0x1022   : > { %5079 = vmatpush1.bf16.msra.mxu1 %v8130_v50  ;;  %v8186_v50 = vld [vmem:[%s10952_s16 + $0x304] ss:$8 sps:$4 sm:$0xff]  }
0x1023   : > { %5080 = vmatprep.subr.bf16.mxu1 %v8138_v36  ;;  %5165 = vmatpush1.bf16.msra.mxu0 %v8145_v48  ;;  %v8187_v36 = vld [vmem:[%s10952_s16 + $0x310] ss:$8 sps:$4 sm:$0xff]   ;;  %v8201_v48 = vld [vmem:[%s10952_s16 + $0x354] ss:$8 sps:$4 sm:$0xff]  }
0x1026   : > { %5081 = vmatpush1.bf16.msra.mxu1 %v8136_v14  ;;  %v8192_v14 = vld [vmem:[%s10952_s16 + $0x324] ss:$8 sps:$4 sm:$0xff]  }
0x1027   : > { %5082 = vmatprep.subr.bf16.mxu1 %v8144_v37  ;;  %v8193_v37 = vld [vmem:[%s10952_s16 + $0x330] ss:$8 sps:$4 sm:$0xff]  }
0x102a   : > { %5083 = vmatpush1.bf16.msra.mxu1 %v8142_v20  ;;  %v8198_v20 = vld [vmem:[%s10952_s16 + $0x344] ss:$8 sps:$4 sm:$0xff]  }
0x102b   : > { %5101 = vmatprep.subr.bf16.mxu1 %v8150_v54  ;;  %v8199_v54 = vld [vmem:[%s10952_s16 + $0x350] ss:$8 sps:$4 sm:$0xff]  }
0x10ab   : > { %v4548_v42 = vpop.xlane.xlu0 %4547 }
0x10ac   : > { %v4549_v2 = vmul.f32 0.0052083335, %v4548_v42  ;;  %v8154_v42 = vld [vmem:[%s10950_s14 + $0x2a8] ss:$24 sps:$4 sm:$0xff]  }
0x10ae   : > { %v4550_v9 = vsub.f32 %v10182_v21, %v4549_v2  ;;  %v4551_v40 = vsub.f32 %v10184_v46, %v4549_v2  ;;  %v8159_v2 = vld [vmem:[%s10950_s14 + $0x2dc] ss:$24 sps:$4 sm:$0xff]  }
0x10b0   : > { %v4552_v8 = vmul.f32 %v4550_v9, %v4550_v9  ;;  %v4553_v3 = vmul.f32 %v4551_v40, %v4551_v40 }
0x10b2   : > { %v4554_v15 = vsel %vm929_vm2, %v4553_v3, 0.0  ;;  %v8165_v3 = vld [vmem:[%s10950_s14 + $0x33c] ss:$24 sps:$4 sm:$0xff]  }
0x10b3   : > { %v4555_v19 = vadd.f32 %v4554_v15, %v4552_v8  ;;  %v8160_v8 = vld [vmem:[%s10950_s14 + $0x308] ss:$24 sps:$4 sm:$0xff]   ;;  %v8163_v15 = vld [vmem:[%s10950_s14 + $0x338] ss:$24 sps:$4 sm:$0xff]  }
0x10b5   : > { %4556 = vadd.xlane.f32.xlu0 %v4555_v19  ;;  %v8168_v19 = vld [vmem:[%s10950_s14 + $0x36c] ss:$24 sps:$4 sm:$0xff]  }
0x1142   : > { %v4557_v55 = vpop.xlane.xlu0 %4556 }
0x1143   : > { %v4558_v43 = vmul.f32 0.0052083335, %v4557_v55  ;;  %v8204_v55 = vld [vmem:[%s10952_s16 + $0x364] ss:$8 sps:$4 sm:$0xff]  }
0x1145   : > { %v4559_v22 = vadd.f32 1e-05, %v4558_v43  ;;  %v8202_v43 = vld [vmem:[%s10952_s16 + $0x360] ss:$8 sps:$4 sm:$0xff]  }
0x1147   : > { %8348 = vrsqrt.f32 %v4559_v22  ;;  %v8207_v22 = vld [vmem:[%s10952_s16 + $0x374] ss:$8 sps:$4 sm:$0xff]  }
0x1151   : > { %v8349_v13 = vpop.eup %8348 }
0x1152   : > { %v4561_v6 = vmul.f32 %v8349_v13, %v4550_v9  ;;  %v4562_v63 = vmul.f32 %v8349_v13, %v4551_v40  ;;  %v8157_v9 = vld [vmem:[%s10950_s14 + $0x2d8] ss:$24 sps:$4 sm:$0xff]   ;;  %v8162_v40 = vld [vmem:[%s10950_s14 + $0x30c] ss:$24 sps:$4 sm:$0xff]  }
0x1153   : > { %v8211_v13 = vld [vmem:[%s10952_s16 + $0x390] ss:$8 sps:$4 sm:$0xff]  }
0x1154   : > { %v4575_v57 = vmul.f32 %v4571_v59, %v4562_v63  ;;  %v4574_v61 = vmul.f32 %v4567_v11, %v4561_v6  ;;  %v8208_v11 = vld [vmem:[%s10952_s16 + $0x380] ss:$8 sps:$4 sm:$0xff]   ;;  %v8213_v59 = vld [vmem:[%s10952_s16 + $0x394] ss:$8 sps:$4 sm:$0xff]   ;;  %v8216_v6 = vld [vmem:[%s10952_s16 + $0x3a4] ss:$8 sps:$4 sm:$0xff]  }
0x1155   : > { %v8214_v63 = vld [vmem:[%s10952_s16 + $0x3a0] ss:$8 sps:$4 sm:$0xff]  }
0x1156   : > { %v4588_v44 = vadd.f32 %v4584_v16, %v4575_v57  ;;  %v4587_v10 = vadd.f32 %v4580_v1, %v4574_v61  ;;  %v8219_v1 = vld [vmem:[%s10952_s16 + $0x3b4] ss:$8 sps:$4 sm:$0xff]   ;;  %v8217_v16 = vld [vmem:[%s10952_s16 + $0x3b0] ss:$8 sps:$4 sm:$0xff]   ;;  %v8222_v57 = vld [vmem:[%s10952_s16 + $0x3c4] ss:$8 sps:$4 sm:$0xff]  }
0x1157   : > { %v8225_v61 = vld [vmem:[%s10952_s16 + $0x404] ss:$8 sps:$4 sm:$0xff]  }
0x1158   : > { %v4590_v34 = vpack.c.bf16 %v4588_v44, %v4588_v44  ;;  %v4589_v41 = vpack.c.bf16 %v4587_v10, %v4587_v10  ;;  %v8220_v44 = vld [vmem:[%s10952_s16 + $0x3c0] ss:$8 sps:$4 sm:$0xff]   ;;  %5969 = vmatprep.subr.bf16.mxu0 %v8225_v61 }
0x1159   : > { %v8223_v10 = vld [vmem:[%s10952_s16 + $0x400] ss:$8 sps:$4 sm:$0xff]  }
0x115a   : > { %7107 = vmatprep.mubr.msk.bf16.mxu1 %vm929_vm2, %v4590_v34  ;;  %7109 = vmatprep.mubr.msk.bf16.mxu0 %vm929_vm2, %v4590_v34 }
0x115b   : > { %5093 = vmatmul.mubr.bf16.vlgmr.msra.gmra.mrb[4].mxu1 %v4589_v41  ;;  %5175 = vmatmul.mubr.bf16.vlgmr.msra.gmra.mrb[4].mxu0 %v4589_v41 }
0x115c   : > { %5102 = vmatpush1.bf16.msra.mxu1 %v8148_v39  ;;  %7108 = vmatprep.mubr.msk.bf16.mxu1 %vm929_vm2, %v4590_v34  ;;  %v8228_v34 = vld [vmem:[%s10952_s16 + $0x3d4] ss:$8 sps:$4 sm:$0xff]  }
0x115d   : > { %5103 = vmatprep.subr.bf16.mxu1 %v8153_v56  ;;  %5970 = vmatpush1.bf16.msra.mxu0 %v8223_v10  ;;  %v8231_v39 = vld [vmem:[%s10952_s16 + $0x414] ss:$8 sps:$4 sm:$0xff]   ;;  %v8229_v56 = vld [vmem:[%s10952_s16 + $0x410] ss:$8 sps:$4 sm:$0xff]  }
0x115e   : > { %5971 = vmatprep.subr.bf16.mxu0 %v8231_v39 }
0x1160   : > { %5104 = vmatpush1.bf16.msra.mxu1 %v8151_v58  ;;  %v8234_v58 = vld [vmem:[%s10952_s16 + $0x3e4] ss:$8 sps:$4 sm:$0xff]  }
0x1161   : > { %5105 = vmatprep.subr.bf16.mxu1 %v8156_v62  ;;  %5972 = vmatpush1.bf16.msra.mxu0 %v8229_v56  ;;  %v8237_v62 = vld [vmem:[%s10952_s16 + $0x424] ss:$8 sps:$4 sm:$0xff]  }
0x1162   : > { %5973 = vmatprep.subr.bf16.mxu0 %v8237_v62 }
0x1164   : > { %5106 = vmatpush1.bf16.msra.mxu1 %v8154_v42  ;;  %v8232_v42 = vld [vmem:[%s10952_s16 + $0x3e0] ss:$8 sps:$4 sm:$0xff]  }
0x1165   : > { %5107 = vmatprep.subr.bf16.mxu1 %v8159_v2  ;;  %v8235_v2 = vld [vmem:[%s10952_s16 + $0x420] ss:$8 sps:$4 sm:$0xff]  }
0x1166   : > { %5974 = vmatpush1.bf16.msra.mxu0 %v8235_v2 }
0x1168   : > { %5108 = vmatpush1.bf16.msra.mxu1 %v8157_v9  ;;  %v8240_v9 = vld [vmem:[%s10952_s16 + $0x3f4] ss:$8 sps:$4 sm:$0xff]  }
0x1169   : > { %5109 = vmatprep.subr.bf16.mxu1 %v8162_v40  ;;  %v8243_v40 = vld [vmem:[%s10952_s16 + $0x434] ss:$8 sps:$4 sm:$0xff]  }
0x116a   : > { %5975 = vmatprep.subr.bf16.mxu0 %v8243_v40 }
0x116c   : > { %5110 = vmatpush1.bf16.msra.mxu1 %v8160_v8  ;;  %v8238_v8 = vld [vmem:[%s10952_s16 + $0x3f0] ss:$8 sps:$4 sm:$0xff]  }
0x116d   : > { %5111 = vmatprep.subr.bf16.mxu1 %v8165_v3  ;;  %v8241_v3 = vld [vmem:[%s10952_s16 + $0x430] ss:$8 sps:$4 sm:$0xff]  }
0x116e   : > { %5976 = vmatpush1.bf16.msra.mxu0 %v8241_v3 }
0x1170   : > { %5112 = vmatpush1.bf16.msra.mxu1 %v8163_v15  ;;  %v8246_v15 = vld [vmem:[%s10952_s16 + $0x444] ss:$8 sps:$4 sm:$0xff]  }
0x1171   : > { %5113 = vmatprep.subr.bf16.mxu1 %v8168_v19  ;;  %v8249_v19 = vld [vmem:[%s10952_s16 + $0x504] ss:$8 sps:$4 sm:$0xff]   ;;  %5977 = vmatprep.subr.bf16.mxu0 %v8246_v15 }
0x1174   : > { %5114 = vmatpush1.bf16.msra.mxu1 %v8166_v12  ;;  %v8244_v12 = vld [vmem:[%s10952_s16 + $0x440] ss:$8 sps:$4 sm:$0xff]  }
0x1175   : > { %5115 = vmatprep.subr.bf16.mxu1 %v8171_v23  ;;  %5978 = vmatpush1.bf16.msra.mxu0 %v8244_v12  ;;  %v8252_v23 = vld [vmem:[%s10952_s16 + $0x454] ss:$8 sps:$4 sm:$0xff]  }
0x1176   : > { %5979 = vmatprep.subr.bf16.mxu0 %v8252_v23 }
0x1178   : > { %5116 = vmatpush1.bf16.msra.mxu1 %v8169_v17  ;;  %v8250_v17 = vld [vmem:[%s10952_s16 + $0x450] ss:$8 sps:$4 sm:$0xff]  }
0x1179   : > { %5117 = vmatprep.subr.bf16.mxu1 %v8174_v33  ;;  %5980 = vmatpush1.bf16.msra.mxu0 %v8250_v17  ;;  %v8258_v33 = vld [vmem:[%s10952_s16 + $0x464] ss:$8 sps:$4 sm:$0xff]  }
0x117a   : > { %5981 = vmatprep.subr.bf16.mxu0 %v8258_v33 }
0x117c   : > { %5118 = vmatpush1.bf16.msra.mxu1 %v8172_v35  ;;  %v8256_v35 = vld [vmem:[%s10952_s16 + $0x460] ss:$8 sps:$4 sm:$0xff]  }
0x117d   : > { %5119 = vmatprep.subr.bf16.mxu1 %v8177_v32  ;;  %5982 = vmatpush1.bf16.msra.mxu0 %v8256_v35  ;;  %v8264_v32 = vld [vmem:[%s10952_s16 + $0x474] ss:$8 sps:$4 sm:$0xff]  }
0x117e   : > { %5983 = vmatprep.subr.bf16.mxu0 %v8264_v32 }
0x1180   : > { %5120 = vmatpush1.bf16.msra.mxu1 %v8175_v27  ;;  %v8262_v27 = vld [vmem:[%s10952_s16 + $0x470] ss:$8 sps:$4 sm:$0xff]  }
0x1181   : > { %5121 = vmatprep.subr.bf16.mxu1 %v8180_v28  ;;  %5984 = vmatpush1.bf16.msra.mxu0 %v8262_v27  ;;  %v8270_v28 = vld [vmem:[%s10952_s16 + $0x484] ss:$8 sps:$4 sm:$0xff]  }
0x1182   : > { %5985 = vmatprep.subr.bf16.mxu0 %v8270_v28 }
0x1184   : > { %5122 = vmatpush1.bf16.msra.mxu1 %v8178_v7  ;;  %v8268_v7 = vld [vmem:[%s10952_s16 + $0x480] ss:$8 sps:$4 sm:$0xff]  }
0x1185   : > { %5123 = vmatprep.subr.bf16.mxu1 %v8183_v5  ;;  %5986 = vmatpush1.bf16.msra.mxu0 %v8268_v7  ;;  %v8276_v5 = vld [vmem:[%s10952_s16 + $0x494] ss:$8 sps:$4 sm:$0xff]  }
0x1186   : > { %5987 = vmatprep.subr.bf16.mxu0 %v8276_v5 }
0x1188   : > { %5124 = vmatpush1.bf16.msra.mxu1 %v8181_v29  ;;  %v8274_v29 = vld [vmem:[%s10952_s16 + $0x490] ss:$8 sps:$4 sm:$0xff]  }
0x1189   : > { %5928 = vmatprep.subr.bf16.mxu1 %v8186_v50  ;;  %5988 = vmatpush1.bf16.msra.mxu0 %v8274_v29  ;;  %v8282_v50 = vld [vmem:[%s10952_s16 + $0x4a4] ss:$8 sps:$4 sm:$0xff]  }
0x118a   : > { %5989 = vmatprep.subr.bf16.mxu0 %v8282_v50 }
0x118b   : > { %5134 = vmatmul.mubr.bf16.vlgmr.msra.gmra.mrb[8].mxu1 %v4589_v41  ;;  %v8226_v41 = vld [vmem:[%s10952_s16 + $0x3d0] ss:$8 sps:$4 sm:$0xff]  }
0x118c   : > { %5929 = vmatpush1.bf16.msra.mxu1 %v8184_v31  ;;  %v8280_v31 = vld [vmem:[%s10952_s16 + $0x4a0] ss:$8 sps:$4 sm:$0xff]  }
0x118d   : > { %5930 = vmatprep.subr.bf16.mxu1 %v8189_v38  ;;  %5990 = vmatpush1.bf16.msra.mxu0 %v8280_v31  ;;  %v8288_v38 = vld [vmem:[%s10952_s16 + $0x4b4] ss:$8 sps:$4 sm:$0xff]  }
0x118e   : > { %5991 = vmatprep.subr.bf16.mxu0 %v8288_v38 }
0x1190   : > { %5931 = vmatpush1.bf16.msra.mxu1 %v8187_v36  ;;  %v8286_v36 = vld [vmem:[%s10952_s16 + $0x4b0] ss:$8 sps:$4 sm:$0xff]  }
0x1191   : > { %5932 = vmatprep.subr.bf16.mxu1 %v8192_v14  ;;  %5992 = vmatpush1.bf16.msra.mxu0 %v8286_v36  ;;  %v8294_v14 = vld [vmem:[%s10952_s16 + $0x4c4] ss:$8 sps:$4 sm:$0xff]  }
0x1192   : > { %5993 = vmatprep.subr.bf16.mxu0 %v8294_v14 }
0x1194   : > { %5933 = vmatpush1.bf16.msra.mxu1 %v8190_v45  ;;  %v8292_v45 = vld [vmem:[%s10952_s16 + $0x4c0] ss:$8 sps:$4 sm:$0xff]  }
0x1195   : > { %5934 = vmatprep.subr.bf16.mxu1 %v8195_v47  ;;  %5994 = vmatpush1.bf16.msra.mxu0 %v8292_v45  ;;  %v8300_v47 = vld [vmem:[%s10952_s16 + $0x4d4] ss:$8 sps:$4 sm:$0xff]  }
0x1196   : > { %5995 = vmatprep.subr.bf16.mxu0 %v8300_v47 }
0x1198   : > { %5935 = vmatpush1.bf16.msra.mxu1 %v8193_v37  ;;  %v8298_v37 = vld [vmem:[%s10952_s16 + $0x4d0] ss:$8 sps:$4 sm:$0xff]  }
0x1199   : > { %5936 = vmatprep.subr.bf16.mxu1 %v8198_v20  ;;  %5996 = vmatpush1.bf16.msra.mxu0 %v8298_v37  ;;  %v8306_v20 = vld [vmem:[%s10952_s16 + $0x4e4] ss:$8 sps:$4 sm:$0xff]  }
0x119a   : > { %5997 = vmatprep.subr.bf16.mxu0 %v8306_v20 }
0x119c   : > { %5937 = vmatpush1.bf16.msra.mxu1 %v8196_v30  ;;  %v8304_v30 = vld [vmem:[%s10952_s16 + $0x4e0] ss:$8 sps:$4 sm:$0xff]  }
0x119d   : > { %5938 = vmatprep.subr.bf16.mxu1 %v8201_v48  ;;  %v8312_v48 = vld [vmem:[%s10952_s16 + $0x4f4] ss:$8 sps:$4 sm:$0xff]   ;;  %5998 = vmatpush1.bf16.msra.mxu0 %v8304_v30 }
0x119e   : > { %5999 = vmatprep.subr.bf16.mxu0 %v8312_v48 }
0x11a0   : > { %5939 = vmatpush1.bf16.msra.mxu1 %v8199_v54  ;;  %v8310_v54 = vld [vmem:[%s10952_s16 + $0x4f0] ss:$8 sps:$4 sm:$0xff]  }
0x11a1   : > { %5940 = vmatprep.subr.bf16.mxu1 %v8204_v55  ;;  %6000 = vmatpush1.bf16.msra.mxu0 %v8310_v54  ;;  %v10620_v55 = vld [vmem:[%s10951_s15 + $0x6] sm:$0x3f] }
0x11a2   : > { %6176 = vmatprep.subr.bf16.mxu0 %v8490_v60  ;;  %v4686_v33 = vrot.slane %v10620_v55, %v2112_v51 }
0x11a4   : > { %5941 = vmatpush1.bf16.msra.mxu1 %v8202_v43  ;;  %v4670_v43 = vrot.slane %v10620_v55, %v8871_v26 }
0x11a5   : > { %5942 = vmatprep.subr.bf16.mxu1 %v8207_v22  ;;  %v4674_v22 = vrot.slane %v10620_v55, %v8868_v25 }
0x11a8   : > { %5943 = vmatpush1.bf16.msra.mxu1 %v8205_v52  ;;  %v4690_v52 = vrot.slane %v10620_v55, %v2116_v18 }
0x11a9   : > { %5944 = vmatprep.subr.bf16.mxu1 %v8210_v0 }
0x11ac   : > { %5945 = vmatpush1.bf16.msra.mxu1 %v8208_v11 }
0x11ad   : > { %5946 = vmatprep.subr.bf16.mxu1 %v8213_v59 }
0x11b0   : > { %5947 = vmatpush1.bf16.msra.mxu1 %v8211_v13 }
0x11b1   : > { %5948 = vmatprep.subr.bf16.mxu1 %v8216_v6 }
0x11b4   : > { %5949 = vmatpush1.bf16.msra.mxu1 %v8214_v63 }
0x11b5   : > { %5950 = vmatprep.subr.bf16.mxu1 %v8219_v1 }
0x11b8   : > { %5951 = vmatpush1.bf16.msra.mxu1 %v8217_v16 }
0x11b9   : > { %5952 = vmatprep.subr.bf16.mxu1 %v8222_v57 }
0x11bc   : > { %5953 = vmatpush1.bf16.msra.mxu1 %v8220_v44 }
0x11bd   : > { %5954 = vmatprep.subr.bf16.mxu1 %v8228_v34 }
0x11c0   : > { %5955 = vmatpush1.bf16.msra.mxu1 %v8226_v41 }
0x11c1   : > { %5956 = vmatprep.subr.bf16.mxu1 %v8234_v58 }
0x11c4   : > { %5957 = vmatpush1.bf16.msra.mxu1 %v8232_v42 }
0x11c5   : > { %5958 = vmatprep.subr.bf16.mxu1 %v8240_v9 }
0x11c8   : > { %5959 = vmatpush1.bf16.msra.mxu1 %v8238_v8 }
0x11c9   : > { %6010 = vmatprep.subr.bf16.mxu1 %v8249_v19 }
0x122e   : > { %v5094_v0 = vpop.f32.mrb[4].mxu1  ;;  %v5176_v11 = vpop.f32.mrb[4].mxu0 }
0x122f   : > { %v10629_v59 = vadd.f32 %v5094_v0, %v4670_v43  ;;  %v5096_v13 = vpop.f32.mrb[5].mxu1  ;;  %v5178_v6 = vpop.f32.mrb[5].mxu0  ;;  %v10650_v31 = vadd.f32 %v5176_v11, %v4686_v33 }
0x1230   : > { %v10631_v63 = vadd.f32 %v5096_v13, %v4674_v22  ;;  %v10633_v1 = vadd.f32 %v5178_v6, %v4690_v52  ;;  %v5098_v16 = vpop.f32.mrb[6].mxu1  ;;  %v5180_v57 = vpop.f32.mrb[6].mxu0 }
0x1231   : > { %v10636_v61 = vmul.f32 0.70710677, %v10629_v59  ;;  %v5099_v42 = vpop.f32.mrb[7].mxu1  ;;  %v5181_v2 = vpop.f32.mrb[7].mxu0  ;;  %v10653_v51 = vmul.f32 0.70710677, %v10650_v31 }
0x1232   : > { %v10639_v44 = vmul.f32 0.70710677, %v10631_v63  ;;  %v10642_v18 = vmul.f32 0.70710677, %v10633_v1 }
0x1233   : > { %v5195_v10 = vand.u32 2147483647, %v10636_v61  ;;  %v10656_v11 = vand.u32 2147483647, %v10653_v51  ;;  %vm5315_vm3 = vcmp.lt.f32.partialorder %v10636_v61, 0.0  ;;  %vm5319_vm15 = vcmp.lt.f32.partialorder %v10653_v51, 0.0 }
0x1234   : > { %v5196_v34 = vand.u32 2147483647, %v10639_v44  ;;  %v5200_v39 = vand.u32 2147483647, %v10642_v18  ;;  %vm5316_vm4 = vcmp.lt.f32.partialorder %v10639_v44, 0.0  ;;  %vm5320_vm11 = vcmp.lt.f32.partialorder %v10642_v18, 0.0 }
0x1235   : > { %v5201_v41 = vmul.f32 0.3275911, %v5195_v10  ;;  %v5279_v8 = vsub.f32 0.0, %v5195_v10  ;;  %v8325_v51 = vld [vmem:[%s10952_s16 + $0x5f0] ss:$8 sps:$4 sm:$0xff]  }
0x1236   : > { %v5202_v56 = vmul.f32 0.3275911, %v5196_v34  ;;  %v5206_v62 = vmul.f32 0.3275911, %v5200_v39  ;;  %v5280_v19 = vsub.f32 0.0, %v5196_v34  ;;  %v5284_v23 = vsub.f32 0.0, %v5200_v39 }
0x1237   : > { %v5207_v58 = vadd.f32 1.0, %v5201_v41  ;;  %v5285_v15 = vmul.f32 %v5279_v8, %v5195_v10  ;;  %v5205_v41 = vmul.f32 0.3275911, %v10656_v11 }
0x1238   : > { %v5208_v9 = vadd.f32 1.0, %v5202_v56  ;;  %v5212_v40 = vadd.f32 1.0, %v5206_v62  ;;  %v5286_v27 = vmul.f32 %v5280_v19, %v5196_v34  ;;  %v5290_v29 = vmul.f32 %v5284_v23, %v5200_v39 }
0x1239   : > { %8350 = vrcp.f32 %v5207_v58  ;;  %v5291_v32 = vmul.f32 1.442695, %v5285_v15  ;;  %v5211_v8 = vadd.f32 1.0, %v5205_v41  ;;  %v8267_v41 = vld [vmem:[%s10952_s16 + $0x534] ss:$8 sps:$4 sm:$0xff]  }
0x123a   : > { %8352 = vrcp.f32 %v5208_v9  ;;  %v5293_v14 = vmul.f32 1.442695, %v5286_v27  ;;  %v5301_v20 = vmul.f32 1.442695, %v5290_v29  ;;  %v5183_v29 = vmul.f32 0.5, %v10629_v59 }
0x123b   : > { %8354 = vrcp.f32 %v5212_v40  ;;  %v5188_v59 = vmul.f32 0.5, %v10633_v1 }
0x123c   : > { %8356 = vpow2.f32 %v5291_v32 }
0x123d   : > { %8358 = vpow2.f32 %v5293_v14 }
0x123e   : > { %8360 = vpow2.f32 %v5301_v20 }
0x123f   : > { %8362 = vrcp.f32 %v5211_v8 }
0x1243   : > { %v8351_v3 = vpop.eup %8350 }
0x1244   : > { %v5225_v12 = vmul.f32 1.0614054, %v8351_v3  ;;  %v8353_v35 = vpop.eup %8352 }
0x1245   : > { %v5226_v7 = vmul.f32 1.0614054, %v8353_v35  ;;  %v8355_v5 = vpop.eup %8354 }
0x1246   : > { %v7110_v17 = vadd.f32 -1.4531521, %v5225_v12  ;;  %v5230_v36 = vmul.f32 1.0614054, %v8355_v5  ;;  %v8357_v34 = vpop.eup %8356 }
0x1247   : > { %v7111_v38 = vadd.f32 -1.4531521, %v5226_v7  ;;  %v8359_v9 = vpop.eup %8358 }
0x1248   : > { %v5237_v28 = vmul.f32 %v8351_v3, %v7110_v17  ;;  %v7115_v37 = vadd.f32 -1.4531521, %v5230_v36  ;;  %v8361_v12 = vpop.eup %8360  ;;  %v4682_v17 = vrot.slane %v10620_v55, %v2108_v53  ;;  %v5184_v53 = vmul.f32 0.5, %v10631_v63 }
0x1249   : > { %v5238_v47 = vmul.f32 %v8353_v35, %v7111_v38 }
0x124a   : > { %v5243_v50 = vadd.f32 1.4214138, %v5237_v28  ;;  %v5242_v54 = vmul.f32 %v8355_v5, %v7115_v37 }
0x124b   : > { %v5244_v48 = vadd.f32 1.4214138, %v5238_v47 }
0x124c   : > { %v5249_v45 = vmul.f32 %v8351_v3, %v5243_v50  ;;  %v5248_v52 = vadd.f32 1.4214138, %v5242_v54  ;;  %v8247_v54 = vld [vmem:[%s10952_s16 + $0x500] ss:$8 sps:$4 sm:$0xff]  }
0x124d   : > { %v5250_v22 = vmul.f32 %v8353_v35, %v5244_v48 }
0x124e   : > { %v7116_v30 = vadd.f32 -0.28449672, %v5249_v45  ;;  %v5254_v6 = vmul.f32 %v8355_v5, %v5248_v52 }
0x124f   : > { %v7117_v13 = vadd.f32 -0.28449672, %v5250_v22 }
0x1250   : > { %v5261_v43 = vmul.f32 %v8351_v3, %v7116_v30  ;;  %v7121_v10 = vadd.f32 -0.28449672, %v5254_v6  ;;  %v10689_v6 = vpop.eup %8362 }
0x1251   : > { %v5262_v57 = vmul.f32 %v8353_v35, %v7117_v13 }
0x1252   : > { %v5267_v0 = vadd.f32 0.2548296, %v5261_v43  ;;  %v5266_v58 = vmul.f32 %v8355_v5, %v7121_v10  ;;  %v8261_v10 = vld [vmem:[%s10952_s16 + $0x524] ss:$8 sps:$4 sm:$0xff]  }
0x1253   : > { %v5268_v56 = vadd.f32 0.2548296, %v5262_v57  ;;  %v8253_v57 = vld [vmem:[%s10952_s16 + $0x510] ss:$8 sps:$4 sm:$0xff]  }
0x1254   : > { %v5273_v16 = vmul.f32 %v8351_v3, %v5267_v0  ;;  %v5272_v2 = vadd.f32 0.2548296, %v5266_v58  ;;  %v4678_v3 = vrot.slane %v10620_v55, %v2104_v49  ;;  %v8255_v0 = vld [vmem:[%s10952_s16 + $0x514] ss:$8 sps:$4 sm:$0xff]  }
0x1255   : > { %v5274_v42 = vmul.f32 %v8353_v35, %v5268_v56 }
0x1256   : > { %v5303_v39 = vmul.f32 %v8357_v34, %v5273_v16  ;;  %v5278_v19 = vmul.f32 %v8355_v5, %v5272_v2  ;;  %v5229_v34 = vmul.f32 1.0614054, %v10689_v6  ;;  %v8273_v2 = vld [vmem:[%s10952_s16 + $0x544] ss:$8 sps:$4 sm:$0xff]  }
0x1257   : > { %v5304_v15 = vmul.f32 %v8359_v9, %v5274_v42  ;;  %v8265_v42 = vld [vmem:[%s10952_s16 + $0x530] ss:$8 sps:$4 sm:$0xff]  }
0x1258   : > { %v5309_v62 = vsub.f32 1.0, %v5303_v39  ;;  %v5308_v35 = vmul.f32 %v8361_v12, %v5278_v19  ;;  %v8259_v39 = vld [vmem:[%s10952_s16 + $0x520] ss:$8 sps:$4 sm:$0xff]   ;;  %v7114_v56 = vadd.f32 -1.4531521, %v5229_v34 }
0x1259   : > { %v5310_v33 = vsub.f32 1.0, %v5304_v15 }
0x125a   : > { %v5321_v40 = vsub.f32 0.0, %v5309_v62  ;;  %v5314_v7 = vsub.f32 1.0, %v5308_v35 }
0x125b   : > { %v5322_v28 = vsub.f32 0.0, %v5310_v33 }
0x125c   : > { %v5327_v23 = vsel %vm5315_vm3, %v5321_v40, %v5309_v62  ;;  %v5326_v38 = vsub.f32 0.0, %v5314_v7  ;;  %v5241_v40 = vmul.f32 %v10689_v6, %v7114_v56 }
0x125d   : > { %v5333_v32 = vadd.f32 1.0, %v5327_v23  ;;  %v5328_v24 = vsel %vm5316_vm4, %v5322_v28, %v5310_v33  ;;  %v8279_v33 = vld [vmem:[%s10952_s16 + $0x554] ss:$8 sps:$4 sm:$0xff]   ;;  %v5283_v28 = vsub.f32 0.0, %v10656_v11 }
0x125e   : > { %v5135_v27 = vpop.f32.mrb[8].mxu1  ;;  %v5334_v14 = vadd.f32 1.0, %v5328_v24  ;;  %v5332_v47 = vsel %vm5320_vm11, %v5326_v38, %v5314_v7  ;;  %v5247_v35 = vadd.f32 1.4214138, %v5241_v40  ;;  %v8285_v38 = vld [vmem:[%s10952_s16 + $0x564] ss:$8 sps:$4 sm:$0xff]  }
0x125f   : > { %v10667_v5 = vadd.f32 %v5135_v27, %v4678_v3  ;;  %v5137_v61 = vpop.f32.mrb[9].mxu1  ;;  %v5339_v44 = vmul.f32 %v5333_v32, %v5183_v29  ;;  %v5338_v30 = vadd.f32 1.0, %v5332_v47  ;;  %v8271_v3 = vld [vmem:[%s10952_s16 + $0x540] ss:$8 sps:$4 sm:$0xff]   ;;  %v8277_v29 = vld [vmem:[%s10952_s16 + $0x550] ss:$8 sps:$4 sm:$0xff]  }
0x1260   : > { %v10670_v49 = vadd.f32 %v5137_v61, %v4682_v17  ;;  %v5139_v50 = vpop.f32.mrb[10].mxu1  ;;  %v5340_v20 = vmul.f32 %v5334_v14, %v5184_v53  ;;  %v5253_v53 = vmul.f32 %v10689_v6, %v5247_v35  ;;  %v5289_v14 = vmul.f32 %v5283_v28, %v10656_v11  ;;  %v8283_v47 = vld [vmem:[%s10952_s16 + $0x560] ss:$8 sps:$4 sm:$0xff]   ;;  %v8289_v11 = vld [vmem:[%s10952_s16 + $0x570] ss:$8 sps:$4 sm:$0xff]  }
0x1261   : > { %v10675_v55 = vmul.f32 0.70710677, %v10667_v5  ;;  %v5140_v36 = vpop.f32.mrb[11].mxu1  ;;  %v5344_v43 = vmul.f32 %v5338_v30, %v5188_v59  ;;  %v5345_v22 = vpack.c.bf16 %v5339_v44, %v5339_v44 }
0x1262   : > { %v10678_v45 = vmul.f32 0.70710677, %v10670_v49  ;;  %v5346_v18 = vpack.c.bf16 %v5340_v20, %v5340_v20  ;;  %v8291_v20 = vld [vmem:[%s10952_s16 + $0x574] ss:$8 sps:$4 sm:$0xff]   ;;  %v7120_v30 = vadd.f32 -0.28449672, %v5253_v53 }
0x1263   : > { %v5197_v37 = vand.u32 2147483647, %v10675_v55  ;;  %v5350_v13 = vpack.c.bf16 %v5344_v43, %v5344_v43  ;;  %vm5317_vm13 = vcmp.lt.f32.partialorder %v10675_v55, 0.0  ;;  %v8315_v55 = vld [vmem:[%s10952_s16 + $0x5b4] ss:$8 sps:$4 sm:$0xff]  }
0x1264   : > { %v5198_v63 = vand.u32 2147483647, %v10678_v45  ;;  %5960 = vmatprep.mubr.bf16.mxu1 %v5346_v18  ;;  %vm5318_vm14 = vcmp.lt.f32.partialorder %v10678_v45, 0.0 }
0x1265   : > { %v5203_v48 = vmul.f32 0.3275911, %v5197_v37  ;;  %5961 = vmatmul.mubr.bf16.vlgmr.msra.gmra.mrb[12].mxu1 %v5345_v22  ;;  %v5281_v58 = vsub.f32 0.0, %v5197_v37  ;;  %v8297_v22 = vld [vmem:[%s10952_s16 + $0x584] ss:$8 sps:$4 sm:$0xff]  }
0x1266   : > { %v5204_v52 = vmul.f32 0.3275911, %v5198_v63  ;;  %6011 = vmatpush1.bf16.msra.mxu1 %v8247_v54  ;;  %6042 = vmatprep.mubr.bf16.mxu1 %v5350_v13  ;;  %v5282_v62 = vsub.f32 0.0, %v5198_v63 }
0x1267   : > { %v5209_v1 = vadd.f32 1.0, %v5203_v48  ;;  %6012 = vmatprep.subr.bf16.mxu1 %v8255_v0  ;;  %v5287_v8 = vmul.f32 %v5281_v58, %v5197_v37  ;;  %v5299_v48 = vmul.f32 1.442695, %v5289_v14 }
0x1268   : > { %v5210_v16 = vadd.f32 1.0, %v5204_v52  ;;  %v5288_v12 = vmul.f32 %v5282_v62, %v5198_v63  ;;  %v5265_v52 = vmul.f32 %v10689_v6, %v7120_v30  ;;  %v8301_v62 = vld [vmem:[%s10952_s16 + $0x590] ss:$8 sps:$4 sm:$0xff]   ;;  %v8329_v30 = vld [vmem:[%s10954_s18 + $0x8] sm:$0xff]  }
0x1269   : > { %8364 = vrcp.f32 %v5209_v1  ;;  %v5295_v32 = vmul.f32 1.442695, %v5287_v8 }
0x126a   : > { %8366 = vrcp.f32 %v5210_v16  ;;  %6013 = vmatpush1.bf16.msra.mxu1 %v8253_v57  ;;  %v5297_v61 = vmul.f32 1.442695, %v5288_v12  ;;  %v8295_v16 = vld [vmem:[%s10952_s16 + $0x580] ss:$8 sps:$4 sm:$0xff]  }
0x126b   : > { %6014 = vmatprep.subr.bf16.mxu1 %v8261_v10  ;;  %8368 = vpow2.f32 %v5295_v32 }
0x126c   : > { %8370 = vpow2.f32 %v5297_v61  ;;  %v8316_v61 = vld [vmem:[%s10952_s16 + $0x5c0] ss:$8 sps:$4 sm:$0xff]  }
0x126d   : > { %8372 = vpow2.f32 %v5299_v48  ;;  %v8332_v48 = vld [vmem:[%s10954_s18 + $0x20] sm:$0xff]  }
0x126e   : > { %6015 = vmatpush1.bf16.msra.mxu1 %v8259_v39  ;;  %v8303_v39 = vld [vmem:[%s10952_s16 + $0x594] ss:$8 sps:$4 sm:$0xff]  }
0x126f   : > { %6016 = vmatprep.subr.bf16.mxu1 %v8267_v41  ;;  %v5271_v41 = vadd.f32 0.2548296, %v5265_v52  ;;  %v8338_v52 = vld [vmem:[%s10954_s18 + $0x50] sm:$0xff]  }
0x1271   : > { %v5277_v40 = vmul.f32 %v10689_v6, %v5271_v41 }
0x1272   : > { %6017 = vmatpush1.bf16.msra.mxu1 %v8265_v42 }
0x1273   : > { %v8365_v9 = vpop.eup %8364  ;;  %6018 = vmatprep.subr.bf16.mxu1 %v8273_v2 }
0x1274   : > { %v8367_v15 = vpop.eup %8366  ;;  %v5227_v19 = vmul.f32 1.0614054, %v8365_v9 }
0x1275   : > { %v5228_v23 = vmul.f32 1.0614054, %v8367_v15  ;;  %v8369_v13 = vpop.eup %8368 }
0x1276   : > { %v7112_v17 = vadd.f32 -1.4531521, %v5227_v19  ;;  %6019 = vmatpush1.bf16.msra.mxu1 %v8271_v3  ;;  %v8371_v10 = vpop.eup %8370  ;;  %v5185_v19 = vmul.f32 0.5, %v10667_v5  ;;  %v8307_v3 = vld [vmem:[%s10952_s16 + $0x5a0] ss:$8 sps:$4 sm:$0xff]  }
0x1277   : > { %v7113_v27 = vadd.f32 -1.4531521, %v5228_v23  ;;  %6020 = vmatprep.subr.bf16.mxu1 %v8279_v33  ;;  %v5186_v33 = vmul.f32 0.5, %v10670_v49  ;;  %v8313_v5 = vld [vmem:[%s10952_s16 + $0x5b0] ss:$8 sps:$4 sm:$0xff]  }
0x1278   : > { %v5239_v7 = vmul.f32 %v8365_v9, %v7112_v17  ;;  %v8373_v17 = vpop.eup %8372  ;;  %v8318_v49 = vld [vmem:[%s10952_s16 + $0x5c4] ss:$8 sps:$4 sm:$0xff]  }
0x1279   : > { %v5240_v50 = vmul.f32 %v8367_v15, %v7113_v27  ;;  %v5307_v35 = vmul.f32 %v8373_v17, %v5277_v40 }
0x127a   : > { %v5245_v24 = vadd.f32 1.4214138, %v5239_v7  ;;  %6021 = vmatpush1.bf16.msra.mxu1 %v8277_v29  ;;  %v8321_v29 = vld [vmem:[%s10952_s16 + $0x5d4] ss:$8 sps:$4 sm:$0xff]  }
0x127b   : > { %v5246_v36 = vadd.f32 1.4214138, %v5240_v50  ;;  %6022 = vmatprep.subr.bf16.mxu1 %v8285_v38  ;;  %v5313_v28 = vsub.f32 1.0, %v5307_v35  ;;  %v8324_v38 = vld [vmem:[%s10952_s16 + $0x5e4] ss:$8 sps:$4 sm:$0xff]  }
0x127c   : > { %v5251_v44 = vmul.f32 %v8365_v9, %v5245_v24  ;;  %v8319_v24 = vld [vmem:[%s10952_s16 + $0x5d0] ss:$8 sps:$4 sm:$0xff]   ;;  %v8345_v35 = vld [vmem:[%s10956_s20 + $0x28] sm:$0xff]  }
0x127d   : > { %v5252_v59 = vmul.f32 %v8367_v15, %v5246_v36  ;;  %v5325_v50 = vsub.f32 0.0, %v5313_v28  ;;  %v8322_v36 = vld [vmem:[%s10952_s16 + $0x5e0] ss:$8 sps:$4 sm:$0xff]  }
0x127e   : > { %v7118_v37 = vadd.f32 -0.28449672, %v5251_v44  ;;  %6023 = vmatpush1.bf16.msra.mxu1 %v8283_v47  ;;  %v8327_v44 = vld [vmem:[%s10952_s16 + $0x5f4] ss:$8 sps:$4 sm:$0xff]   ;;  %v5187_v47 = vmul.f32 0.5, %v10650_v31 }
0x127f   : > { %v7119_v63 = vadd.f32 -0.28449672, %v5252_v59  ;;  %6024 = vmatprep.subr.bf16.mxu1 %v8291_v20  ;;  %v5331_v53 = vsel %vm5319_vm15, %v5325_v50, %v5313_v28  ;;  %v8328_v20 = vld [vmem:[%s10954_s18] sm:$0xff]   ;;  %v8330_v31 = vld [vmem:[%s10954_s18 + $0x10] sm:$0xff]  }
0x1280   : > { %v5263_v18 = vmul.f32 %v8365_v9, %v7118_v37  ;;  %v5337_v14 = vadd.f32 1.0, %v5331_v53 }
0x1281   : > { %v5264_v54 = vmul.f32 %v8367_v15, %v7119_v63  ;;  %v8331_v63 = vld [vmem:[%s10954_s18 + $0x18] sm:$0xff]  }
0x1282   : > { %v5269_v43 = vadd.f32 0.2548296, %v5263_v18  ;;  %6025 = vmatpush1.bf16.msra.mxu1 %v8289_v11  ;;  %v5343_v59 = vmul.f32 %v5337_v14, %v5187_v47  ;;  %v8333_v18 = vld [vmem:[%s10954_s18 + $0x28] sm:$0xff]   ;;  %v8334_v11 = vld [vmem:[%s10954_s18 + $0x30] sm:$0xff]  }
0x1283   : > { %v5270_v0 = vadd.f32 0.2548296, %v5264_v54  ;;  %6026 = vmatprep.subr.bf16.mxu1 %v8297_v22  ;;  %v8335_v54 = vld [vmem:[%s10954_s18 + $0x38] sm:$0xff]   ;;  %v8337_v22 = vld [vmem:[%s10954_s18 + $0x48] sm:$0xff]  }
0x1284   : > { %v5275_v1 = vmul.f32 %v8365_v9, %v5269_v43  ;;  %v8309_v9 = vld [vmem:[%s10952_s16 + $0x5a4] ss:$8 sps:$4 sm:$0xff]   ;;  %v5349_v37 = vpack.c.bf16 %v5343_v59, %v5343_v59 }
0x1285   : > { %v5276_v57 = vmul.f32 %v8367_v15, %v5270_v0  ;;  %v8336_v43 = vld [vmem:[%s10954_s18 + $0x40] sm:$0xff]   ;;  %v8339_v0 = vld [vmem:[%s10954_s18 + $0x58] sm:$0xff]  }
0x1286   : > { %v5305_v34 = vmul.f32 %v8369_v13, %v5275_v1  ;;  %6027 = vmatpush1.bf16.msra.mxu1 %v8295_v16 }
0x1287   : > { %v5306_v56 = vmul.f32 %v8371_v10, %v5276_v57  ;;  %6028 = vmatprep.subr.bf16.mxu1 %v8303_v39 }
0x1288   : > { %v5311_v58 = vsub.f32 1.0, %v5305_v34 }
0x1289   : > { %v5312_v42 = vsub.f32 1.0, %v5306_v56 }
0x128a   : > { %v5323_v2 = vsub.f32 0.0, %v5311_v58  ;;  %6029 = vmatpush1.bf16.msra.mxu1 %v8301_v62 }
0x128b   : > { %v5324_v8 = vsub.f32 0.0, %v5312_v42  ;;  %6030 = vmatprep.subr.bf16.mxu1 %v8309_v9 }
0x128c   : > { %v5329_v15 = vsel %vm5317_vm13, %v5323_v2, %v5311_v58 }
0x128d   : > { %v5335_v12 = vadd.f32 1.0, %v5329_v15  ;;  %v5330_v23 = vsel %vm5318_vm14, %v5324_v8, %v5312_v42 }
0x128e   : > { %v5336_v6 = vadd.f32 1.0, %v5330_v23  ;;  %6031 = vmatpush1.bf16.msra.mxu1 %v8307_v3 }
0x128f   : > { %v5341_v45 = vmul.f32 %v5335_v12, %v5185_v19  ;;  %6032 = vmatprep.subr.bf16.mxu1 %v8315_v55  ;;  %v8340_v55 = vld [vmem:[%s10956_s20] sm:$0xff]  }
0x1290   : > { %v5342_v32 = vmul.f32 %v5336_v6, %v5186_v33 }
0x1291   : > { %v5347_v7 = vpack.c.bf16 %v5341_v45, %v5341_v45  ;;  %v8346_v45 = vld [vmem:[%s10956_s20 + $0x30] sm:$0xff]  }
0x1292   : > { %v5348_v27 = vpack.c.bf16 %v5342_v32, %v5342_v32  ;;  %6033 = vmatpush1.bf16.msra.mxu1 %v8313_v5  ;;  %v8347_v32 = vld [vmem:[%s10956_s20 + $0x38] sm:$0xff]   ;;  %v7315_v5 = vld [vmem:[%s10955_s19] ss:$0 sm:$0xff] }
0x1293   : > { %6034 = vmatprep.subr.bf16.mxu1 %v8318_v49 }
0x1294   : > { %6001 = vmatprep.mubr.bf16.mxu0 %v5348_v27 }
0x1295   : > { %6002 = vmatmul.mubr.bf16.vlgmr.msra.gmra.mrb[8].mxu0 %v5347_v7 }
0x1296   : > { %6035 = vmatpush1.bf16.msra.mxu1 %v8316_v61  ;;  %6177 = vmatpush1.bf16.msra.mxu0 %v8328_v20 }
0x1297   : > { %6036 = vmatprep.subr.bf16.mxu1 %v8321_v29  ;;  %6178 = vmatprep.subr.bf16.mxu0 %v8490_v60 }
0x129a   : > { %6037 = vmatpush1.bf16.msra.mxu1 %v8319_v24  ;;  %6179 = vmatpush1.bf16.msra.mxu0 %v8329_v30 }
0x129b   : > { %6038 = vmatprep.subr.bf16.mxu1 %v8324_v38  ;;  %6180 = vmatprep.subr.bf16.mxu0 %v8490_v60 }
0x129e   : > { %6039 = vmatpush1.bf16.msra.mxu1 %v8322_v36  ;;  %6181 = vmatpush1.bf16.msra.mxu0 %v8330_v31 }
0x129f   : > { %6040 = vmatprep.subr.bf16.mxu1 %v8327_v44  ;;  %6182 = vmatprep.subr.bf16.mxu0 %v8490_v60 }
0x12a2   : > { %6041 = vmatpush1.bf16.msra.mxu1 %v8325_v51  ;;  %6183 = vmatpush1.bf16.msra.mxu0 %v8331_v63 }
0x12a3   : > { %6184 = vmatprep.subr.bf16.mxu0 %v8490_v60 }
0x12a5   : > { %6043 = vmatmul.mubr.bf16.vlgmr.msra.gmra.mrb[16].mxu1 %v5349_v37 }
0x12a6   : > { %6185 = vmatpush1.bf16.msra.mxu0 %v8332_v48 }
0x12a7   : > { %6186 = vmatprep.subr.bf16.mxu0 %v8490_v60 }
0x12aa   : > { %6187 = vmatpush1.bf16.msra.mxu0 %v8333_v18 }
0x12ab   : > { %6188 = vmatprep.subr.bf16.mxu0 %v8490_v60 }
0x12ae   : > { %6189 = vmatpush1.bf16.msra.mxu0 %v8334_v11 }
0x12af   : > { %6190 = vmatprep.subr.bf16.mxu0 %v8490_v60 }
0x12b2   : > { %6191 = vmatpush1.bf16.msra.mxu0 %v8335_v54 }
0x12b3   : > { %6192 = vmatprep.subr.bf16.mxu0 %v8490_v60 }
0x12b6   : > { %6193 = vmatpush1.bf16.msra.mxu0 %v8336_v43 }
0x12b7   : > { %6194 = vmatprep.subr.bf16.mxu0 %v8490_v60 }
0x12ba   : > { %6195 = vmatpush1.bf16.msra.mxu0 %v8337_v22 }
0x12bb   : > { %6196 = vmatprep.subr.bf16.mxu0 %v8490_v60 }
0x12be   : > { %6197 = vmatpush1.bf16.msra.mxu0 %v8338_v52 }
0x12bf   : > { %6198 = vmatprep.subr.bf16.mxu0 %v8490_v60  ;;  %v7314_v60 = vld [vmem:[%s10953_s17 + $0x2] sm:$0x3] }
0x12c0   : > { %v6059_v2 = vrot.slane %v7314_v60, %v8871_v26  ;;  %v6063_v15 = vrot.slane %v7314_v60, %v8868_v25  ;;  %v8341_v25 = vld [vmem:[%s10956_s20 + $0x8] sm:$0xff]   ;;  %v8342_v26 = vld [vmem:[%s10956_s20 + $0x10] sm:$0xff]  }
0x12c2   : > { %6199 = vmatpush1.bf16.msra.mxu0 %v8339_v0 }
0x12c3   : > { %7366 = vmatprep.subr.bf16.mxu0 %v8486_v4 }
0x1338   : > { %v5962_v1 = vpop.f32.mrb[12].mxu1 }
0x1339   : > { %v5964_v13 = vpop.f32.mrb[13].mxu1 }
0x133a   : > { %v5966_v16 = vpop.f32.mrb[14].mxu1 }
0x133b   : > { %v5967_v57 = vpop.f32.mrb[15].mxu1 }
0x1368   : > { %v6003_v10 = vpop.f32.mrb[8].mxu0 }
0x1369   : > { %v6004_v34 = vadd.f32 %v6003_v10, %v5962_v1  ;;  %v6005_v39 = vpop.f32.mrb[9].mxu0 }
0x136a   : > { %v6006_v41 = vadd.f32 %v6005_v39, %v5964_v13  ;;  %v6007_v56 = vpop.f32.mrb[10].mxu0 }
0x136b   : > { %v6008_v58 = vpop.f32.mrb[11].mxu0 }
0x1378   : > { %v6044_v62 = vpop.f32.mrb[16].mxu1 }
0x1379   : > { %v6045_v42 = vadd.f32 %v6044_v62, %v6004_v34  ;;  %v6046_v9 = vpop.f32.mrb[17].mxu1 }
0x137a   : > { %v6047_v40 = vadd.f32 %v6046_v9, %v6006_v41  ;;  %v6048_v8 = vpop.f32.mrb[18].mxu1 }
0x137b   : > { %v6051_v19 = vadd.f32 %v10182_v21, %v6045_v42  ;;  %v6049_v12 = vpop.f32.mrb[19].mxu1  ;;  %v8343_v21 = vld [vmem:[%s10956_s20 + $0x18] sm:$0xff]  }
0x137c   : > { %v6052_v3 = vadd.f32 %v10184_v46, %v6047_v40  ;;  %v8344_v46 = vld [vmem:[%s10956_s20 + $0x20] sm:$0xff]  }
0x137d   : > { %v6066_v23 = vadd.f32 %v6059_v2, %v6051_v19 }
0x137e   : > { %v6067_v17 = vadd.f32 %v6063_v15, %v6052_v3 }
0x137f   : > { %v6068_v6 = vpack.c.bf16 %v6066_v23, %v6066_v23 }
0x1380   : > { %v6069_v33 = vpack.c.bf16 %v6067_v17, %v6067_v17 }
0x1382   : > { %7328 = vmatprep.mubr.msk.bf16.mxu0 %vm929_vm2, %v6069_v33 }
0x1383   : > { %6209 = vmatmul.mubr.bf16.vlgmr.msra.gmra.mrb[12].mxu0 %v6068_v6 }
0x1384   : > { %7367 = vmatpush3.bf16.msra.mxu0 %v8340_v55  ;;  %7382 = vmatprep.mubr.msk.bf16.mxu0 %vm8487_vm0, %v8486_v4 }
0x1385   : > { %7368 = vmatprep.subr.bf16.mxu0 %v8486_v4 }
0x1388   : > { %7369 = vmatpush3.bf16.msra.mxu0 %v8341_v25 }
0x1389   : > { %7370 = vmatprep.subr.bf16.mxu0 %v8486_v4 }
0x138c   : > { %7371 = vmatpush3.bf16.msra.mxu0 %v8342_v26 }
0x138d   : > { %7372 = vmatprep.subr.bf16.mxu0 %v8486_v4 }
0x1390   : > { %7373 = vmatpush3.bf16.msra.mxu0 %v8343_v21 }
0x1391   : > { %7374 = vmatprep.subr.bf16.mxu0 %v8486_v4 }
0x1394   : > { %7375 = vmatpush3.bf16.msra.mxu0 %v8344_v46 }
0x1395   : > { %7376 = vmatprep.subr.bf16.mxu0 %v8486_v4 }
0x1398   : > { %7377 = vmatpush3.bf16.msra.mxu0 %v8345_v35 }
0x1399   : > { %7378 = vmatprep.subr.bf16.mxu0 %v8486_v4 }
0x139c   : > { %7379 = vmatpush3.bf16.msra.mxu0 %v8346_v45 }
0x139d   : > { %7380 = vmatprep.subr.bf16.mxu0 %v8486_v4  ;;  %v7329_v4 = vld [vmem:[%s10957_s21] ss:$0 sm:$0xff] }
0x13a0   : > { %7381 = vmatpush3.bf16.msra.mxu0 %v8347_v32 }
0x1456   : > { %v6210_v27 = vpop.f32.mrb[12].mxu0 }
0x1457   : > { %v6211_v49 = vadd.f32 %v7315_v5, %v6210_v27  ;;  %v6212_v28 = vpop.f32.mrb[13].mxu0 }
0x1458   : > { %v6213_v7 = vpop.f32.mrb[14].mxu0 }
0x1459   : > { %v6216_v61 = vpack.c.bf16 %v6211_v49, %v6211_v49  ;;  %v6214_v29 = vpop.f32.mrb[15].mxu0 }
0x145b   : > { %7383 = vmatmul.mubr.bf16.vlgmr.msra.gmra.mrb[16].mxu0 %v6216_v61 }
0x152e   : > { %v6322_v50 = vpop.f32.mrb[16].mxu0 }
0x152f   : > { %v6323_v24 = vadd.f32 %v7329_v4, %v6322_v50  ;;  %v7384_v38 = vpop.f32.mrb[17].mxu0 }
0x1530   : > { %v6325_v53 = vpop.f32.mrb[18].mxu0 }
0x1531   : > { %6328 = vst [vmem:[%s9003_s26] sm:$0xff] %v6323_v24  ;;  %v7385_v36 = vpop.f32.mrb[19].mxu0 }
0x1532   : > { %8387 = shalt.err (!%p8384_p11)
}
0x1533   : > { %s8388_s24 = scalar_lea.hbm %s10891_s5, 128  ;;  %s8392_s25 = scalar_lea.hbm %s11007_s0, 256 }
0x1534   : > { %p8389_p12 = scmp.ne.s32.totalorder %s10891_s5, %s8388_s24  ;;  %p8393_p1 = scmp.lt.u32.totalorder %s10891_s5, %s11007_s0 }
0x1535   : > { %p8394_p2 = scmp.lt.u32.totalorder %s8392_s25, %s8388_s24  ;;  %p8396_p4 = scmp.lt.u32.totalorder %s8388_s24, %s10891_s5 }
0x1536   : > { %p8390_p13 = pnand %p8389_p12, %p8648_p6 }
0x1537   : > { %p8395_p3 = por %p8394_p2, %p8393_p1 }
0x1538   : > { %p8391_p0 = pneg %p8390_p13 }
0x1539   : > { %p8397_p5 = por %p8396_p4, %p8395_p3 }
0x153b   : > { %p8398_p7 = pnand %p8397_p5, %p8391_p0 }
0x153d   : > { %8401 = shalt.err (!%p8398_p7)
}
0x153e   : > { %7400 = dma.vmem_to_hbm [thread:$0]  (%p8648_p6), %s10893_s3, 128, %s10891_s5, %s6330_s28  }
0x153f PF: > { %s11008_s23 = sld [smem:[#allocation6_spill]]  ;;  %p7403_p10 = pnand %p6444_p9, %p8652_p8 }
0x1545   : > { %s6355_s2 = sand.u32 1, %s11008_s23  }
0x1546   : > { %s6356_s27 = scalar_lea.sflag [#allocation4], %s6355_s2 }
0x1547   : > { %8443 = dma.done.wait (!%p7403_p10), %s6356_s27, 128  }
0x1548   : > { %8445 = vsyncadd (!%p7403_p10), %s6356_s27, 4294967168  ;;  %s11011_s30 = sld [smem:[#allocation10_spill]]  ;;  %s11012_s3 = sld [smem:[#allocation7_spill]] }
0x1549   : > { %s11013_s28 = sld [smem:[#allocation8_spill]]  ;;  %s11014_s29 = sld [smem:[#allocation11_spill]] }
0x154e   : > { %p32_p11 = scmp.ge.s32.totalorder %s11011_s30, 4  }
0x1550   :  { %34 = sbr.rel (!%p32_p11) target bundleno = 12 (0xc), region = 244 }
0x1557   :  { %6361 = vsyncpa [#allocation4], 1 }
0x1558   :  { %6363 = vsyncpa [#allocation4 + $0x1], 1 }

</bundles_post_ra>
